<compile_context>
chip_gen: v7x
topology: tpu7x:2x2x1
jax: 0.10.0
libtpu: 0.0.40
codegen_flags: <defaults>
</compile_context>

<pallas_src>
import functools

import jax
import jax.numpy as jnp
from jax.experimental import pallas as pl
from jax.experimental.pallas import tpu as pltpu


def _round_up(n, m):
    return ((n + m - 1) // m) * m


# ---------------------------------------------------------------------------
# Pallas kernels
# ---------------------------------------------------------------------------
def _conv_pool_kernel(cols_ref, w_ref, b_ref, o_ref):
    # cols_ref: (1, 4, Kp, N) bf16   w_ref: (OC, Kp) bf16
    # b_ref:    (OC, 1)      f32     o_ref: (1, OC, N) f32
    w = w_ref[...]
    m = jnp.dot(w, cols_ref[0, 0], preferred_element_type=jnp.float32)
    for q in range(1, 4):  # static unroll: 4 quadrants of the 2x2 pool window
        m = jnp.maximum(
            m, jnp.dot(w, cols_ref[0, q], preferred_element_type=jnp.float32))
    # max-pool done (max over quadrants); bias + sigmoid in f32.
    o_ref[0] = jax.nn.sigmoid(m + b_ref[...])


def _mlp_kernel(x_ref, w1_ref, b1_ref, w2_ref, b2_ref, w3_ref, b3_ref, o_ref):
    # bf16 matmul operands, f32 accumulation / bias / sigmoid epilogue.
    h = jnp.dot(x_ref[...].astype(jnp.bfloat16), w1_ref[...],
                preferred_element_type=jnp.float32) + b1_ref[...]
    h = jax.nn.sigmoid(h)
    h = jnp.dot(h.astype(jnp.bfloat16), w2_ref[...],
                preferred_element_type=jnp.float32) + b2_ref[...]
    h = jax.nn.sigmoid(h)
    o_ref[...] = jnp.dot(h.astype(jnp.bfloat16), w3_ref[...],
                         preferred_element_type=jnp.float32) + b3_ref[...]


# ---------------------------------------------------------------------------
# XLA glue: pooling-quadrant im2col
# ---------------------------------------------------------------------------
# TODO(synk): the patch/quadrant gather below stays as XLA glue; for very large
# batches it could be moved in-kernel as k*k shifted-matmul accumulation.
def _pool_quadrant_cols(x, k, k_pad):
    """(B,C,H,W) NCHW -> (B, 4, k_pad, POH*POW) bf16 pooling-quadrant im2col.

    K ordering is (c, di, dj), matching torch's w.reshape(OC, C*k*k).
    Quadrant q = 2*qi + qj holds conv-output pixels (2*ph + qi, 2*pw + qj).
    """
    B, C, H, W = x.shape
    OH, OW = H - k + 1, W - k + 1
    POH, POW = OH // 2, OW // 2
    K = C * k * k
    # patches[b, c, di, dj, oh, ow] = x[b, c, oh + di, ow + dj]
    patches = jnp.stack(
        [jnp.stack([x[:, :, di:di + OH, dj:dj + OW] for dj in range(k)], axis=2)
         for di in range(k)],
        axis=2)                                            # (B, C, k, k, OH, OW)
    quads = []
    for qi in range(2):
        for qj in range(2):
            q = patches[:, :, :, :, qi::2, qj::2]          # (B, C, k, k, POH, POW)
            quads.append(q.reshape(B, K, POH * POW))
    cols = jnp.stack(quads, axis=1)                        # (B, 4, K, N)
    if k_pad > K:
        cols = jnp.pad(cols, ((0, 0), (0, 0), (0, k_pad - K), (0, 0)))
    return cols.astype(jnp.bfloat16)


# ---------------------------------------------------------------------------
# pallas_call wrappers
# ---------------------------------------------------------------------------
def conv_sigmoid_pool(x, w2, b2, k):
    """Fused Conv2d(k, stride=1, valid) + bias + sigmoid + MaxPool2d(2,2), NCHW."""
    B, C, H, W = x.shape
    OC, Kp = w2.shape
    OH, OW = H - k + 1, W - k + 1
    assert OH % 2 == 0 and OW % 2 == 0, "2x2 pool expects even conv output"
    POH, POW = OH // 2, OW // 2
    N = POH * POW

    cols = _pool_quadrant_cols(x, k, Kp)                   # (B, 4, Kp, N) bf16

    out = pl.pallas_call(
        _conv_pool_kernel,
        out_shape=jax.ShapeDtypeStruct((B, OC, N), jnp.float32),
        grid=(B,),
        in_specs=[
            pl.BlockSpec((1, 4, Kp, N), lambda b: (b, 0, 0, 0)),
            pl.BlockSpec((OC, Kp), lambda b: (0, 0)),
            pl.BlockSpec((OC, 1), lambda b: (0, 0)),
        ],
        out_specs=pl.BlockSpec((1, OC, N), lambda b: (b, 0, 0)),
        compiler_params=pltpu.CompilerParams(
            dimension_semantics=("parallel",),
            vmem_limit_bytes=32 * 1024 * 1024,
        ),
    )(cols, w2, b2)
    return out.reshape(B, OC, POH, POW)                    # free reshape, NCHW


def mlp_fused(x, packed):
    """sigmoid(x@W1+b1) -> sigmoid(.@W2+b2) -> .@W3+b3 in one pallas_call."""
    B, K = x.shape
    w1, b1 = packed["fc1_w"], packed["fc1_b"]
    w2, b2 = packed["fc2_w"], packed["fc2_b"]
    w3, b3 = packed["fc3_w"], packed["fc3_b"]
    NP = w3.shape[1]

    def full(shape):
        return pl.BlockSpec(shape, lambda i: (0,) * len(shape))

    return pl.pallas_call(
        _mlp_kernel,
        out_shape=jax.ShapeDtypeStruct((B, NP), jnp.float32),
        grid=(1,),
        in_specs=[
            full((B, K)),
            full(w1.shape), full(b1.shape),
            full(w2.shape), full(b2.shape),
            full(w3.shape), full(b3.shape),
        ],
        out_specs=full((B, NP)),
        compiler_params=pltpu.CompilerParams(
            dimension_semantics=("arbitrary",),
            vmem_limit_bytes=32 * 1024 * 1024,
        ),
    )(x, w1, b1, w2, b2, w3, b3)


# ---------------------------------------------------------------------------
# Parameters: torch-layout init + one-time packing (transpose / pad / bf16)
# ---------------------------------------------------------------------------
def init_params(key, num_classes=2):
    ks = jax.random.split(key, 10)

    def u(k, shape, fan_in):
        bound = 1.0 / float(fan_in) ** 0.5
        return jax.random.uniform(k, shape, jnp.float32, -bound, bound)

    return {
        "conv1_w": u(ks[0], (6, 3, 5, 5), 3 * 5 * 5),
        "conv1_b": u(ks[1], (6,), 3 * 5 * 5),
        "conv2_w": u(ks[2], (16, 6, 5, 5), 6 * 5 * 5),
        "conv2_b": u(ks[3], (16,), 6 * 5 * 5),
        "fc1_w": u(ks[4], (256, 16 * 13 * 13), 16 * 13 * 13),
        "fc1_b": u(ks[5], (256,), 16 * 13 * 13),
        "fc2_w": u(ks[6], (64, 256), 256),
        "fc2_b": u(ks[7], (64,), 256),
        "fc3_w": u(ks[8], (num_classes, 64), 64),
        "fc3_b": u(ks[9], (num_classes,), 64),
    }


def pack_params(params, num_classes=2):
    """One-time layout work: flatten/pad/transpose weights, cast to bf16."""
    def conv_pack(w, b):
        OC, C, k, _ = w.shape
        K = C * k * k
        Kp = _round_up(K, 128)
        w2 = jnp.pad(w.reshape(OC, K), ((0, 0), (0, Kp - K))).astype(jnp.bfloat16)
        return w2, b.reshape(OC, 1).astype(jnp.float32)

    c1w, c1b = conv_pack(params["conv1_w"], params["conv1_b"])
    c2w, c2b = conv_pack(params["conv2_w"], params["conv2_b"])

    NP = _round_up(num_classes, 128)                       # lane-dense fc3 output
    w3 = jnp.pad(params["fc3_w"].T, ((0, 0), (0, NP - num_classes)))
    b3 = jnp.pad(params["fc3_b"], (0, NP - num_classes)).reshape(1, NP)

    return {
        "conv1_w": c1w, "conv1_b": c1b,
        "conv2_w": c2w, "conv2_b": c2b,
        "fc1_w": params["fc1_w"].T.astype(jnp.bfloat16),   # (2704, 256)
        "fc1_b": params["fc1_b"].reshape(1, -1).astype(jnp.float32),
        "fc2_w": params["fc2_w"].T.astype(jnp.bfloat16),   # (256, 64)
        "fc2_b": params["fc2_b"].reshape(1, -1).astype(jnp.float32),
        "fc3_w": w3.astype(jnp.bfloat16),                  # (64, NP)
        "fc3_b": b3.astype(jnp.float32),
    }


# ---------------------------------------------------------------------------
# Forward pass (semantics match the PyTorch LeNet5 reference)
# ---------------------------------------------------------------------------
def lenet5_forward(packed, x, *, num_classes=2):
    # x: (B, 3, 64, 64) NCHW float32
    out = conv_sigmoid_pool(x, packed["conv1_w"], packed["conv1_b"], k=5)    # (B, 6, 30, 30)
    out = conv_sigmoid_pool(out, packed["conv2_w"], packed["conv2_b"], k=5)  # (B, 16, 13, 13)
    B = out.shape[0]
    out = out.reshape(B, -1)                               # (B, 2704) NCHW flatten == torch
    logits_padded = mlp_fused(out, packed)                 # (B, 128)
    return logits_padded[:, :num_classes]                  # (B, num_classes)


if __name__ == "__main__":
    key = jax.random.PRNGKey(0)
    pkey, xkey = jax.random.split(key)
    params = init_params(pkey, num_classes=2)
    packed = pack_params(params, num_classes=2)
    # 64x64 input is required so the flatten matches linear1's 16*13*13 fan-in.
    x = jax.random.normal(xkey, (2, 3, 64, 64), dtype=jnp.float32)

    fwd = jax.jit(functools.partial(lenet5_forward, num_classes=2))
    logits = fwd(packed, x)
    jax.block_until_ready(logits)

    assert logits.shape == (2, 2) and logits.dtype == jnp.float32
    print("KERNEL_OK")
</pallas_src>

<mosaic_0001>
module attributes {stable_mosaic.version = 11 : i64} {
  func.func @_conv_pool_kernel(%arg0: i32, %arg1: memref<1x4x128x900xbf16, #tpu.memory_space<vmem>>, %arg2: memref<6x128xbf16, #tpu.memory_space<vmem>>, %arg3: memref<6x1xf32, #tpu.memory_space<vmem>>, %arg4: memref<1x6x900xf32, #tpu.memory_space<vmem>>) attributes {dimension_semantics = [#tpu.dimension_semantics<parallel>], iteration_bounds = array<i64: 2>, scalar_prefetch = 0 : i64, scratch_operands = 0 : i64, tpu.core_type = #tpu.core_type<tc>, window_params = [{transform_indices = @transform_0, window_bounds = array<i64: 1, 4, 128, 900>}, {pipeline_mode = #tpu.pipeline_mode<synchronous>, transform_indices = @transform_1, window_bounds = array<i64: 6, 128>}, {pipeline_mode = #tpu.pipeline_mode<synchronous>, transform_indices = @transform_2, window_bounds = array<i64: 6, 1>}, {transform_indices = @transform_3, window_bounds = array<i64: 1, 6, 900>}]} {
    %c0 = arith.constant 0 : index
    %c0_0 = arith.constant 0 : index
    %0 = vector.load %arg2[%c0, %c0_0] : memref<6x128xbf16, #tpu.memory_space<vmem>>, vector<6x128xbf16>
    %c0_1 = arith.constant 0 : index
    %c0_2 = arith.constant 0 : index
    %c0_3 = arith.constant 0 : index
    %c0_4 = arith.constant 0 : index
    %1 = vector.load %arg1[%c0_1, %c0_2, %c0_3, %c0_4] : memref<1x4x128x900xbf16, #tpu.memory_space<vmem>>, vector<1x1x128x900xbf16>
    %2 = vector.shape_cast %1 : vector<1x1x128x900xbf16> to vector<128x900xbf16>
    %cst = arith.constant dense<0.000000e+00> : vector<6x900xf32>
    %3 = tpu.matmul %0, %2, %cst {dimension_numbers = #tpu.dot_dimension_numbers<[1], [0], [0], [1], [0, 0, 1, 1], [], []>} : vector<6x128xbf16>, vector<128x900xbf16>, vector<6x900xf32> -> vector<6x900xf32>
    %c0_5 = arith.constant 0 : index
    %c1 = arith.constant 1 : index
    %c0_6 = arith.constant 0 : index
    %c0_7 = arith.constant 0 : index
    %4 = vector.load %arg1[%c0_5, %c1, %c0_6, %c0_7] : memref<1x4x128x900xbf16, #tpu.memory_space<vmem>>, vector<1x1x128x900xbf16>
    %5 = vector.shape_cast %4 : vector<1x1x128x900xbf16> to vector<128x900xbf16>
    %cst_8 = arith.constant dense<0.000000e+00> : vector<6x900xf32>
    %6 = tpu.matmul %0, %5, %cst_8 {dimension_numbers = #tpu.dot_dimension_numbers<[1], [0], [0], [1], [0, 0, 1, 1], [], []>} : vector<6x128xbf16>, vector<128x900xbf16>, vector<6x900xf32> -> vector<6x900xf32>
    %7 = arith.maximumf %3, %6 : vector<6x900xf32>
    %c0_9 = arith.constant 0 : index
    %c2 = arith.constant 2 : index
    %c0_10 = arith.constant 0 : index
    %c0_11 = arith.constant 0 : index
    %8 = vector.load %arg1[%c0_9, %c2, %c0_10, %c0_11] : memref<1x4x128x900xbf16, #tpu.memory_space<vmem>>, vector<1x1x128x900xbf16>
    %9 = vector.shape_cast %8 : vector<1x1x128x900xbf16> to vector<128x900xbf16>
    %cst_12 = arith.constant dense<0.000000e+00> : vector<6x900xf32>
    %10 = tpu.matmul %0, %9, %cst_12 {dimension_numbers = #tpu.dot_dimension_numbers<[1], [0], [0], [1], [0, 0, 1, 1], [], []>} : vector<6x128xbf16>, vector<128x900xbf16>, vector<6x900xf32> -> vector<6x900xf32>
    %11 = arith.maximumf %7, %10 : vector<6x900xf32>
    %c0_13 = arith.constant 0 : index
    %c3 = arith.constant 3 : index
    %c0_14 = arith.constant 0 : index
    %c0_15 = arith.constant 0 : index
    %12 = vector.load %arg1[%c0_13, %c3, %c0_14, %c0_15] : memref<1x4x128x900xbf16, #tpu.memory_space<vmem>>, vector<1x1x128x900xbf16>
    %13 = vector.shape_cast %12 : vector<1x1x128x900xbf16> to vector<128x900xbf16>
    %cst_16 = arith.constant dense<0.000000e+00> : vector<6x900xf32>
    %14 = tpu.matmul %0, %13, %cst_16 {dimension_numbers = #tpu.dot_dimension_numbers<[1], [0], [0], [1], [0, 0, 1, 1], [], []>} : vector<6x128xbf16>, vector<128x900xbf16>, vector<6x900xf32> -> vector<6x900xf32>
    %15 = arith.maximumf %11, %14 : vector<6x900xf32>
    %c0_17 = arith.constant 0 : index
    %c0_18 = arith.constant 0 : index
    %16 = vector.load %arg3[%c0_17, %c0_18] : memref<6x1xf32, #tpu.memory_space<vmem>>, vector<6x1xf32>
    %17 = vector.broadcast %16 : vector<6x1xf32> to vector<6x900xf32>
    %18 = arith.addf %15, %17 : vector<6x900xf32>
    %19 = arith.negf %18 : vector<6x900xf32>
    %20 = math.exp %19 : vector<6x900xf32>
    %cst_19 = arith.constant 1.000000e+00 : f32
    %21 = vector.broadcast %cst_19 : f32 to vector<6x900xf32>
    %22 = arith.addf %21, %20 : vector<6x900xf32>
    %23 = arith.divf %21, %22 : vector<6x900xf32>
    %c0_20 = arith.constant 0 : index
    %c0_21 = arith.constant 0 : index
    %c0_22 = arith.constant 0 : index
    %24 = vector.load %arg4[%c0_20, %c0_21, %c0_22] : memref<1x6x900xf32, #tpu.memory_space<vmem>>, vector<1x6x900xf32>
    %25 = vector.shape_cast %24 : vector<1x6x900xf32> to vector<6x900xf32>
    %26 = vector.shape_cast %23 : vector<6x900xf32> to vector<1x6x900xf32>
    tpu.vector_store %arg4[%c0_20, %c0_21, %c0_22], %26 {strides = array<i32>} : memref<1x6x900xf32, #tpu.memory_space<vmem>>, vector<1x6x900xf32>,
    return
  }
  func.func @transform_0(%arg0: i32) -> (i32, i32, i32, i32) {
    %c0_i32 = arith.constant 0 : i32
    %c0_i32_0 = arith.constant 0 : i32
    %c0_i32_1 = arith.constant 0 : i32
    %c0_i32_2 = arith.constant 0 : i32
    return %arg0, %c0_i32, %c0_i32_0, %c0_i32_1 : i32, i32, i32, i32
  }
  func.func @transform_1(%arg0: i32) -> (i32, i32) {
    %c0_i32 = arith.constant 0 : i32
    %c0_i32_0 = arith.constant 0 : i32
    %c0_i32_1 = arith.constant 0 : i32
    return %c0_i32, %c0_i32_0 : i32, i32
  }
  func.func @transform_2(%arg0: i32) -> (i32, i32) {
    %c0_i32 = arith.constant 0 : i32
    %c0_i32_0 = arith.constant 0 : i32
    %c0_i32_1 = arith.constant 0 : i32
    return %c0_i32, %c0_i32_0 : i32, i32
  }
  func.func @transform_3(%arg0: i32) -> (i32, i32, i32) {
    %c0_i32 = arith.constant 0 : i32
    %c0_i32_0 = arith.constant 0 : i32
    %c0_i32_1 = arith.constant 0 : i32
    return %arg0, %c0_i32, %c0_i32_0 : i32, i32, i32
  }
}

module attributes {stable_mosaic.version = 11 : i64} {
  func.func @_conv_pool_kernel(%arg0: i32, %arg1: memref<1x4x256x169xbf16, #tpu.memory_space<vmem>>, %arg2: memref<16x256xbf16, #tpu.memory_space<vmem>>, %arg3: memref<16x1xf32, #tpu.memory_space<vmem>>, %arg4: memref<1x16x169xf32, #tpu.memory_space<vmem>>) attributes {dimension_semantics = [#tpu.dimension_semantics<parallel>], iteration_bounds = array<i64: 2>, scalar_prefetch = 0 : i64, scratch_operands = 0 : i64, tpu.core_type = #tpu.core_type<tc>, window_params = [{transform_indices = @transform_0, window_bounds = array<i64: 1, 4, 256, 169>}, {pipeline_mode = #tpu.pipeline_mode<synchronous>, transform_indices = @transform_1, window_bounds = array<i64: 16, 256>}, {pipeline_mode = #tpu.pipeline_mode<synchronous>, transform_indices = @transform_2, window_bounds = array<i64: 16, 1>}, {transform_indices = @transform_3, window_bounds = array<i64: 1, 16, 169>}]} {
    %c0 = arith.constant 0 : index
    %c0_0 = arith.constant 0 : index
    %0 = vector.load %arg2[%c0, %c0_0] : memref<16x256xbf16, #tpu.memory_space<vmem>>, vector<16x256xbf16>
    %c0_1 = arith.constant 0 : index
    %c0_2 = arith.constant 0 : index
    %c0_3 = arith.constant 0 : index
    %c0_4 = arith.constant 0 : index
    %1 = vector.load %arg1[%c0_1, %c0_2, %c0_3, %c0_4] : memref<1x4x256x169xbf16, #tpu.memory_space<vmem>>, vector<1x1x256x169xbf16>
    %2 = vector.shape_cast %1 : vector<1x1x256x169xbf16> to vector<256x169xbf16>
    %cst = arith.constant dense<0.000000e+00> : vector<16x169xf32>
    %3 = tpu.matmul %0, %2, %cst {dimension_numbers = #tpu.dot_dimension_numbers<[1], [0], [0], [1], [0, 0, 1, 1], [], []>} : vector<16x256xbf16>, vector<256x169xbf16>, vector<16x169xf32> -> vector<16x169xf32>
    %c0_5 = arith.constant 0 : index
    %c1 = arith.constant 1 : index
    %c0_6 = arith.constant 0 : index
    %c0_7 = arith.constant 0 : index
    %4 = vector.load %arg1[%c0_5, %c1, %c0_6, %c0_7] : memref<1x4x256x169xbf16, #tpu.memory_space<vmem>>, vector<1x1x256x169xbf16>
    %5 = vector.shape_cast %4 : vector<1x1x256x169xbf16> to vector<256x169xbf16>
    %cst_8 = arith.constant dense<0.000000e+00> : vector<16x169xf32>
    %6 = tpu.matmul %0, %5, %cst_8 {dimension_numbers = #tpu.dot_dimension_numbers<[1], [0], [0], [1], [0, 0, 1, 1], [], []>} : vector<16x256xbf16>, vector<256x169xbf16>, vector<16x169xf32> -> vector<16x169xf32>
    %7 = arith.maximumf %3, %6 : vector<16x169xf32>
    %c0_9 = arith.constant 0 : index
    %c2 = arith.constant 2 : index
    %c0_10 = arith.constant 0 : index
    %c0_11 = arith.constant 0 : index
    %8 = vector.load %arg1[%c0_9, %c2, %c0_10, %c0_11] : memref<1x4x256x169xbf16, #tpu.memory_space<vmem>>, vector<1x1x256x169xbf16>
    %9 = vector.shape_cast %8 : vector<1x1x256x169xbf16> to vector<256x169xbf16>
    %cst_12 = arith.constant dense<0.000000e+00> : vector<16x169xf32>
    %10 = tpu.matmul %0, %9, %cst_12 {dimension_numbers = #tpu.dot_dimension_numbers<[1], [0], [0], [1], [0, 0, 1, 1], [], []>} : vector<16x256xbf16>, vector<256x169xbf16>, vector<16x169xf32> -> vector<16x169xf32>
    %11 = arith.maximumf %7, %10 : vector<16x169xf32>
    %c0_13 = arith.constant 0 : index
    %c3 = arith.constant 3 : index
    %c0_14 = arith.constant 0 : index
    %c0_15 = arith.constant 0 : index
    %12 = vector.load %arg1[%c0_13, %c3, %c0_14, %c0_15] : memref<1x4x256x169xbf16, #tpu.memory_space<vmem>>, vector<1x1x256x169xbf16>
    %13 = vector.shape_cast %12 : vector<1x1x256x169xbf16> to vector<256x169xbf16>
    %cst_16 = arith.constant dense<0.000000e+00> : vector<16x169xf32>
    %14 = tpu.matmul %0, %13, %cst_16 {dimension_numbers = #tpu.dot_dimension_numbers<[1], [0], [0], [1], [0, 0, 1, 1], [], []>} : vector<16x256xbf16>, vector<256x169xbf16>, vector<16x169xf32> -> vector<16x169xf32>
    %15 = arith.maximumf %11, %14 : vector<16x169xf32>
    %c0_17 = arith.constant 0 : index
    %c0_18 = arith.constant 0 : index
    %16 = vector.load %arg3[%c0_17, %c0_18] : memref<16x1xf32, #tpu.memory_space<vmem>>, vector<16x1xf32>
    %17 = vector.broadcast %16 : vector<16x1xf32> to vector<16x169xf32>
    %18 = arith.addf %15, %17 : vector<16x169xf32>
    %19 = arith.negf %18 : vector<16x169xf32>
    %20 = math.exp %19 : vector<16x169xf32>
    %cst_19 = arith.constant 1.000000e+00 : f32
    %21 = vector.broadcast %cst_19 : f32 to vector<16x169xf32>
    %22 = arith.addf %21, %20 : vector<16x169xf32>
    %23 = arith.divf %21, %22 : vector<16x169xf32>
    %c0_20 = arith.constant 0 : index
    %c0_21 = arith.constant 0 : index
    %c0_22 = arith.constant 0 : index
    %24 = vector.load %arg4[%c0_20, %c0_21, %c0_22] : memref<1x16x169xf32, #tpu.memory_space<vmem>>, vector<1x16x169xf32>
    %25 = vector.shape_cast %24 : vector<1x16x169xf32> to vector<16x169xf32>
    %26 = vector.shape_cast %23 : vector<16x169xf32> to vector<1x16x169xf32>
    tpu.vector_store %arg4[%c0_20, %c0_21, %c0_22], %26 {strides = array<i32>} : memref<1x16x169xf32, #tpu.memory_space<vmem>>, vector<1x16x169xf32>,
    return
  }
  func.func @transform_0(%arg0: i32) -> (i32, i32, i32, i32) {
    %c0_i32 = arith.constant 0 : i32
    %c0_i32_0 = arith.constant 0 : i32
    %c0_i32_1 = arith.constant 0 : i32
    %c0_i32_2 = arith.constant 0 : i32
    return %arg0, %c0_i32, %c0_i32_0, %c0_i32_1 : i32, i32, i32, i32
  }
  func.func @transform_1(%arg0: i32) -> (i32, i32) {
    %c0_i32 = arith.constant 0 : i32
    %c0_i32_0 = arith.constant 0 : i32
    %c0_i32_1 = arith.constant 0 : i32
    return %c0_i32, %c0_i32_0 : i32, i32
  }
  func.func @transform_2(%arg0: i32) -> (i32, i32) {
    %c0_i32 = arith.constant 0 : i32
    %c0_i32_0 = arith.constant 0 : i32
    %c0_i32_1 = arith.constant 0 : i32
    return %c0_i32, %c0_i32_0 : i32, i32
  }
  func.func @transform_3(%arg0: i32) -> (i32, i32, i32) {
    %c0_i32 = arith.constant 0 : i32
    %c0_i32_0 = arith.constant 0 : i32
    %c0_i32_1 = arith.constant 0 : i32
    return %arg0, %c0_i32, %c0_i32_0 : i32, i32, i32
  }
}

module attributes {stable_mosaic.version = 11 : i64} {
  func.func @_mlp_kernel(%arg0: i32, %arg1: memref<2x2704xf32, #tpu.memory_space<vmem>>, %arg2: memref<2704x256xbf16, #tpu.memory_space<vmem>>, %arg3: memref<1x256xf32, #tpu.memory_space<vmem>>, %arg4: memref<256x64xbf16, #tpu.memory_space<vmem>>, %arg5: memref<1x64xf32, #tpu.memory_space<vmem>>, %arg6: memref<64x128xbf16, #tpu.memory_space<vmem>>, %arg7: memref<1x128xf32, #tpu.memory_space<vmem>>, %arg8: memref<2x128xf32, #tpu.memory_space<vmem>>) attributes {dimension_semantics = [#tpu.dimension_semantics<arbitrary>], iteration_bounds = array<i64: 1>, scalar_prefetch = 0 : i64, scratch_operands = 0 : i64, tpu.core_type = #tpu.core_type<tc>, window_params = [{pipeline_mode = #tpu.pipeline_mode<synchronous>, transform_indices = @transform_0, window_bounds = array<i64: 2, 2704>}, {pipeline_mode = #tpu.pipeline_mode<synchronous>, transform_indices = @transform_1, window_bounds = array<i64: 2704, 256>}, {pipeline_mode = #tpu.pipeline_mode<synchronous>, transform_indices = @transform_2, window_bounds = array<i64: 1, 256>}, {pipeline_mode = #tpu.pipeline_mode<synchronous>, transform_indices = @transform_3, window_bounds = array<i64: 256, 64>}, {pipeline_mode = #tpu.pipeline_mode<synchronous>, transform_indices = @transform_4, window_bounds = array<i64: 1, 64>}, {pipeline_mode = #tpu.pipeline_mode<synchronous>, transform_indices = @transform_5, window_bounds = array<i64: 64, 128>}, {pipeline_mode = #tpu.pipeline_mode<synchronous>, transform_indices = @transform_6, window_bounds = array<i64: 1, 128>}, {pipeline_mode = #tpu.pipeline_mode<synchronous>, transform_indices = @transform_7, window_bounds = array<i64: 2, 128>}]} {
    %c0 = arith.constant 0 : index
    %c0_0 = arith.constant 0 : index
    %0 = vector.load %arg1[%c0, %c0_0] : memref<2x2704xf32, #tpu.memory_space<vmem>>, vector<2x2704xf32>
    %1 = arith.truncf %0 : vector<2x2704xf32> to vector<2x2704xbf16>
    %c0_1 = arith.constant 0 : index
    %c0_2 = arith.constant 0 : index
    %2 = vector.load %arg2[%c0_1, %c0_2] : memref<2704x256xbf16, #tpu.memory_space<vmem>>, vector<2704x256xbf16>
    %cst = arith.constant dense<0.000000e+00> : vector<2x256xf32>
    %3 = tpu.matmul %1, %2, %cst {dimension_numbers = #tpu.dot_dimension_numbers<[1], [0], [0], [1], [0, 0, 1, 1], [], []>} : vector<2x2704xbf16>, vector<2704x256xbf16>, vector<2x256xf32> -> vector<2x256xf32>
    %c0_3 = arith.constant 0 : index
    %c0_4 = arith.constant 0 : index
    %4 = vector.load %arg3[%c0_3, %c0_4] : memref<1x256xf32, #tpu.memory_space<vmem>>, vector<1x256xf32>
    %5 = vector.broadcast %4 : vector<1x256xf32> to vector<2x256xf32>
    %6 = arith.addf %3, %5 : vector<2x256xf32>
    %7 = arith.negf %6 : vector<2x256xf32>
    %8 = math.exp %7 : vector<2x256xf32>
    %cst_5 = arith.constant 1.000000e+00 : f32
    %9 = vector.broadcast %cst_5 : f32 to vector<2x256xf32>
    %10 = arith.addf %9, %8 : vector<2x256xf32>
    %11 = arith.divf %9, %10 : vector<2x256xf32>
    %12 = arith.truncf %11 : vector<2x256xf32> to vector<2x256xbf16>
    %c0_6 = arith.constant 0 : index
    %c0_7 = arith.constant 0 : index
    %13 = vector.load %arg4[%c0_6, %c0_7] : memref<256x64xbf16, #tpu.memory_space<vmem>>, vector<256x64xbf16>
    %cst_8 = arith.constant dense<0.000000e+00> : vector<2x64xf32>
    %14 = tpu.matmul %12, %13, %cst_8 {dimension_numbers = #tpu.dot_dimension_numbers<[1], [0], [0], [1], [0, 0, 1, 1], [], []>} : vector<2x256xbf16>, vector<256x64xbf16>, vector<2x64xf32> -> vector<2x64xf32>
    %c0_9 = arith.constant 0 : index
    %c0_10 = arith.constant 0 : index
    %15 = vector.load %arg5[%c0_9, %c0_10] : memref<1x64xf32, #tpu.memory_space<vmem>>, vector<1x64xf32>
    %16 = vector.broadcast %15 : vector<1x64xf32> to vector<2x64xf32>
    %17 = arith.addf %14, %16 : vector<2x64xf32>
    %18 = arith.negf %17 : vector<2x64xf32>
    %19 = math.exp %18 : vector<2x64xf32>
    %cst_11 = arith.constant 1.000000e+00 : f32
    %20 = vector.broadcast %cst_11 : f32 to vector<2x64xf32>
    %21 = arith.addf %20, %19 : vector<2x64xf32>
    %22 = arith.divf %20, %21 : vector<2x64xf32>
    %23 = arith.truncf %22 : vector<2x64xf32> to vector<2x64xbf16>
    %c0_12 = arith.constant 0 : index
    %c0_13 = arith.constant 0 : index
    %24 = vector.load %arg6[%c0_12, %c0_13] : memref<64x128xbf16, #tpu.memory_space<vmem>>, vector<64x128xbf16>
    %cst_14 = arith.constant dense<0.000000e+00> : vector<2x128xf32>
    %25 = tpu.matmul %23, %24, %cst_14 {dimension_numbers = #tpu.dot_dimension_numbers<[1], [0], [0], [1], [0, 0, 1, 1], [], []>} : vector<2x64xbf16>, vector<64x128xbf16>, vector<2x128xf32> -> vector<2x128xf32>
    %c0_15 = arith.constant 0 : index
    %c0_16 = arith.constant 0 : index
    %26 = vector.load %arg7[%c0_15, %c0_16] : memref<1x128xf32, #tpu.memory_space<vmem>>, vector<1x128xf32>
    %27 = vector.broadcast %26 : vector<1x128xf32> to vector<2x128xf32>
    %28 = arith.addf %25, %27 : vector<2x128xf32>
    %c0_17 = arith.constant 0 : index
    %c0_18 = arith.constant 0 : index
    %29 = vector.load %arg8[%c0_17, %c0_18] : memref<2x128xf32, #tpu.memory_space<vmem>>, vector<2x128xf32>
    tpu.vector_store %arg8[%c0_17, %c0_18], %28 {strides = array<i32>} : memref<2x128xf32, #tpu.memory_space<vmem>>, vector<2x128xf32>,
    return
  }
  func.func @transform_0(%arg0: i32) -> (i32, i32) {
    %c0_i32 = arith.constant 0 : i32
    %c0_i32_0 = arith.constant 0 : i32
    %c0_i32_1 = arith.constant 0 : i32
    return %c0_i32, %c0_i32_0 : i32, i32
  }
  func.func @transform_1(%arg0: i32) -> (i32, i32) {
    %c0_i32 = arith.constant 0 : i32
    %c0_i32_0 = arith.constant 0 : i32
    %c0_i32_1 = arith.constant 0 : i32
    return %c0_i32, %c0_i32_0 : i32, i32
  }
  func.func @transform_2(%arg0: i32) -> (i32, i32) {
    %c0_i32 = arith.constant 0 : i32
    %c0_i32_0 = arith.constant 0 : i32
    %c0_i32_1 = arith.constant 0 : i32
    return %c0_i32, %c0_i32_0 : i32, i32
  }
  func.func @transform_3(%arg0: i32) -> (i32, i32) {
    %c0_i32 = arith.constant 0 : i32
    %c0_i32_0 = arith.constant 0 : i32
    %c0_i32_1 = arith.constant 0 : i32
    return %c0_i32, %c0_i32_0 : i32, i32
  }
  func.func @transform_4(%arg0: i32) -> (i32, i32) {
    %c0_i32 = arith.constant 0 : i32
    %c0_i32_0 = arith.constant 0 : i32
    %c0_i32_1 = arith.constant 0 : i32
    return %c0_i32, %c0_i32_0 : i32, i32
  }
  func.func @transform_5(%arg0: i32) -> (i32, i32) {
    %c0_i32 = arith.constant 0 : i32
    %c0_i32_0 = arith.constant 0 : i32
    %c0_i32_1 = arith.constant 0 : i32
    return %c0_i32, %c0_i32_0 : i32, i32
  }
  func.func @transform_6(%arg0: i32) -> (i32, i32) {
    %c0_i32 = arith.constant 0 : i32
    %c0_i32_0 = arith.constant 0 : i32
    %c0_i32_1 = arith.constant 0 : i32
    return %c0_i32, %c0_i32_0 : i32, i32
  }
  func.func @transform_7(%arg0: i32) -> (i32, i32) {
    %c0_i32 = arith.constant 0 : i32
    %c0_i32_0 = arith.constant 0 : i32
    %c0_i32_1 = arith.constant 0 : i32
    return %c0_i32, %c0_i32_0 : i32, i32
  }
}

</mosaic_0001>

<bundles_post_ra>
// kernel: lenet5_forward.3
= control target key start
LH: loop header
LB: loop body
LE: loop exit
PB: predicated region body
PF: predicated region fallthrough
CT: control target
= control target key end

     0   :  { %s3059_s12 = smov 0   ;;  %s3418_s0 = inlined_call_operand.vmem [shape: bf16[2,4,128,900], index: 0, kind: input, shape index: {}]   ;;  %s3419_s1 = inlined_call_operand.vmem [shape: bf16[6,128], index: 1, kind: input, shape index: {}]   ;;  %s3420_s2 = inlined_call_operand.vmem [shape: f32[6,1], index: 2, kind: input, shape index: {}]   ;;  %s3421_s3 = inlined_call_operand.vmem [shape: f32[2,6,900], index: 3, kind: output, shape index: {}]  }
   0x1 LB: > { %s2518_s13 = sadd.s32 4294967295, %s3036_s12   ;;  %p2522_p0 = scmp.ge.s32.totalorder %s3036_s12, 1  ;;  %s3036_s12 = sphi %s3059_s12, %s13_s12  }
   0x2   : > { %p137_p1 = scmp.lt.s32.totalorder %s3036_s12, 3 }
   0x4   : > { %p138_p2 = pnand %p2522_p0, %p137_p1 }
   0x5   : > { %p161_p3 = scmp.lt.s32.totalorder (!%p138_p2), %s2518_s13, 1  ;;  %v3038_v0 = vmov (!%p138_p2), 0   ;;  %vm2461_vm0 = vcmask (!%p138_p2), 29696  }
   0x6   : > { %141 = sbr.rel (%p138_p2) target bundleno = 522 (0x20a), region = 32  ;;  %589 = vmatprep.mubr.bf16.mxu0 (!%p138_p2), %v3038_v0  ;;  %630 = vmatprep.mubr.bf16.mxu1 (!%p138_p2), %v3038_v0 }
   0x7   : > { %2996 = vset.pattern.permute.xlu0 (!%p138_p2), %v3038_v0 }
   0xd   : > { %s3423_s13 = smov (!%p161_p3, %s2518_s13), 1 }
   0xe   : > { %s2985_s14 = sshll.u32 %s3423_s13, 11  ;;  %s2986_s24 = sshll.u32 %s3423_s13, 6 }
   0xf   : > { %s3076_s17 = scalar_lea.vmem %s3418_s0, %s2985_s14  ;;  %s3401_s27 = scalar_lea.vmem %s3421_s3, %s2986_s24 }
  0x10   : > { %v173_v1 = vld [vmem:[%s3076_s17] sm:$0xff]  ;;  %v174_v3 = vld [vmem:[%s3076_s17 + $0x8] sm:$0xff]  ;;  %v175_v63 = vld [vmem:[%s3076_s17 + $0x10] sm:$0xff] }
  0x11   : > { %v177_v2 = vld [vmem:[%s3076_s17 + $0x20] sm:$0xff]  ;;  %v178_v5 = vld [vmem:[%s3076_s17 + $0x28] sm:$0xff] }
  0x12   : > { %v2528_v4 = vcombine.high %v173_v1, %v177_v2  ;;  %v2527_v6 = vcombine.low %v173_v1, %v177_v2  ;;  %v181_v7 = vld [vmem:[%s3076_s17 + $0x40] sm:$0xff]  ;;  %v2530_v9 = vcombine.high %v174_v3, %v178_v5  ;;  %v2529_v10 = vcombine.low %v174_v3, %v178_v5  ;;  %v182_v12 = vld [vmem:[%s3076_s17 + $0x48] sm:$0xff]  ;;  %v179_v1 = vld [vmem:[%s3076_s17 + $0x30] sm:$0xff] }
  0x13   : > { %v185_v8 = vld [vmem:[%s3076_s17 + $0x60] sm:$0xff]  ;;  %v186_v13 = vld [vmem:[%s3076_s17 + $0x68] sm:$0xff]  ;;  %v176_v2 = vld [vmem:[%s3076_s17 + $0x18] sm:$0xff] }
  0x14   : > { %v2536_v11 = vcombine.high %v181_v7, %v185_v8  ;;  %v189_v14 = vld [vmem:[%s3076_s17 + $0x80] sm:$0xff]  ;;  %557 = vmatprep.subr.bf16.mxu0 %v2528_v4  ;;  %v2538_v15 = vcombine.high %v182_v12, %v186_v13  ;;  %v190_v17 = vld [vmem:[%s3076_s17 + $0x88] sm:$0xff]  ;;  %598 = vmatprep.subr.bf16.mxu1 %v2530_v9  ;;  %v2535_v19 = vcombine.low %v181_v7, %v185_v8  ;;  %v180_v3 = vld [vmem:[%s3076_s17 + $0x38] sm:$0xff] }
  0x15   : > { %v193_v16 = vld [vmem:[%s3076_s17 + $0xa0] sm:$0xff]  ;;  %v194_v18 = vld [vmem:[%s3076_s17 + $0xa8] sm:$0xff]  ;;  %558 = vmatpush1.bf16.msra.mxu0 %v2527_v6  ;;  %599 = vmatpush1.bf16.msra.mxu1 %v2529_v10  ;;  %v2537_v20 = vcombine.low %v182_v12, %v186_v13  ;;  %v2532_v6 = vcombine.high %v175_v63, %v179_v1  ;;  %v2534_v7 = vcombine.high %v176_v2, %v180_v3  ;;  %v183_v8 = vld [vmem:[%s3076_s17 + $0x50] sm:$0xff] }
  0x16   : > { %559 = vmatprep.subr.bf16.mxu0 %v2536_v11  ;;  %v2544_v21 = vcombine.high %v189_v14, %v193_v16  ;;  %600 = vmatprep.subr.bf16.mxu1 %v2538_v15  ;;  %v2546_v22 = vcombine.high %v190_v17, %v194_v18  ;;  %v197_v23 = vld [vmem:[%s3076_s17 + $0xc0] sm:$0xff]  ;;  %v198_v25 = vld [vmem:[%s3076_s17 + $0xc8] sm:$0xff]  ;;  %v2543_v27 = vcombine.low %v189_v14, %v193_v16  ;;  %v187_v9 = vld [vmem:[%s3076_s17 + $0x70] sm:$0xff] }
  0x17   : > { %v201_v24 = vld [vmem:[%s3076_s17 + $0xe0] sm:$0xff]  ;;  %v202_v26 = vld [vmem:[%s3076_s17 + $0xe8] sm:$0xff]  ;;  %v2545_v28 = vcombine.low %v190_v17, %v194_v18  ;;  %v184_v10 = vld [vmem:[%s3076_s17 + $0x58] sm:$0xff]  ;;  %v2531_v13 = vcombine.low %v175_v63, %v179_v1  ;;  %v2533_v14 = vcombine.low %v176_v2, %v180_v3  ;;  %v2540_v15 = vcombine.high %v183_v8, %v187_v9 }
  0x18   : > { %v2552_v29 = vcombine.high %v197_v23, %v201_v24  ;;  %v2554_v30 = vcombine.high %v198_v25, %v202_v26  ;;  %v205_v31 = vld [vmem:[%s3076_s17 + $0x100] sm:$0xff]  ;;  %v206_v33 = vld [vmem:[%s3076_s17 + $0x108] sm:$0xff]  ;;  %v2551_v35 = vcombine.low %v197_v23, %v201_v24  ;;  %v2553_v36 = vcombine.low %v198_v25, %v202_v26  ;;  %v188_v11 = vld [vmem:[%s3076_s17 + $0x78] sm:$0xff] }
  0x19   : > { %560 = vmatpush1.bf16.msra.mxu0 %v2535_v19  ;;  %601 = vmatpush1.bf16.msra.mxu1 %v2537_v20  ;;  %v209_v32 = vld [vmem:[%s3076_s17 + $0x120] sm:$0xff]  ;;  %v210_v34 = vld [vmem:[%s3076_s17 + $0x128] sm:$0xff]  ;;  %v2542_v16 = vcombine.high %v184_v10, %v188_v11  ;;  %v191_v17 = vld [vmem:[%s3076_s17 + $0x90] sm:$0xff] }
  0x1a   : > { %561 = vmatprep.subr.bf16.mxu0 %v2544_v21  ;;  %602 = vmatprep.subr.bf16.mxu1 %v2546_v22  ;;  %v2560_v37 = vcombine.high %v205_v31, %v209_v32  ;;  %v2562_v38 = vcombine.high %v206_v33, %v210_v34  ;;  %v213_v39 = vld [vmem:[%s3076_s17 + $0x140] sm:$0xff]  ;;  %v214_v41 = vld [vmem:[%s3076_s17 + $0x148] sm:$0xff]  ;;  %v2559_v43 = vcombine.low %v205_v31, %v209_v32  ;;  %v195_v18 = vld [vmem:[%s3076_s17 + $0xb0] sm:$0xff] }
  0x1b   : > { %v217_v40 = vld [vmem:[%s3076_s17 + $0x160] sm:$0xff]  ;;  %v218_v42 = vld [vmem:[%s3076_s17 + $0x168] sm:$0xff]  ;;  %v2561_v44 = vcombine.low %v206_v33, %v210_v34  ;;  %v192_v19 = vld [vmem:[%s3076_s17 + $0x98] sm:$0xff]  ;;  %v2539_v21 = vcombine.low %v183_v8, %v187_v9  ;;  %v2541_v22 = vcombine.low %v184_v10, %v188_v11  ;;  %v2548_v23 = vcombine.high %v191_v17, %v195_v18 }
  0x1c   : > { %v2568_v45 = vcombine.high %v213_v39, %v217_v40  ;;  %v2570_v46 = vcombine.high %v214_v41, %v218_v42  ;;  %v221_v47 = vld [vmem:[%s3076_s17 + $0x180] sm:$0xff]  ;;  %v222_v49 = vld [vmem:[%s3076_s17 + $0x188] sm:$0xff]  ;;  %v2567_v51 = vcombine.low %v213_v39, %v217_v40  ;;  %v2569_v52 = vcombine.low %v214_v41, %v218_v42  ;;  %v196_v20 = vld [vmem:[%s3076_s17 + $0xb8] sm:$0xff] }
  0x1d   : > { %562 = vmatpush1.bf16.msra.mxu0 %v2543_v27  ;;  %603 = vmatpush1.bf16.msra.mxu1 %v2545_v28  ;;  %v225_v48 = vld [vmem:[%s3076_s17 + $0x1a0] sm:$0xff]  ;;  %v226_v50 = vld [vmem:[%s3076_s17 + $0x1a8] sm:$0xff]  ;;  %v2550_v24 = vcombine.high %v192_v19, %v196_v20  ;;  %v199_v25 = vld [vmem:[%s3076_s17 + $0xd0] sm:$0xff] }
  0x1e   : > { %563 = vmatprep.subr.bf16.mxu0 %v2552_v29  ;;  %604 = vmatprep.subr.bf16.mxu1 %v2554_v30  ;;  %v2576_v53 = vcombine.high %v221_v47, %v225_v48  ;;  %v2578_v54 = vcombine.high %v222_v49, %v226_v50  ;;  %v229_v55 = vld [vmem:[%s3076_s17 + $0x1c0] sm:$0xff]  ;;  %v230_v57 = vld [vmem:[%s3076_s17 + $0x1c8] sm:$0xff]  ;;  %v2575_v59 = vcombine.low %v221_v47, %v225_v48  ;;  %v203_v26 = vld [vmem:[%s3076_s17 + $0xf0] sm:$0xff] }
  0x1f   : > { %v233_v56 = vld [vmem:[%s3076_s17 + $0x1e0] sm:$0xff]  ;;  %v234_v58 = vld [vmem:[%s3076_s17 + $0x1e8] sm:$0xff]  ;;  %v2577_v60 = vcombine.low %v222_v49, %v226_v50  ;;  %v200_v27 = vld [vmem:[%s3076_s17 + $0xd8] sm:$0xff]  ;;  %v2547_v29 = vcombine.low %v191_v17, %v195_v18  ;;  %v2549_v30 = vcombine.low %v192_v19, %v196_v20  ;;  %v2556_v31 = vcombine.high %v199_v25, %v203_v26 }
  0x20   : > { %v2584_v61 = vcombine.high %v229_v55, %v233_v56  ;;  %v2586_v62 = vcombine.high %v230_v57, %v234_v58  ;;  %v2583_v4 = vcombine.low %v229_v55, %v233_v56  ;;  %v2585_v5 = vcombine.low %v230_v57, %v234_v58  ;;  %v3121_v12 = vld [vmem:[%s3419_s1] sm:$0x7]  ;;  %v204_v28 = vld [vmem:[%s3076_s17 + $0xf8] sm:$0xff]  ;;  %v207_v33 = vld [vmem:[%s3076_s17 + $0x110] sm:$0xff] }
  0x21   : > { %564 = vmatpush1.bf16.msra.mxu0 %v2551_v35  ;;  %605 = vmatpush1.bf16.msra.mxu1 %v2553_v36  ;;  %v2558_v32 = vcombine.high %v200_v27, %v204_v28  ;;  %v211_v34 = vld [vmem:[%s3076_s17 + $0x130] sm:$0xff]  ;;  %v208_v35 = vld [vmem:[%s3076_s17 + $0x118] sm:$0xff]  ;;  %v2591_v2 = vld [vmem:[%s3076_s17 + $0x200] sm:$0xff] }
  0x22   : > { %565 = vmatprep.subr.bf16.mxu0 %v2560_v37  ;;  %606 = vmatprep.subr.bf16.mxu1 %v2562_v38  ;;  %v212_v36 = vld [vmem:[%s3076_s17 + $0x138] sm:$0xff]  ;;  %v2555_v37 = vcombine.low %v199_v25, %v203_v26  ;;  %v2557_v38 = vcombine.low %v200_v27, %v204_v28  ;;  %v2564_v39 = vcombine.high %v207_v33, %v211_v34  ;;  %v215_v41 = vld [vmem:[%s3076_s17 + $0x150] sm:$0xff]  ;;  %v2595_v3 = vld [vmem:[%s3076_s17 + $0x220] sm:$0xff] }
  0x23   : > { %v2566_v40 = vcombine.high %v208_v35, %v212_v36  ;;  %v219_v42 = vld [vmem:[%s3076_s17 + $0x170] sm:$0xff]  ;;  %v2656_v8 = vcombine.high %v2591_v2, %v2595_v3  ;;  %v2599_v10 = vld [vmem:[%s3076_s17 + $0x240] sm:$0xff] }
  0x24   : > { %v2572_v47 = vcombine.high %v215_v41, %v219_v42  ;;  %v223_v49 = vld [vmem:[%s3076_s17 + $0x190] sm:$0xff]  ;;  %v2603_v11 = vld [vmem:[%s3076_s17 + $0x260] sm:$0xff] }
  0x25   : > { %566 = vmatpush1.bf16.msra.mxu0 %v2559_v43  ;;  %607 = vmatpush1.bf16.msra.mxu1 %v2561_v44  ;;  %v216_v43 = vld [vmem:[%s3076_s17 + $0x158] sm:$0xff]  ;;  %v227_v50 = vld [vmem:[%s3076_s17 + $0x1b0] sm:$0xff]  ;;  %v2664_v17 = vcombine.high %v2599_v10, %v2603_v11  ;;  %v2607_v19 = vld [vmem:[%s3076_s17 + $0x280] sm:$0xff] }
  0x26   : > { %567 = vmatprep.subr.bf16.mxu0 %v2568_v45  ;;  %608 = vmatprep.subr.bf16.mxu1 %v2570_v46  ;;  %v220_v44 = vld [vmem:[%s3076_s17 + $0x178] sm:$0xff]  ;;  %v2563_v45 = vcombine.low %v207_v33, %v211_v34  ;;  %v2565_v46 = vcombine.low %v208_v35, %v212_v36  ;;  %v2580_v55 = vcombine.high %v223_v49, %v227_v50  ;;  %v231_v57 = vld [vmem:[%s3076_s17 + $0x1d0] sm:$0xff]  ;;  %v2611_v20 = vld [vmem:[%s3076_s17 + $0x2a0] sm:$0xff] }
  0x27   : > { %v2574_v48 = vcombine.high %v216_v43, %v220_v44  ;;  %v235_v58 = vld [vmem:[%s3076_s17 + $0x1f0] sm:$0xff]  ;;  %v2672_v25 = vcombine.high %v2607_v19, %v2611_v20  ;;  %v2615_v27 = vld [vmem:[%s3076_s17 + $0x2c0] sm:$0xff] }
  0x28   : > { %v2588_v63 = vcombine.high %v231_v57, %v235_v58  ;;  %v2619_v28 = vld [vmem:[%s3076_s17 + $0x2e0] sm:$0xff] }
  0x29   : > { %568 = vmatpush1.bf16.msra.mxu0 %v2567_v51  ;;  %609 = vmatpush1.bf16.msra.mxu1 %v2569_v52  ;;  %v224_v51 = vld [vmem:[%s3076_s17 + $0x198] sm:$0xff]  ;;  %v2680_v33 = vcombine.high %v2615_v27, %v2619_v28  ;;  %v2623_v35 = vld [vmem:[%s3076_s17 + $0x300] sm:$0xff] }
  0x2a   : > { %569 = vmatprep.subr.bf16.mxu0 %v2576_v53  ;;  %610 = vmatprep.subr.bf16.mxu1 %v2578_v54  ;;  %v228_v52 = vld [vmem:[%s3076_s17 + $0x1b8] sm:$0xff]  ;;  %v2571_v53 = vcombine.low %v215_v41, %v219_v42  ;;  %v2573_v54 = vcombine.low %v216_v43, %v220_v44  ;;  %v2627_v36 = vld [vmem:[%s3076_s17 + $0x320] sm:$0xff] }
  0x2b   : > { %v2582_v56 = vcombine.high %v224_v51, %v228_v52  ;;  %v2688_v41 = vcombine.high %v2623_v35, %v2627_v36  ;;  %v2631_v43 = vld [vmem:[%s3076_s17 + $0x340] sm:$0xff] }
  0x2c   : > { %v2635_v44 = vld [vmem:[%s3076_s17 + $0x360] sm:$0xff] }
  0x2d   : > { %570 = vmatpush1.bf16.msra.mxu0 %v2575_v59  ;;  %611 = vmatpush1.bf16.msra.mxu1 %v2577_v60  ;;  %v232_v59 = vld [vmem:[%s3076_s17 + $0x1d8] sm:$0xff] }
  0x2e   : > { %571 = vmatprep.subr.bf16.mxu0 %v2584_v61  ;;  %612 = vmatprep.subr.bf16.mxu1 %v2586_v62  ;;  %v236_v60 = vld [vmem:[%s3076_s17 + $0x1f8] sm:$0xff]  ;;  %v2579_v61 = vcombine.low %v223_v49, %v227_v50  ;;  %v2581_v62 = vcombine.low %v224_v51, %v228_v52  ;;  %v2696_v49 = vcombine.high %v2631_v43, %v2635_v44  ;;  %v2639_v51 = vld [vmem:[%s3076_s17 + $0x380] sm:$0xff] }
  0x2f   : > { %v2590_v1 = vcombine.high %v232_v59, %v236_v60  ;;  %v2643_v52 = vld [vmem:[%s3076_s17 + $0x3a0] sm:$0xff] }
  0x31   : > { %572 = vmatpush1.bf16.msra.mxu0 %v2583_v4  ;;  %613 = vmatpush1.bf16.msra.mxu1 %v2585_v5  ;;  %v2592_v4 = vld [vmem:[%s3076_s17 + $0x208] sm:$0xff] }
  0x32   : > { %639 = vmatprep.subr.bf16.mxu0 %v2532_v6  ;;  %680 = vmatprep.subr.bf16.mxu1 %v2534_v7  ;;  %v2596_v5 = vld [vmem:[%s3076_s17 + $0x228] sm:$0xff]  ;;  %v2587_v6 = vcombine.low %v231_v57, %v235_v58  ;;  %v2589_v7 = vcombine.low %v232_v59, %v236_v60  ;;  %v2704_v57 = vcombine.high %v2639_v51, %v2643_v52  ;;  %v2647_v59 = vld [vmem:[%s3076_s17 + $0x3c0] sm:$0xff] }
  0x33   : > { %v2658_v9 = vcombine.high %v2592_v4, %v2596_v5  ;;  %v2651_v60 = vld [vmem:[%s3076_s17 + $0x3e0] sm:$0xff] }
  0x34   : > { %590 = vmatmul.mubr.bf16.vlgmr.msra.gmra.mrb[0].mxu0 %v3121_v12  ;;  %631 = vmatmul.mubr.bf16.vlgmr.msra.gmra.mrb[0].mxu1 %v3121_v12 }
  0x35   : > { %640 = vmatpush1.bf16.msra.mxu0 %v2531_v13  ;;  %681 = vmatpush1.bf16.msra.mxu1 %v2533_v14  ;;  %v2600_v13 = vld [vmem:[%s3076_s17 + $0x248] sm:$0xff] }
  0x36   : > { %641 = vmatprep.subr.bf16.mxu0 %v2540_v15  ;;  %682 = vmatprep.subr.bf16.mxu1 %v2542_v16  ;;  %v2604_v14 = vld [vmem:[%s3076_s17 + $0x268] sm:$0xff]  ;;  %v2655_v15 = vcombine.low %v2591_v2, %v2595_v3  ;;  %v2657_v16 = vcombine.low %v2592_v4, %v2596_v5  ;;  %v2712_v2 = vcombine.high %v2647_v59, %v2651_v60  ;;  %v2593_v4 = vld [vmem:[%s3076_s17 + $0x210] sm:$0xff] }
  0x37   : > { %671 = vmatprep.mubr.bf16.mxu0 %v3038_v0  ;;  %712 = vmatprep.mubr.bf16.mxu1 %v3038_v0  ;;  %v2666_v18 = vcombine.high %v2600_v13, %v2604_v14  ;;  %v2597_v5 = vld [vmem:[%s3076_s17 + $0x230] sm:$0xff] }
  0x39   : > { %642 = vmatpush1.bf16.msra.mxu0 %v2539_v21  ;;  %683 = vmatpush1.bf16.msra.mxu1 %v2541_v22  ;;  %v2608_v21 = vld [vmem:[%s3076_s17 + $0x288] sm:$0xff] }
  0x3a   : > { %643 = vmatprep.subr.bf16.mxu0 %v2548_v23  ;;  %684 = vmatprep.subr.bf16.mxu1 %v2550_v24  ;;  %v2612_v22 = vld [vmem:[%s3076_s17 + $0x2a8] sm:$0xff]  ;;  %v2663_v23 = vcombine.low %v2599_v10, %v2603_v11  ;;  %v2665_v24 = vcombine.low %v2600_v13, %v2604_v14  ;;  %v2660_v10 = vcombine.high %v2593_v4, %v2597_v5  ;;  %v2601_v13 = vld [vmem:[%s3076_s17 + $0x250] sm:$0xff] }
  0x3b   : > { %v2674_v26 = vcombine.high %v2608_v21, %v2612_v22  ;;  %v2605_v14 = vld [vmem:[%s3076_s17 + $0x270] sm:$0xff] }
  0x3d   : > { %644 = vmatpush1.bf16.msra.mxu0 %v2547_v29  ;;  %685 = vmatpush1.bf16.msra.mxu1 %v2549_v30  ;;  %v2616_v29 = vld [vmem:[%s3076_s17 + $0x2c8] sm:$0xff] }
  0x3e   : > { %645 = vmatprep.subr.bf16.mxu0 %v2556_v31  ;;  %686 = vmatprep.subr.bf16.mxu1 %v2558_v32  ;;  %v2620_v30 = vld [vmem:[%s3076_s17 + $0x2e8] sm:$0xff]  ;;  %v2671_v31 = vcombine.low %v2607_v19, %v2611_v20  ;;  %v2673_v32 = vcombine.low %v2608_v21, %v2612_v22  ;;  %v2668_v19 = vcombine.high %v2601_v13, %v2605_v14  ;;  %v2609_v21 = vld [vmem:[%s3076_s17 + $0x290] sm:$0xff] }
  0x3f   : > { %v2682_v34 = vcombine.high %v2616_v29, %v2620_v30  ;;  %v2613_v22 = vld [vmem:[%s3076_s17 + $0x2b0] sm:$0xff] }
  0x41   : > { %646 = vmatpush1.bf16.msra.mxu0 %v2555_v37  ;;  %687 = vmatpush1.bf16.msra.mxu1 %v2557_v38  ;;  %v2624_v37 = vld [vmem:[%s3076_s17 + $0x308] sm:$0xff] }
  0x42   : > { %647 = vmatprep.subr.bf16.mxu0 %v2564_v39  ;;  %688 = vmatprep.subr.bf16.mxu1 %v2566_v40  ;;  %v2628_v38 = vld [vmem:[%s3076_s17 + $0x328] sm:$0xff]  ;;  %v2679_v39 = vcombine.low %v2615_v27, %v2619_v28  ;;  %v2681_v40 = vcombine.low %v2616_v29, %v2620_v30  ;;  %v2676_v27 = vcombine.high %v2609_v21, %v2613_v22  ;;  %v2617_v29 = vld [vmem:[%s3076_s17 + $0x2d0] sm:$0xff] }
  0x43   : > { %v2690_v42 = vcombine.high %v2624_v37, %v2628_v38  ;;  %v2621_v30 = vld [vmem:[%s3076_s17 + $0x2f0] sm:$0xff] }
  0x45   : > { %648 = vmatpush1.bf16.msra.mxu0 %v2563_v45  ;;  %689 = vmatpush1.bf16.msra.mxu1 %v2565_v46  ;;  %v2632_v45 = vld [vmem:[%s3076_s17 + $0x348] sm:$0xff] }
  0x46   : > { %649 = vmatprep.subr.bf16.mxu0 %v2572_v47  ;;  %690 = vmatprep.subr.bf16.mxu1 %v2574_v48  ;;  %v2636_v46 = vld [vmem:[%s3076_s17 + $0x368] sm:$0xff]  ;;  %v2687_v47 = vcombine.low %v2623_v35, %v2627_v36  ;;  %v2689_v48 = vcombine.low %v2624_v37, %v2628_v38  ;;  %v2684_v35 = vcombine.high %v2617_v29, %v2621_v30  ;;  %v2625_v37 = vld [vmem:[%s3076_s17 + $0x310] sm:$0xff] }
  0x47   : > { %v2698_v50 = vcombine.high %v2632_v45, %v2636_v46  ;;  %v2629_v38 = vld [vmem:[%s3076_s17 + $0x330] sm:$0xff] }
  0x49   : > { %650 = vmatpush1.bf16.msra.mxu0 %v2571_v53  ;;  %691 = vmatpush1.bf16.msra.mxu1 %v2573_v54  ;;  %v2640_v53 = vld [vmem:[%s3076_s17 + $0x388] sm:$0xff] }
  0x4a   : > { %651 = vmatprep.subr.bf16.mxu0 %v2580_v55  ;;  %692 = vmatprep.subr.bf16.mxu1 %v2582_v56  ;;  %v2644_v54 = vld [vmem:[%s3076_s17 + $0x3a8] sm:$0xff]  ;;  %v2695_v55 = vcombine.low %v2631_v43, %v2635_v44  ;;  %v2697_v56 = vcombine.low %v2632_v45, %v2636_v46  ;;  %v2692_v43 = vcombine.high %v2625_v37, %v2629_v38  ;;  %v2633_v45 = vld [vmem:[%s3076_s17 + $0x350] sm:$0xff] }
  0x4b   : > { %v2706_v58 = vcombine.high %v2640_v53, %v2644_v54  ;;  %v2637_v46 = vld [vmem:[%s3076_s17 + $0x370] sm:$0xff] }
  0x4d   : > { %652 = vmatpush1.bf16.msra.mxu0 %v2579_v61  ;;  %693 = vmatpush1.bf16.msra.mxu1 %v2581_v62  ;;  %v2648_v61 = vld [vmem:[%s3076_s17 + $0x3c8] sm:$0xff] }
  0x4e   : > { %653 = vmatprep.subr.bf16.mxu0 %v2588_v63  ;;  %694 = vmatprep.subr.bf16.mxu1 %v2590_v1  ;;  %v2652_v62 = vld [vmem:[%s3076_s17 + $0x3e8] sm:$0xff]  ;;  %v2703_v63 = vcombine.low %v2639_v51, %v2643_v52  ;;  %v2705_v1 = vcombine.low %v2640_v53, %v2644_v54  ;;  %v2700_v51 = vcombine.high %v2633_v45, %v2637_v46  ;;  %v2641_v53 = vld [vmem:[%s3076_s17 + $0x390] sm:$0xff] }
  0x4f   : > { %v2714_v3 = vcombine.high %v2648_v61, %v2652_v62  ;;  %v2645_v54 = vld [vmem:[%s3076_s17 + $0x3b0] sm:$0xff] }
  0x51   : > { %654 = vmatpush1.bf16.msra.mxu0 %v2587_v6  ;;  %695 = vmatpush1.bf16.msra.mxu1 %v2589_v7  ;;  %v2594_v6 = vld [vmem:[%s3076_s17 + $0x218] sm:$0xff] }
  0x52   : > { %1106 = vmatprep.subr.bf16.mxu0 %v2656_v8  ;;  %1147 = vmatprep.subr.bf16.mxu1 %v2658_v9  ;;  %v2598_v7 = vld [vmem:[%s3076_s17 + $0x238] sm:$0xff]  ;;  %v2711_v8 = vcombine.low %v2647_v59, %v2651_v60  ;;  %v2713_v9 = vcombine.low %v2648_v61, %v2652_v62  ;;  %v2708_v59 = vcombine.high %v2641_v53, %v2645_v54  ;;  %v2649_v61 = vld [vmem:[%s3076_s17 + $0x3d0] sm:$0xff] }
  0x53   : > { %v2662_v11 = vcombine.high %v2594_v6, %v2598_v7  ;;  %v2653_v62 = vld [vmem:[%s3076_s17 + $0x3f0] sm:$0xff] }
  0x54   : > { %672 = vmatmul.mubr.bf16.vlgmr.msra.gmra.mrb[4].mxu0 %v3121_v12  ;;  %713 = vmatmul.mubr.bf16.vlgmr.msra.gmra.mrb[4].mxu1 %v3121_v12 }
  0x55   : > { %1107 = vmatpush1.bf16.msra.mxu0 %v2655_v15  ;;  %1148 = vmatpush1.bf16.msra.mxu1 %v2657_v16  ;;  %v2602_v15 = vld [vmem:[%s3076_s17 + $0x258] sm:$0xff] }
  0x56   : > { %1108 = vmatprep.subr.bf16.mxu0 %v2664_v17  ;;  %1149 = vmatprep.subr.bf16.mxu1 %v2666_v18  ;;  %v2606_v16 = vld [vmem:[%s3076_s17 + $0x278] sm:$0xff]  ;;  %v2659_v17 = vcombine.low %v2593_v4, %v2597_v5  ;;  %v2661_v18 = vcombine.low %v2594_v6, %v2598_v7  ;;  %v2716_v4 = vcombine.high %v2649_v61, %v2653_v62  ;;  %v2719_v6 = vld [vmem:[%s3076_s17 + $0x400] sm:$0xff] }
  0x57   : > { %1138 = vmatprep.mubr.bf16.mxu0 %v3038_v0  ;;  %1179 = vmatprep.mubr.bf16.mxu1 %v3038_v0  ;;  %v2670_v20 = vcombine.high %v2602_v15, %v2606_v16  ;;  %v2723_v7 = vld [vmem:[%s3076_s17 + $0x420] sm:$0xff] }
  0x59   : > { %1109 = vmatpush1.bf16.msra.mxu0 %v2663_v23  ;;  %1150 = vmatpush1.bf16.msra.mxu1 %v2665_v24  ;;  %v2610_v23 = vld [vmem:[%s3076_s17 + $0x298] sm:$0xff] }
  0x5a   : > { %1110 = vmatprep.subr.bf16.mxu0 %v2672_v25  ;;  %1151 = vmatprep.subr.bf16.mxu1 %v2674_v26  ;;  %v2614_v24 = vld [vmem:[%s3076_s17 + $0x2b8] sm:$0xff]  ;;  %v2667_v25 = vcombine.low %v2601_v13, %v2605_v14  ;;  %v2669_v26 = vcombine.low %v2602_v15, %v2606_v16  ;;  %v2784_v13 = vcombine.high %v2719_v6, %v2723_v7  ;;  %v2727_v15 = vld [vmem:[%s3076_s17 + $0x440] sm:$0xff] }
  0x5b   : > { %v2678_v28 = vcombine.high %v2610_v23, %v2614_v24  ;;  %v2731_v16 = vld [vmem:[%s3076_s17 + $0x460] sm:$0xff] }
  0x5d   : > { %1111 = vmatpush1.bf16.msra.mxu0 %v2671_v31  ;;  %1152 = vmatpush1.bf16.msra.mxu1 %v2673_v32  ;;  %v2618_v31 = vld [vmem:[%s3076_s17 + $0x2d8] sm:$0xff] }
  0x5e   : > { %1112 = vmatprep.subr.bf16.mxu0 %v2680_v33  ;;  %1153 = vmatprep.subr.bf16.mxu1 %v2682_v34  ;;  %v2622_v32 = vld [vmem:[%s3076_s17 + $0x2f8] sm:$0xff]  ;;  %v2675_v33 = vcombine.low %v2609_v21, %v2613_v22  ;;  %v2677_v34 = vcombine.low %v2610_v23, %v2614_v24  ;;  %v2792_v21 = vcombine.high %v2727_v15, %v2731_v16  ;;  %v2735_v23 = vld [vmem:[%s3076_s17 + $0x480] sm:$0xff] }
  0x5f   : > { %v2686_v36 = vcombine.high %v2618_v31, %v2622_v32  ;;  %v2739_v24 = vld [vmem:[%s3076_s17 + $0x4a0] sm:$0xff] }
  0x61   : > { %1113 = vmatpush1.bf16.msra.mxu0 %v2679_v39  ;;  %1154 = vmatpush1.bf16.msra.mxu1 %v2681_v40  ;;  %v2626_v39 = vld [vmem:[%s3076_s17 + $0x318] sm:$0xff] }
  0x62   : > { %1114 = vmatprep.subr.bf16.mxu0 %v2688_v41  ;;  %1155 = vmatprep.subr.bf16.mxu1 %v2690_v42  ;;  %v2630_v40 = vld [vmem:[%s3076_s17 + $0x338] sm:$0xff]  ;;  %v2683_v41 = vcombine.low %v2617_v29, %v2621_v30  ;;  %v2685_v42 = vcombine.low %v2618_v31, %v2622_v32  ;;  %v2800_v29 = vcombine.high %v2735_v23, %v2739_v24  ;;  %v2743_v31 = vld [vmem:[%s3076_s17 + $0x4c0] sm:$0xff] }
  0x63   : > { %v2694_v44 = vcombine.high %v2626_v39, %v2630_v40  ;;  %v2747_v32 = vld [vmem:[%s3076_s17 + $0x4e0] sm:$0xff] }
  0x65   : > { %1115 = vmatpush1.bf16.msra.mxu0 %v2687_v47  ;;  %1156 = vmatpush1.bf16.msra.mxu1 %v2689_v48  ;;  %v2634_v47 = vld [vmem:[%s3076_s17 + $0x358] sm:$0xff] }
  0x66   : > { %1116 = vmatprep.subr.bf16.mxu0 %v2696_v49  ;;  %1157 = vmatprep.subr.bf16.mxu1 %v2698_v50  ;;  %v2638_v48 = vld [vmem:[%s3076_s17 + $0x378] sm:$0xff]  ;;  %v2691_v49 = vcombine.low %v2625_v37, %v2629_v38  ;;  %v2693_v50 = vcombine.low %v2626_v39, %v2630_v40  ;;  %v2808_v37 = vcombine.high %v2743_v31, %v2747_v32  ;;  %v2751_v39 = vld [vmem:[%s3076_s17 + $0x500] sm:$0xff] }
  0x67   : > { %v2702_v52 = vcombine.high %v2634_v47, %v2638_v48  ;;  %v2755_v40 = vld [vmem:[%s3076_s17 + $0x520] sm:$0xff] }
  0x69   : > { %1117 = vmatpush1.bf16.msra.mxu0 %v2695_v55  ;;  %1158 = vmatpush1.bf16.msra.mxu1 %v2697_v56  ;;  %v2642_v55 = vld [vmem:[%s3076_s17 + $0x398] sm:$0xff] }
  0x6a   : > { %1118 = vmatprep.subr.bf16.mxu0 %v2704_v57  ;;  %1159 = vmatprep.subr.bf16.mxu1 %v2706_v58  ;;  %v2646_v56 = vld [vmem:[%s3076_s17 + $0x3b8] sm:$0xff]  ;;  %v2699_v57 = vcombine.low %v2633_v45, %v2637_v46  ;;  %v2701_v58 = vcombine.low %v2634_v47, %v2638_v48  ;;  %v2816_v45 = vcombine.high %v2751_v39, %v2755_v40  ;;  %v2759_v47 = vld [vmem:[%s3076_s17 + $0x540] sm:$0xff] }
  0x6b   : > { %v2710_v60 = vcombine.high %v2642_v55, %v2646_v56  ;;  %v2763_v48 = vld [vmem:[%s3076_s17 + $0x560] sm:$0xff] }
  0x6d   : > { %1119 = vmatpush1.bf16.msra.mxu0 %v2703_v63  ;;  %1160 = vmatpush1.bf16.msra.mxu1 %v2705_v1  ;;  %v2650_v63 = vld [vmem:[%s3076_s17 + $0x3d8] sm:$0xff] }
  0x6e   : > { %1120 = vmatprep.subr.bf16.mxu0 %v2712_v2  ;;  %1161 = vmatprep.subr.bf16.mxu1 %v2714_v3  ;;  %v2654_v1 = vld [vmem:[%s3076_s17 + $0x3f8] sm:$0xff]  ;;  %v2707_v2 = vcombine.low %v2641_v53, %v2645_v54  ;;  %v2709_v3 = vcombine.low %v2642_v55, %v2646_v56  ;;  %v2824_v53 = vcombine.high %v2759_v47, %v2763_v48  ;;  %v2767_v55 = vld [vmem:[%s3076_s17 + $0x580] sm:$0xff] }
  0x6f   : > { %v2718_v5 = vcombine.high %v2650_v63, %v2654_v1  ;;  %v2771_v56 = vld [vmem:[%s3076_s17 + $0x5a0] sm:$0xff] }
  0x71   : > { %1121 = vmatpush1.bf16.msra.mxu0 %v2711_v8  ;;  %1162 = vmatpush1.bf16.msra.mxu1 %v2713_v9  ;;  %v2720_v8 = vld [vmem:[%s3076_s17 + $0x408] sm:$0xff] }
  0x72   : > { %1188 = vmatprep.subr.bf16.mxu0 %v2660_v10  ;;  %1229 = vmatprep.subr.bf16.mxu1 %v2662_v11  ;;  %v2724_v9 = vld [vmem:[%s3076_s17 + $0x428] sm:$0xff]  ;;  %v2715_v10 = vcombine.low %v2649_v61, %v2653_v62  ;;  %v2717_v11 = vcombine.low %v2650_v63, %v2654_v1  ;;  %v2832_v61 = vcombine.high %v2767_v55, %v2771_v56  ;;  %v2775_v63 = vld [vmem:[%s3076_s17 + $0x5c0] sm:$0xff] }
  0x73   : > { %v2786_v14 = vcombine.high %v2720_v8, %v2724_v9  ;;  %v2779_v1 = vld [vmem:[%s3076_s17 + $0x5e0] sm:$0xff] }
  0x74   : > { %1139 = vmatmul.mubr.bf16.vlgmr.msra.gmra.mrb[8].mxu0 %v3121_v12  ;;  %1180 = vmatmul.mubr.bf16.vlgmr.msra.gmra.mrb[8].mxu1 %v3121_v12 }
  0x75   : > { %1189 = vmatpush1.bf16.msra.mxu0 %v2659_v17  ;;  %1230 = vmatpush1.bf16.msra.mxu1 %v2661_v18  ;;  %v2728_v17 = vld [vmem:[%s3076_s17 + $0x448] sm:$0xff] }
  0x76   : > { %1190 = vmatprep.subr.bf16.mxu0 %v2668_v19  ;;  %1231 = vmatprep.subr.bf16.mxu1 %v2670_v20  ;;  %v2732_v18 = vld [vmem:[%s3076_s17 + $0x468] sm:$0xff]  ;;  %v2783_v19 = vcombine.low %v2719_v6, %v2723_v7  ;;  %v2785_v20 = vcombine.low %v2720_v8, %v2724_v9  ;;  %v2840_v6 = vcombine.high %v2775_v63, %v2779_v1  ;;  %v2721_v8 = vld [vmem:[%s3076_s17 + $0x410] sm:$0xff] }
  0x77   : > { %1220 = vmatprep.mubr.bf16.mxu0 %v3038_v0  ;;  %1261 = vmatprep.mubr.bf16.mxu1 %v3038_v0  ;;  %v2794_v22 = vcombine.high %v2728_v17, %v2732_v18  ;;  %v2725_v9 = vld [vmem:[%s3076_s17 + $0x430] sm:$0xff] }
  0x79   : > { %1191 = vmatpush1.bf16.msra.mxu0 %v2667_v25  ;;  %1232 = vmatpush1.bf16.msra.mxu1 %v2669_v26  ;;  %v2736_v25 = vld [vmem:[%s3076_s17 + $0x488] sm:$0xff] }
  0x7a   : > { %1192 = vmatprep.subr.bf16.mxu0 %v2676_v27  ;;  %1233 = vmatprep.subr.bf16.mxu1 %v2678_v28  ;;  %v2740_v26 = vld [vmem:[%s3076_s17 + $0x4a8] sm:$0xff]  ;;  %v2791_v27 = vcombine.low %v2727_v15, %v2731_v16  ;;  %v2793_v28 = vcombine.low %v2728_v17, %v2732_v18  ;;  %v2788_v15 = vcombine.high %v2721_v8, %v2725_v9  ;;  %v2729_v17 = vld [vmem:[%s3076_s17 + $0x450] sm:$0xff] }
  0x7b   : > { %v2802_v30 = vcombine.high %v2736_v25, %v2740_v26  ;;  %v2733_v18 = vld [vmem:[%s3076_s17 + $0x470] sm:$0xff] }
  0x7d   : > { %1193 = vmatpush1.bf16.msra.mxu0 %v2675_v33  ;;  %1234 = vmatpush1.bf16.msra.mxu1 %v2677_v34  ;;  %v2744_v33 = vld [vmem:[%s3076_s17 + $0x4c8] sm:$0xff] }
  0x7e   : > { %1194 = vmatprep.subr.bf16.mxu0 %v2684_v35  ;;  %1235 = vmatprep.subr.bf16.mxu1 %v2686_v36  ;;  %v2748_v34 = vld [vmem:[%s3076_s17 + $0x4e8] sm:$0xff]  ;;  %v2799_v35 = vcombine.low %v2735_v23, %v2739_v24  ;;  %v2801_v36 = vcombine.low %v2736_v25, %v2740_v26  ;;  %v2796_v23 = vcombine.high %v2729_v17, %v2733_v18  ;;  %v2737_v25 = vld [vmem:[%s3076_s17 + $0x490] sm:$0xff] }
  0x7f   : > { %v2810_v38 = vcombine.high %v2744_v33, %v2748_v34  ;;  %v2741_v26 = vld [vmem:[%s3076_s17 + $0x4b0] sm:$0xff] }
  0x81   : > { %1195 = vmatpush1.bf16.msra.mxu0 %v2683_v41  ;;  %1236 = vmatpush1.bf16.msra.mxu1 %v2685_v42  ;;  %v2752_v41 = vld [vmem:[%s3076_s17 + $0x508] sm:$0xff] }
  0x82   : > { %1196 = vmatprep.subr.bf16.mxu0 %v2692_v43  ;;  %1237 = vmatprep.subr.bf16.mxu1 %v2694_v44  ;;  %v2756_v42 = vld [vmem:[%s3076_s17 + $0x528] sm:$0xff]  ;;  %v2807_v43 = vcombine.low %v2743_v31, %v2747_v32  ;;  %v2809_v44 = vcombine.low %v2744_v33, %v2748_v34  ;;  %v2804_v31 = vcombine.high %v2737_v25, %v2741_v26  ;;  %v2745_v33 = vld [vmem:[%s3076_s17 + $0x4d0] sm:$0xff] }
  0x83   : > { %v2818_v46 = vcombine.high %v2752_v41, %v2756_v42  ;;  %v2749_v34 = vld [vmem:[%s3076_s17 + $0x4f0] sm:$0xff] }
  0x85   : > { %1197 = vmatpush1.bf16.msra.mxu0 %v2691_v49  ;;  %1238 = vmatpush1.bf16.msra.mxu1 %v2693_v50  ;;  %v2760_v49 = vld [vmem:[%s3076_s17 + $0x548] sm:$0xff] }
  0x86   : > { %1198 = vmatprep.subr.bf16.mxu0 %v2700_v51  ;;  %1239 = vmatprep.subr.bf16.mxu1 %v2702_v52  ;;  %v2764_v50 = vld [vmem:[%s3076_s17 + $0x568] sm:$0xff]  ;;  %v2815_v51 = vcombine.low %v2751_v39, %v2755_v40  ;;  %v2817_v52 = vcombine.low %v2752_v41, %v2756_v42  ;;  %v2753_v40 = vld [vmem:[%s3076_s17 + $0x510] sm:$0xff]  ;;  %v2754_v42 = vld [vmem:[%s3076_s17 + $0x518] sm:$0xff] }
  0x87   : > { %v2826_v54 = vcombine.high %v2760_v49, %v2764_v50  ;;  %v2757_v41 = vld [vmem:[%s3076_s17 + $0x530] sm:$0xff] }
  0x89   : > { %1199 = vmatpush1.bf16.msra.mxu0 %v2699_v57  ;;  %1240 = vmatpush1.bf16.msra.mxu1 %v2701_v58  ;;  %v2768_v57 = vld [vmem:[%s3076_s17 + $0x588] sm:$0xff] }
  0x8a   : > { %1200 = vmatprep.subr.bf16.mxu0 %v2708_v59  ;;  %1241 = vmatprep.subr.bf16.mxu1 %v2710_v60  ;;  %v2772_v58 = vld [vmem:[%s3076_s17 + $0x5a8] sm:$0xff]  ;;  %v2823_v59 = vcombine.low %v2759_v47, %v2763_v48  ;;  %v2825_v60 = vcombine.low %v2760_v49, %v2764_v50  ;;  %v2761_v48 = vld [vmem:[%s3076_s17 + $0x550] sm:$0xff]  ;;  %v2762_v50 = vld [vmem:[%s3076_s17 + $0x558] sm:$0xff] }
  0x8b   : > { %v2834_v62 = vcombine.high %v2768_v57, %v2772_v58  ;;  %v2765_v49 = vld [vmem:[%s3076_s17 + $0x570] sm:$0xff] }
  0x8d   : > { %1201 = vmatpush1.bf16.msra.mxu0 %v2707_v2  ;;  %1242 = vmatpush1.bf16.msra.mxu1 %v2709_v3  ;;  %v2776_v2 = vld [vmem:[%s3076_s17 + $0x5c8] sm:$0xff] }
  0x8e   : > { %1202 = vmatprep.subr.bf16.mxu0 %v2716_v4  ;;  %1243 = vmatprep.subr.bf16.mxu1 %v2718_v5  ;;  %v2780_v3 = vld [vmem:[%s3076_s17 + $0x5e8] sm:$0xff]  ;;  %v2831_v4 = vcombine.low %v2767_v55, %v2771_v56  ;;  %v2833_v5 = vcombine.low %v2768_v57, %v2772_v58  ;;  %v2769_v56 = vld [vmem:[%s3076_s17 + $0x590] sm:$0xff]  ;;  %v2770_v58 = vld [vmem:[%s3076_s17 + $0x598] sm:$0xff] }
  0x8f   : > { %v2842_v7 = vcombine.high %v2776_v2, %v2780_v3  ;;  %v2773_v57 = vld [vmem:[%s3076_s17 + $0x5b0] sm:$0xff] }
  0x91   : > { %1203 = vmatpush1.bf16.msra.mxu0 %v2715_v10  ;;  %1244 = vmatpush1.bf16.msra.mxu1 %v2717_v11  ;;  %v2722_v10 = vld [vmem:[%s3076_s17 + $0x418] sm:$0xff] }
  0x92   : > { %1663 = vmatprep.subr.bf16.mxu0 %v2784_v13  ;;  %1704 = vmatprep.subr.bf16.mxu1 %v2786_v14  ;;  %v2726_v11 = vld [vmem:[%s3076_s17 + $0x438] sm:$0xff]  ;;  %v2839_v13 = vcombine.low %v2775_v63, %v2779_v1  ;;  %v2841_v14 = vcombine.low %v2776_v2, %v2780_v3  ;;  %v2777_v1 = vld [vmem:[%s3076_s17 + $0x5d0] sm:$0xff] }
  0x93   : > { %v2790_v16 = vcombine.high %v2722_v10, %v2726_v11  ;;  %v2781_v2 = vld [vmem:[%s3076_s17 + $0x5f0] sm:$0xff]  ;;  %v2778_v3 = vld [vmem:[%s3076_s17 + $0x5d8] sm:$0xff] }
  0x94   : > { %1221 = vmatmul.mubr.bf16.vlgmr.msra.gmra.mrb[12].mxu0 %v3121_v12  ;;  %1262 = vmatmul.mubr.bf16.vlgmr.msra.gmra.mrb[12].mxu1 %v3121_v12 }
  0x95   : > { %1664 = vmatpush1.bf16.msra.mxu0 %v2783_v19  ;;  %1705 = vmatpush1.bf16.msra.mxu1 %v2785_v20  ;;  %v2730_v19 = vld [vmem:[%s3076_s17 + $0x458] sm:$0xff] }
  0x96   : > { %1665 = vmatprep.subr.bf16.mxu0 %v2792_v21  ;;  %1706 = vmatprep.subr.bf16.mxu1 %v2794_v22  ;;  %v2734_v20 = vld [vmem:[%s3076_s17 + $0x478] sm:$0xff]  ;;  %v2787_v21 = vcombine.low %v2721_v8, %v2725_v9  ;;  %v2789_v22 = vcombine.low %v2722_v10, %v2726_v11  ;;  %v2392_v8 = vld [vmem:[%s3420_s2] sm:$0x3f] }
  0x97   : > { %1695 = vmatprep.mubr.bf16.mxu0 %v3038_v0  ;;  %1736 = vmatprep.mubr.bf16.mxu1 %v3038_v0  ;;  %v2798_v24 = vcombine.high %v2730_v19, %v2734_v20  ;;  %v2847_v10 = vld [vmem:[%s3076_s17 + $0x600] sm:$0xff] }
  0x98   : > { %v2851_v11 = vld [vmem:[%s3076_s17 + $0x620] sm:$0xff]  ;;  %2395 = vperm.xlu0 %2996, %v2392_v8  }
  0x99   : > { %1666 = vmatpush1.bf16.msra.mxu0 %v2791_v27  ;;  %1707 = vmatpush1.bf16.msra.mxu1 %v2793_v28  ;;  %v2738_v27 = vld [vmem:[%s3076_s17 + $0x498] sm:$0xff] }
  0x9a   : > { %1667 = vmatprep.subr.bf16.mxu0 %v2800_v29  ;;  %1708 = vmatprep.subr.bf16.mxu1 %v2802_v30  ;;  %v2742_v28 = vld [vmem:[%s3076_s17 + $0x4b8] sm:$0xff]  ;;  %v2795_v29 = vcombine.low %v2729_v17, %v2733_v18  ;;  %v2797_v30 = vcombine.low %v2730_v19, %v2734_v20  ;;  %v2912_v17 = vcombine.high %v2847_v10, %v2851_v11  ;;  %v2855_v19 = vld [vmem:[%s3076_s17 + $0x640] sm:$0xff] }
  0x9b   : > { %v2806_v32 = vcombine.high %v2738_v27, %v2742_v28  ;;  %v2859_v20 = vld [vmem:[%s3076_s17 + $0x660] sm:$0xff] }
  0x9d   : > { %1668 = vmatpush1.bf16.msra.mxu0 %v2799_v35  ;;  %1709 = vmatpush1.bf16.msra.mxu1 %v2801_v36  ;;  %v2746_v35 = vld [vmem:[%s3076_s17 + $0x4d8] sm:$0xff] }
  0x9e   : > { %1669 = vmatprep.subr.bf16.mxu0 %v2808_v37  ;;  %1710 = vmatprep.subr.bf16.mxu1 %v2810_v38  ;;  %v2750_v36 = vld [vmem:[%s3076_s17 + $0x4f8] sm:$0xff]  ;;  %v2805_v37 = vcombine.low %v2738_v27, %v2742_v28  ;;  %v2812_v38 = vcombine.high %v2745_v33, %v2749_v34  ;;  %v2863_v27 = vld [vmem:[%s3076_s17 + $0x680] sm:$0xff] }
  0x9f   : > { %v2814_v39 = vcombine.high %v2746_v35, %v2750_v36  ;;  %v2867_v28 = vld [vmem:[%s3076_s17 + $0x6a0] sm:$0xff] }
  0xa1   : > { %1670 = vmatpush1.bf16.msra.mxu0 %v2807_v43  ;;  %1711 = vmatpush1.bf16.msra.mxu1 %v2809_v44  ;;  %v2758_v43 = vld [vmem:[%s3076_s17 + $0x538] sm:$0xff]  ;;  %v2811_v44 = vcombine.low %v2745_v33, %v2749_v34  ;;  %v2928_v34 = vcombine.high %v2863_v27, %v2867_v28 }
  0xa2   : > { %1671 = vmatprep.subr.bf16.mxu0 %v2816_v45  ;;  %1712 = vmatprep.subr.bf16.mxu1 %v2818_v46  ;;  %v2813_v45 = vcombine.low %v2746_v35, %v2750_v36  ;;  %v2820_v46 = vcombine.high %v2753_v40, %v2757_v41  ;;  %v2822_v47 = vcombine.high %v2754_v42, %v2758_v43  ;;  %v2871_v36 = vld [vmem:[%s3076_s17 + $0x6c0] sm:$0xff] }
  0xa5   : > { %1672 = vmatpush1.bf16.msra.mxu0 %v2815_v51  ;;  %1713 = vmatpush1.bf16.msra.mxu1 %v2817_v52  ;;  %v2766_v51 = vld [vmem:[%s3076_s17 + $0x578] sm:$0xff]  ;;  %v2819_v52 = vcombine.low %v2753_v40, %v2757_v41 }
  0xa6   : > { %1673 = vmatprep.subr.bf16.mxu0 %v2824_v53  ;;  %1714 = vmatprep.subr.bf16.mxu1 %v2826_v54  ;;  %v2821_v53 = vcombine.low %v2754_v42, %v2758_v43  ;;  %v2828_v54 = vcombine.high %v2761_v48, %v2765_v49  ;;  %v2830_v55 = vcombine.high %v2762_v50, %v2766_v51  ;;  %v2879_v43 = vld [vmem:[%s3076_s17 + $0x700] sm:$0xff] }
  0xa9   : > { %1674 = vmatpush1.bf16.msra.mxu0 %v2823_v59  ;;  %1715 = vmatpush1.bf16.msra.mxu1 %v2825_v60  ;;  %v2774_v59 = vld [vmem:[%s3076_s17 + $0x5b8] sm:$0xff]  ;;  %v2827_v60 = vcombine.low %v2761_v48, %v2765_v49 }
  0xaa   : > { %1675 = vmatprep.subr.bf16.mxu0 %v2832_v61  ;;  %1716 = vmatprep.subr.bf16.mxu1 %v2834_v62  ;;  %v2829_v61 = vcombine.low %v2762_v50, %v2766_v51  ;;  %v2836_v62 = vcombine.high %v2769_v56, %v2773_v57  ;;  %v2838_v63 = vcombine.high %v2770_v58, %v2774_v59  ;;  %v2887_v51 = vld [vmem:[%s3076_s17 + $0x740] sm:$0xff] }
  0xad   : > { %1676 = vmatpush1.bf16.msra.mxu0 %v2831_v4  ;;  %1717 = vmatpush1.bf16.msra.mxu1 %v2833_v5  ;;  %v2782_v4 = vld [vmem:[%s3076_s17 + $0x5f8] sm:$0xff]  ;;  %v2835_v5 = vcombine.low %v2769_v56, %v2773_v57 }
  0xae   : > { %1677 = vmatprep.subr.bf16.mxu0 %v2840_v6  ;;  %1718 = vmatprep.subr.bf16.mxu1 %v2842_v7  ;;  %v2837_v6 = vcombine.low %v2770_v58, %v2774_v59  ;;  %v2844_v7 = vcombine.high %v2777_v1, %v2781_v2  ;;  %v2846_v9 = vcombine.high %v2778_v3, %v2782_v4  ;;  %v2895_v59 = vld [vmem:[%s3076_s17 + $0x780] sm:$0xff] }
  0xb1   : > { %1678 = vmatpush1.bf16.msra.mxu0 %v2839_v13  ;;  %1719 = vmatpush1.bf16.msra.mxu1 %v2841_v14  ;;  %v2848_v13 = vld [vmem:[%s3076_s17 + $0x608] sm:$0xff] }
  0xb2   : > { %1745 = vmatprep.subr.bf16.mxu0 %v2788_v15  ;;  %1786 = vmatprep.subr.bf16.mxu1 %v2790_v16  ;;  %v2852_v14 = vld [vmem:[%s3076_s17 + $0x628] sm:$0xff]  ;;  %v2843_v15 = vcombine.low %v2777_v1, %v2781_v2  ;;  %v2845_v16 = vcombine.low %v2778_v3, %v2782_v4  ;;  %v2903_v4 = vld [vmem:[%s3076_s17 + $0x7c0] sm:$0xff] }
  0xb3   : > { %v2914_v18 = vcombine.high %v2848_v13, %v2852_v14 }
  0xb4   : > { %1696 = vmatmul.mubr.bf16.vlgmr.msra.gmra.mrb[16].mxu0 %v3121_v12  ;;  %1737 = vmatmul.mubr.bf16.vlgmr.msra.gmra.mrb[16].mxu1 %v3121_v12  ;;  %v2803_v12 = vcombine.low %v2737_v25, %v2741_v26  ;;  %v2920_v25 = vcombine.high %v2855_v19, %v2859_v20 }
  0xb5   : > { %1746 = vmatpush1.bf16.msra.mxu0 %v2787_v21  ;;  %1787 = vmatpush1.bf16.msra.mxu1 %v2789_v22  ;;  %v2856_v21 = vld [vmem:[%s3076_s17 + $0x648] sm:$0xff] }
  0xb6   : > { %1747 = vmatprep.subr.bf16.mxu0 %v2796_v23  ;;  %1788 = vmatprep.subr.bf16.mxu1 %v2798_v24  ;;  %v2860_v22 = vld [vmem:[%s3076_s17 + $0x668] sm:$0xff]  ;;  %v2911_v23 = vcombine.low %v2847_v10, %v2851_v11  ;;  %v2913_v24 = vcombine.low %v2848_v13, %v2852_v14  ;;  %v2849_v13 = vld [vmem:[%s3076_s17 + $0x610] sm:$0xff] }
  0xb7   : > { %1777 = vmatprep.mubr.bf16.mxu0 %v3038_v0  ;;  %1818 = vmatprep.mubr.bf16.mxu1 %v3038_v0  ;;  %v2922_v26 = vcombine.high %v2856_v21, %v2860_v22  ;;  %v2921_v33 = vcombine.low %v2856_v21, %v2860_v22  ;;  %v2853_v14 = vld [vmem:[%s3076_s17 + $0x630] sm:$0xff] }
  0xb8   : > { %v2857_v21 = vld [vmem:[%s3076_s17 + $0x650] sm:$0xff] }
  0xb9   : > { %1748 = vmatpush1.bf16.msra.mxu0 %v2795_v29  ;;  %1789 = vmatpush1.bf16.msra.mxu1 %v2797_v30  ;;  %v3311_v29 = vld [vmem:[%s3419_s1] sm:$0x7]  ;;  %v2864_v30 = vld [vmem:[%s3076_s17 + $0x688] sm:$0xff]  ;;  %v2861_v22 = vld [vmem:[%s3076_s17 + $0x670] sm:$0xff] }
  0xba   : > { %1749 = vmatprep.subr.bf16.mxu0 %v2804_v31  ;;  %1790 = vmatprep.subr.bf16.mxu1 %v2806_v32  ;;  %v2868_v31 = vld [vmem:[%s3076_s17 + $0x6a8] sm:$0xff]  ;;  %v2919_v32 = vcombine.low %v2855_v19, %v2859_v20  ;;  %v2916_v19 = vcombine.high %v2849_v13, %v2853_v14 }
  0xbb   : > { %v2930_v35 = vcombine.high %v2864_v30, %v2868_v31  ;;  %v2929_v40 = vcombine.low %v2864_v30, %v2868_v31  ;;  %v2865_v30 = vld [vmem:[%s3076_s17 + $0x690] sm:$0xff] }
  0xbc   : > { %v2869_v31 = vld [vmem:[%s3076_s17 + $0x6b0] sm:$0xff] }
  0xbd   : > { %1750 = vmatpush1.bf16.msra.mxu0 %v2803_v12  ;;  %1791 = vmatpush1.bf16.msra.mxu1 %v2805_v37  ;;  %v2875_v12 = vld [vmem:[%s3076_s17 + $0x6e0] sm:$0xff]  ;;  %v2872_v37 = vld [vmem:[%s3076_s17 + $0x6c8] sm:$0xff] }
  0xbe   : > { %1751 = vmatprep.subr.bf16.mxu0 %v2812_v38  ;;  %1792 = vmatprep.subr.bf16.mxu1 %v2814_v39  ;;  %v2876_v38 = vld [vmem:[%s3076_s17 + $0x6e8] sm:$0xff]  ;;  %v2927_v39 = vcombine.low %v2863_v27, %v2867_v28  ;;  %v2936_v41 = vcombine.high %v2871_v36, %v2875_v12  ;;  %v2924_v27 = vcombine.high %v2857_v21, %v2861_v22 }
  0xbf   : > { %v2938_v42 = vcombine.high %v2872_v37, %v2876_v38  ;;  %v2937_v48 = vcombine.low %v2872_v37, %v2876_v38  ;;  %v2873_v37 = vld [vmem:[%s3076_s17 + $0x6d0] sm:$0xff] }
  0xc0   : > { %v2877_v38 = vld [vmem:[%s3076_s17 + $0x6f0] sm:$0xff] }
  0xc1   : > { %1752 = vmatpush1.bf16.msra.mxu0 %v2811_v44  ;;  %1793 = vmatpush1.bf16.msra.mxu1 %v2813_v45  ;;  %v2883_v44 = vld [vmem:[%s3076_s17 + $0x720] sm:$0xff]  ;;  %v2880_v45 = vld [vmem:[%s3076_s17 + $0x708] sm:$0xff] }
  0xc2   : > { %1753 = vmatprep.subr.bf16.mxu0 %v2820_v46  ;;  %1794 = vmatprep.subr.bf16.mxu1 %v2822_v47  ;;  %v2884_v46 = vld [vmem:[%s3076_s17 + $0x728] sm:$0xff]  ;;  %v2935_v47 = vcombine.low %v2871_v36, %v2875_v12  ;;  %v2944_v49 = vcombine.high %v2879_v43, %v2883_v44  ;;  %v2932_v36 = vcombine.high %v2865_v30, %v2869_v31 }
  0xc3   : > { %v2946_v50 = vcombine.high %v2880_v45, %v2884_v46  ;;  %v2945_v56 = vcombine.low %v2880_v45, %v2884_v46  ;;  %v2881_v45 = vld [vmem:[%s3076_s17 + $0x710] sm:$0xff] }
  0xc4   : > { %v2885_v46 = vld [vmem:[%s3076_s17 + $0x730] sm:$0xff] }
  0xc5   : > { %1754 = vmatpush1.bf16.msra.mxu0 %v2819_v52  ;;  %1795 = vmatpush1.bf16.msra.mxu1 %v2821_v53  ;;  %v2891_v52 = vld [vmem:[%s3076_s17 + $0x760] sm:$0xff]  ;;  %v2888_v53 = vld [vmem:[%s3076_s17 + $0x748] sm:$0xff] }
  0xc6   : > { %1755 = vmatprep.subr.bf16.mxu0 %v2828_v54  ;;  %1796 = vmatprep.subr.bf16.mxu1 %v2830_v55  ;;  %v2892_v54 = vld [vmem:[%s3076_s17 + $0x768] sm:$0xff]  ;;  %v2943_v55 = vcombine.low %v2879_v43, %v2883_v44  ;;  %v2952_v57 = vcombine.high %v2887_v51, %v2891_v52  ;;  %v2940_v43 = vcombine.high %v2873_v37, %v2877_v38 }
  0xc7   : > { %v2954_v58 = vcombine.high %v2888_v53, %v2892_v54  ;;  %v2953_v1 = vcombine.low %v2888_v53, %v2892_v54  ;;  %v2893_v53 = vld [vmem:[%s3076_s17 + $0x770] sm:$0xff]  ;;  %v2890_v54 = vld [vmem:[%s3076_s17 + $0x758] sm:$0xff] }
  0xc9   : > { %1756 = vmatpush1.bf16.msra.mxu0 %v2827_v60  ;;  %1797 = vmatpush1.bf16.msra.mxu1 %v2829_v61  ;;  %v2899_v60 = vld [vmem:[%s3076_s17 + $0x7a0] sm:$0xff]  ;;  %v2896_v61 = vld [vmem:[%s3076_s17 + $0x788] sm:$0xff] }
  0xca   : > { %1757 = vmatprep.subr.bf16.mxu0 %v2836_v62  ;;  %1798 = vmatprep.subr.bf16.mxu1 %v2838_v63  ;;  %v2900_v62 = vld [vmem:[%s3076_s17 + $0x7a8] sm:$0xff]  ;;  %v2951_v63 = vcombine.low %v2887_v51, %v2891_v52  ;;  %v2960_v2 = vcombine.high %v2895_v59, %v2899_v60  ;;  %v2959_v8 = vcombine.low %v2895_v59, %v2899_v60  ;;  %v2889_v52 = vld [vmem:[%s3076_s17 + $0x750] sm:$0xff] }
  0xcb   : > { %v2962_v3 = vcombine.high %v2896_v61, %v2900_v62  ;;  %v2897_v60 = vld [vmem:[%s3076_s17 + $0x790] sm:$0xff] }
  0xcd   : > { %1758 = vmatpush1.bf16.msra.mxu0 %v2835_v5  ;;  %1799 = vmatpush1.bf16.msra.mxu1 %v2837_v6  ;;  %v2907_v5 = vld [vmem:[%s3076_s17 + $0x7e0] sm:$0xff]  ;;  %v2904_v6 = vld [vmem:[%s3076_s17 + $0x7c8] sm:$0xff] }
  0xce   : > { %1759 = vmatprep.subr.bf16.mxu0 %v2844_v7  ;;  %1800 = vmatprep.subr.bf16.mxu1 %v2846_v9  ;;  %v2908_v7 = vld [vmem:[%s3076_s17 + $0x7e8] sm:$0xff]  ;;  %v2961_v9 = vcombine.low %v2896_v61, %v2900_v62  ;;  %v2968_v10 = vcombine.high %v2903_v4, %v2907_v5  ;;  %v2901_v61 = vld [vmem:[%s3076_s17 + $0x7b0] sm:$0xff]  ;;  %v2898_v62 = vld [vmem:[%s3076_s17 + $0x798] sm:$0xff] }
  0xcf   : > { %v2970_v11 = vcombine.high %v2904_v6, %v2908_v7 }
  0xd1   : > { %1760 = vmatpush1.bf16.msra.mxu0 %v2843_v15  ;;  %1801 = vmatpush1.bf16.msra.mxu1 %v2845_v16  ;;  %v2850_v15 = vld [vmem:[%s3076_s17 + $0x618] sm:$0xff] }
  0xd2   : > { %2220 = vmatprep.subr.bf16.mxu0 %v2912_v17  ;;  %2261 = vmatprep.subr.bf16.mxu1 %v2914_v18  ;;  %v2854_v16 = vld [vmem:[%s3076_s17 + $0x638] sm:$0xff]  ;;  %v2967_v17 = vcombine.low %v2903_v4, %v2907_v5  ;;  %v2969_v18 = vcombine.low %v2904_v6, %v2908_v7  ;;  %v2905_v6 = vld [vmem:[%s3076_s17 + $0x7d0] sm:$0xff] }
  0xd3   : > { %v2918_v20 = vcombine.high %v2850_v15, %v2854_v16  ;;  %v2909_v7 = vld [vmem:[%s3076_s17 + $0x7f0] sm:$0xff] }
  0xd4   : > { %1778 = vmatmul.mubr.bf16.vlgmr.msra.gmra.mrb[20].mxu0 %v3311_v29  ;;  %1819 = vmatmul.mubr.bf16.vlgmr.msra.gmra.mrb[20].mxu1 %v3311_v29 }
  0xd5   : > { %2221 = vmatpush1.bf16.msra.mxu0 %v2911_v23  ;;  %2262 = vmatpush1.bf16.msra.mxu1 %v2913_v24  ;;  %v2858_v23 = vld [vmem:[%s3076_s17 + $0x658] sm:$0xff] }
  0xd6   : > { %2222 = vmatprep.subr.bf16.mxu0 %v2920_v25  ;;  %2263 = vmatprep.subr.bf16.mxu1 %v2922_v26  ;;  %v2862_v24 = vld [vmem:[%s3076_s17 + $0x678] sm:$0xff]  ;;  %v2915_v25 = vcombine.low %v2849_v13, %v2853_v14  ;;  %v2917_v26 = vcombine.low %v2850_v15, %v2854_v16  ;;  %v2963_v15 = vcombine.low %v2897_v60, %v2901_v61 }
  0xd7   : > { %2252 = vmatprep.mubr.bf16.mxu0 %v3038_v0  ;;  %2293 = vmatprep.mubr.bf16.mxu1 %v3038_v0  ;;  %v2926_v28 = vcombine.high %v2858_v23, %v2862_v24 }
  0xd9   : > { %2223 = vmatpush1.bf16.msra.mxu0 %v2919_v32  ;;  %2264 = vmatpush1.bf16.msra.mxu1 %v2921_v33  ;;  %v2866_v32 = vld [vmem:[%s3076_s17 + $0x698] sm:$0xff] }
  0xda   : > { %2224 = vmatprep.subr.bf16.mxu0 %v2928_v34  ;;  %2265 = vmatprep.subr.bf16.mxu1 %v2930_v35  ;;  %v2870_v33 = vld [vmem:[%s3076_s17 + $0x6b8] sm:$0xff]  ;;  %v2923_v34 = vcombine.low %v2857_v21, %v2861_v22  ;;  %v2925_v35 = vcombine.low %v2858_v23, %v2862_v24  ;;  %v2971_v22 = vcombine.low %v2905_v6, %v2909_v7 }
  0xdb   : > { %v2934_v12 = vcombine.high %v2866_v32, %v2870_v33 }
  0xdd   : > { %2225 = vmatpush1.bf16.msra.mxu0 %v2927_v39  ;;  %2266 = vmatpush1.bf16.msra.mxu1 %v2929_v40  ;;  %v2874_v39 = vld [vmem:[%s3076_s17 + $0x6d8] sm:$0xff] }
  0xde   : > { %2226 = vmatprep.subr.bf16.mxu0 %v2936_v41  ;;  %2267 = vmatprep.subr.bf16.mxu1 %v2938_v42  ;;  %v2878_v40 = vld [vmem:[%s3076_s17 + $0x6f8] sm:$0xff]  ;;  %v2931_v41 = vcombine.low %v2865_v30, %v2869_v31  ;;  %v2933_v42 = vcombine.low %v2866_v32, %v2870_v33 }
  0xdf   : > { %v2942_v44 = vcombine.high %v2874_v39, %v2878_v40 }
  0xe1   : > { %2227 = vmatpush1.bf16.msra.mxu0 %v2935_v47  ;;  %2268 = vmatpush1.bf16.msra.mxu1 %v2937_v48  ;;  %v2882_v47 = vld [vmem:[%s3076_s17 + $0x718] sm:$0xff] }
  0xe2   : > { %2228 = vmatprep.subr.bf16.mxu0 %v2944_v49  ;;  %2269 = vmatprep.subr.bf16.mxu1 %v2946_v50  ;;  %v2886_v48 = vld [vmem:[%s3076_s17 + $0x738] sm:$0xff]  ;;  %v2939_v49 = vcombine.low %v2873_v37, %v2877_v38  ;;  %v2948_v50 = vcombine.high %v2881_v45, %v2885_v46 }
  0xe3   : > { %v2950_v51 = vcombine.high %v2882_v47, %v2886_v48 }
  0xe5   : > { %2229 = vmatpush1.bf16.msra.mxu0 %v2943_v55  ;;  %2270 = vmatpush1.bf16.msra.mxu1 %v2945_v56  ;;  %v2894_v55 = vld [vmem:[%s3076_s17 + $0x778] sm:$0xff]  ;;  %v2947_v56 = vcombine.low %v2881_v45, %v2885_v46 }
  0xe6   : > { %2230 = vmatprep.subr.bf16.mxu0 %v2952_v57  ;;  %2271 = vmatprep.subr.bf16.mxu1 %v2954_v58  ;;  %v2949_v57 = vcombine.low %v2882_v47, %v2886_v48  ;;  %v2956_v58 = vcombine.high %v2889_v52, %v2893_v53  ;;  %v2958_v59 = vcombine.high %v2890_v54, %v2894_v55 }
  0xe9   : > { %2231 = vmatpush1.bf16.msra.mxu0 %v2951_v63  ;;  %2272 = vmatpush1.bf16.msra.mxu1 %v2953_v1  ;;  %v2902_v63 = vld [vmem:[%s3076_s17 + $0x7b8] sm:$0xff]  ;;  %v2955_v1 = vcombine.low %v2889_v52, %v2893_v53 }
  0xea   : > { %2232 = vmatprep.subr.bf16.mxu0 %v2960_v2  ;;  %2273 = vmatprep.subr.bf16.mxu1 %v2962_v3  ;;  %v2957_v2 = vcombine.low %v2890_v54, %v2894_v55  ;;  %v2964_v3 = vcombine.high %v2897_v60, %v2901_v61  ;;  %v2966_v5 = vcombine.high %v2898_v62, %v2902_v63 }
  0xed   : > { %2233 = vmatpush1.bf16.msra.mxu0 %v2959_v8  ;;  %2274 = vmatpush1.bf16.msra.mxu1 %v2961_v9 }
  0xee   : > { %2234 = vmatprep.subr.bf16.mxu0 %v2968_v10  ;;  %2275 = vmatprep.subr.bf16.mxu1 %v2970_v11  ;;  %v2906_v10 = vld [vmem:[%s3076_s17 + $0x7d8] sm:$0xff] }
  0xef   : > { %v2910_v11 = vld [vmem:[%s3076_s17 + $0x7f8] sm:$0xff] }
  0xf0   : > { %v2974_v21 = vcombine.high %v2906_v10, %v2910_v11  ;;  %v2973_v23 = vcombine.low %v2906_v10, %v2910_v11 }
  0xf1   : > { %2235 = vmatpush1.bf16.msra.mxu0 %v2967_v17  ;;  %2276 = vmatpush1.bf16.msra.mxu1 %v2969_v18  ;;  %v2965_v18 = vcombine.low %v2898_v62, %v2902_v63 }
  0xf2   : > { %2302 = vmatprep.subr.bf16.mxu0 %v2916_v19  ;;  %2343 = vmatprep.subr.bf16.mxu1 %v2918_v20  ;;  %v2972_v19 = vcombine.high %v2905_v6, %v2909_v7 }
  0xf4   : > { %2253 = vmatmul.mubr.bf16.vlgmr.msra.gmra.mrb[24].mxu0 %v3311_v29  ;;  %2294 = vmatmul.mubr.bf16.vlgmr.msra.gmra.mrb[24].mxu1 %v3311_v29 }
  0xf5   : > { %2303 = vmatpush1.bf16.msra.mxu0 %v2915_v25  ;;  %2344 = vmatpush1.bf16.msra.mxu1 %v2917_v26 }
  0xf6   : > { %2304 = vmatprep.subr.bf16.mxu0 %v2924_v27  ;;  %2345 = vmatprep.subr.bf16.mxu1 %v2926_v28 }
  0xf7   : > { %2334 = vmatprep.mubr.bf16.mxu0 %v3038_v0  ;;  %2375 = vmatprep.mubr.bf16.mxu1 %v3038_v0  ;;  %v2941_v0 = vcombine.low %v2874_v39, %v2878_v40 }
  0xf9   : > { %2305 = vmatpush1.bf16.msra.mxu0 %v2923_v34  ;;  %2346 = vmatpush1.bf16.msra.mxu1 %v2925_v35 }
  0xfa   : > { %2306 = vmatprep.subr.bf16.mxu0 %v2932_v36  ;;  %2347 = vmatprep.subr.bf16.mxu1 %v2934_v12 }
  0xfd   : > { %2307 = vmatpush1.bf16.msra.mxu0 %v2931_v41  ;;  %2348 = vmatpush1.bf16.msra.mxu1 %v2933_v42 }
  0xfe   : > { %2308 = vmatprep.subr.bf16.mxu0 %v2940_v43  ;;  %2349 = vmatprep.subr.bf16.mxu1 %v2942_v44 }
 0x101   : > { %2309 = vmatpush1.bf16.msra.mxu0 %v2939_v49  ;;  %2350 = vmatpush1.bf16.msra.mxu1 %v2941_v0 }
 0x102   : > { %2310 = vmatprep.subr.bf16.mxu0 %v2948_v50  ;;  %2351 = vmatprep.subr.bf16.mxu1 %v2950_v51 }
 0x105   : > { %2311 = vmatpush1.bf16.msra.mxu0 %v2947_v56  ;;  %2352 = vmatpush1.bf16.msra.mxu1 %v2949_v57 }
 0x106   : > { %2312 = vmatprep.subr.bf16.mxu0 %v2956_v58  ;;  %2353 = vmatprep.subr.bf16.mxu1 %v2958_v59 }
 0x107   : > { %v3371_v4 = vpop.f32.mrb[0].mxu0  ;;  %v3375_v8 = vpop.f32.mrb[0].mxu1 }
 0x108   : > { %v3377_v9 = vpop.f32.mrb[1].mxu0  ;;  %v3381_v13 = vpop.f32.mrb[1].mxu1 }
 0x109   : > { %v595_v14 = vpop.f32.mrb[2].mxu0  ;;  %2313 = vmatpush1.bf16.msra.mxu0 %v2955_v1  ;;  %v636_v16 = vpop.f32.mrb[2].mxu1  ;;  %2354 = vmatpush1.bf16.msra.mxu1 %v2957_v2 }
 0x10a   : > { %v596_v17 = vpop.f32.mrb[3].mxu0  ;;  %2314 = vmatprep.subr.bf16.mxu0 %v2964_v3  ;;  %v637_v20 = vpop.f32.mrb[3].mxu1  ;;  %2355 = vmatprep.subr.bf16.mxu1 %v2966_v5 }
 0x10d   : > { %2315 = vmatpush1.bf16.msra.mxu0 %v2963_v15  ;;  %2356 = vmatpush1.bf16.msra.mxu1 %v2965_v18 }
 0x10e   : > { %2316 = vmatprep.subr.bf16.mxu0 %v2972_v19  ;;  %2357 = vmatprep.subr.bf16.mxu1 %v2974_v21 }
 0x111   : > { %2317 = vmatpush1.bf16.msra.mxu0 %v2971_v22  ;;  %2358 = vmatpush1.bf16.msra.mxu1 %v2973_v23 }
 0x114   : > { %2335 = vmatmul.mubr.bf16.vlgmr.msra.gmra.mrb[28].mxu0 %v3311_v29  ;;  %2376 = vmatmul.mubr.bf16.vlgmr.msra.gmra.mrb[28].mxu1 %v3311_v29 }
 0x117   : > { %v2396_v17 = vpop.permute.xlu0 %2395 }
 0x127   : > { %v673_v24 = vpop.f32.mrb[4].mxu0  ;;  %v714_v25 = vpop.f32.mrb[4].mxu1 }
 0x128   : > { %v675_v26 = vpop.f32.mrb[5].mxu0  ;;  %v716_v27 = vpop.f32.mrb[5].mxu1 }
 0x129   : > { %v677_v28 = vpop.f32.mrb[6].mxu0  ;;  %v718_v30 = vpop.f32.mrb[6].mxu1 }
 0x12a   : > { %v678_v31 = vpop.f32.mrb[7].mxu0  ;;  %v719_v32 = vpop.f32.mrb[7].mxu1 }
 0x147   : > { %v1140_v33 = vpop.f32.mrb[8].mxu0  ;;  %v1181_v35 = vpop.f32.mrb[8].mxu1 }
 0x148   : > { %v1270_v34 = vmax.f32 %v3371_v4, %v1140_v33  ;;  %v1142_v36 = vpop.f32.mrb[9].mxu0  ;;  %v1272_v12 = vmax.f32 %v3375_v8, %v1181_v35  ;;  %v1183_v38 = vpop.f32.mrb[9].mxu1 }
 0x149   : > { %v1271_v37 = vmax.f32 %v3377_v9, %v1142_v36  ;;  %v1144_v39 = vpop.f32.mrb[10].mxu0  ;;  %v1273_v29 = vmax.f32 %v3381_v13, %v1183_v38  ;;  %v1185_v40 = vpop.f32.mrb[10].mxu1 }
 0x14a   : > { %v1145_v41 = vpop.f32.mrb[11].mxu0  ;;  %v1186_v42 = vpop.f32.mrb[11].mxu1 }
 0x167   : > { %v1222_v43 = vpop.f32.mrb[12].mxu0  ;;  %v1263_v45 = vpop.f32.mrb[12].mxu1 }
 0x168   : > { %v1274_v44 = vmax.f32 %v673_v24, %v1222_v43  ;;  %v1224_v46 = vpop.f32.mrb[13].mxu0  ;;  %v1276_v47 = vmax.f32 %v714_v25, %v1263_v45  ;;  %v1265_v49 = vpop.f32.mrb[13].mxu1 }
 0x169   : > { %v1275_v48 = vmax.f32 %v675_v26, %v1224_v46  ;;  %v1226_v0 = vpop.f32.mrb[14].mxu0  ;;  %v1277_v50 = vmax.f32 %v716_v27, %v1265_v49  ;;  %v1267_v51 = vpop.f32.mrb[14].mxu1 }
 0x16a   : > { %v1227_v52 = vpop.f32.mrb[15].mxu0  ;;  %v1268_v53 = vpop.f32.mrb[15].mxu1 }
 0x187   : > { %v1697_v54 = vpop.f32.mrb[16].mxu0  ;;  %v1738_v56 = vpop.f32.mrb[16].mxu1 }
 0x188   : > { %v1827_v55 = vmax.f32 %v1270_v34, %v1697_v54  ;;  %v1699_v57 = vpop.f32.mrb[17].mxu0  ;;  %v1829_v58 = vmax.f32 %v1272_v12, %v1738_v56  ;;  %v1740_v60 = vpop.f32.mrb[17].mxu1 }
 0x189   : > { %v1828_v59 = vmax.f32 %v1271_v37, %v1699_v57  ;;  %v1701_v61 = vpop.f32.mrb[18].mxu0  ;;  %v1830_v62 = vmax.f32 %v1273_v29, %v1740_v60  ;;  %v1742_v63 = vpop.f32.mrb[18].mxu1 }
 0x18a   : > { %v1702_v1 = vpop.f32.mrb[19].mxu0  ;;  %v1743_v2 = vpop.f32.mrb[19].mxu1 }
 0x1a7   : > { %v1779_v3 = vpop.f32.mrb[20].mxu0  ;;  %v1820_v5 = vpop.f32.mrb[20].mxu1 }
 0x1a8   : > { %v3389_v4 = vmax.f32 %v1274_v44, %v1779_v3  ;;  %v1781_v6 = vpop.f32.mrb[21].mxu0  ;;  %v3391_v7 = vmax.f32 %v1276_v47, %v1820_v5  ;;  %v1822_v9 = vpop.f32.mrb[21].mxu1 }
 0x1a9   : > { %v3393_v8 = vmax.f32 %v1275_v48, %v1781_v6  ;;  %v1783_v10 = vpop.f32.mrb[22].mxu0  ;;  %v3395_v11 = vmax.f32 %v1277_v50, %v1822_v9  ;;  %v1824_v13 = vpop.f32.mrb[22].mxu1 }
 0x1aa   : > { %v1784_v14 = vpop.f32.mrb[23].mxu0  ;;  %v1825_v15 = vpop.f32.mrb[23].mxu1 }
 0x1c7   : > { %v2254_v16 = vpop.f32.mrb[24].mxu0  ;;  %v2295_v19 = vpop.f32.mrb[24].mxu1 }
 0x1c8   : > { %v2384_v18 = vmax.f32 %v1827_v55, %v2254_v16  ;;  %v2256_v20 = vpop.f32.mrb[25].mxu0  ;;  %v2386_v21 = vmax.f32 %v1829_v58, %v2295_v19  ;;  %v2297_v23 = vpop.f32.mrb[25].mxu1 }
 0x1c9   : > { %v2385_v22 = vmax.f32 %v1828_v59, %v2256_v20  ;;  %v2258_v24 = vpop.f32.mrb[26].mxu0  ;;  %v2387_v25 = vmax.f32 %v1830_v62, %v2297_v23  ;;  %v2299_v27 = vpop.f32.mrb[26].mxu1 }
 0x1ca   : > { %v2398_v26 = vadd.f32 %v2396_v17, %v2384_v18  ;;  %v2259_v28 = vpop.f32.mrb[27].mxu0  ;;  %v2400_v31 = vadd.f32 %v2396_v17, %v2386_v21  ;;  %v2300_v32 = vpop.f32.mrb[27].mxu1 }
 0x1cb   : > { %v2399_v30 = vadd.f32 %v2396_v17, %v2385_v22  ;;  %v2401_v33 = vadd.f32 %v2396_v17, %v2387_v25 }
 0x1cc   : > { %v2975_v34 = vmul.f32 -1.442695, %v2398_v26  ;;  %v2977_v36 = vmul.f32 -1.442695, %v2400_v31 }
 0x1cd   : > { %v2976_v35 = vmul.f32 -1.442695, %v2399_v30  ;;  %v2978_v12 = vmul.f32 -1.442695, %v2401_v33 }
 0x1ce   : > { %2997 = vpow2.f32 %v2975_v34 }
 0x1cf   : > { %2999 = vpow2.f32 %v2976_v35 }
 0x1d0   : > { %3001 = vpow2.f32 %v2977_v36 }
 0x1d1   : > { %3003 = vpow2.f32 %v2978_v12 }
 0x1d8   : > { %v2998_v37 = vpop.eup %2997 }
 0x1d9   : > { %v3000_v38 = vpop.eup %2999  ;;  %v2430_v39 = vadd.f32 1.0, %v2998_v37 }
 0x1da   : > { %v3002_v29 = vpop.eup %3001  ;;  %v2431_v40 = vadd.f32 1.0, %v3000_v38 }
 0x1db   : > { %v3004_v41 = vpop.eup %3003  ;;  %v2432_v42 = vadd.f32 1.0, %v3002_v29  ;;  %3005 = vrcp.f32 %v2430_v39 }
 0x1dc   : > { %v2433_v43 = vadd.f32 1.0, %v3004_v41  ;;  %3007 = vrcp.f32 %v2431_v40 }
 0x1dd   : > { %3009 = vrcp.f32 %v2432_v42 }
 0x1de   : > { %3011 = vrcp.f32 %v2433_v43 }
 0x1e5   : > { %v3006_v44 = vpop.eup %3005 }
 0x1e6   : > { %v3008_v45 = vpop.eup %3007  ;;  %2454 = vst [vmem:[%s3401_s27] sm:$0x3f] %v3006_v44 }
 0x1e7   : > { %v3010_v46 = vpop.eup %3009  ;;  %2455 = vst [vmem:[%s3401_s27 + $0x8] sm:$0x3f] %v3008_v45  ;;  %v2336_v47 = vpop.f32.mrb[28].mxu0 }
 0x1e8   : > { %v3012_v48 = vpop.eup %3011  ;;  %2456 = vst [vmem:[%s3401_s27 + $0x10] sm:$0x3f] %v3010_v46  ;;  %v2388_v49 = vmax.f32 %v3389_v4, %v2336_v47  ;;  %v2377_v0 = vpop.f32.mrb[28].mxu1 }
 0x1e9   : > { %v2338_v50 = vpop.f32.mrb[29].mxu0  ;;  %2457 = vst [vmem:[%s3401_s27 + $0x18] sm:$0x3f] %v3012_v48  ;;  %v2390_v51 = vmax.f32 %v3391_v7, %v2377_v0  ;;  %v2379_v53 = vpop.f32.mrb[29].mxu1 }
 0x1ea   : > { %v2389_v52 = vmax.f32 %v3393_v8, %v2338_v50  ;;  %v2340_v54 = vpop.f32.mrb[30].mxu0  ;;  %v2402_v55 = vadd.f32 %v2396_v17, %v2388_v49  ;;  %v2391_v56 = vmax.f32 %v3395_v11, %v2379_v53  ;;  %v2381_v57 = vpop.f32.mrb[30].mxu1 }
 0x1eb   : > { %v2341_v58 = vpop.f32.mrb[31].mxu0  ;;  %v2404_v59 = vadd.f32 %v2396_v17, %v2390_v51  ;;  %v2382_v61 = vpop.f32.mrb[31].mxu1 }
 0x1ec   : > { %v2403_v60 = vadd.f32 %v2396_v17, %v2389_v52  ;;  %v2979_v62 = vmul.f32 -1.442695, %v2402_v55  ;;  %v2405_v63 = vadd.f32 %v2396_v17, %v2391_v56 }
 0x1ed   : > { %v2981_v1 = vmul.f32 -1.442695, %v2404_v59 }
 0x1ee   : > { %v2980_v2 = vmul.f32 -1.442695, %v2403_v60  ;;  %3013 = vpow2.f32 %v2979_v62  ;;  %v2982_v3 = vmul.f32 -1.442695, %v2405_v63 }
 0x1ef   : > { %3015 = vpow2.f32 %v2981_v1 }
 0x1f0   : > { %3017 = vpow2.f32 %v2980_v2 }
 0x1f1   : > { %3019 = vpow2.f32 %v2982_v3 }
 0x1f8   : > { %v3014_v4 = vpop.eup %3013 }
 0x1f9   : > { %v3016_v5 = vpop.eup %3015  ;;  %v2434_v6 = vadd.f32 1.0, %v3014_v4 }
 0x1fa   : > { %v3018_v7 = vpop.eup %3017  ;;  %v2436_v8 = vadd.f32 1.0, %v3016_v5 }
 0x1fb   : > { %v3020_v9 = vpop.eup %3019  ;;  %3021 = vrcp.f32 %v2434_v6  ;;  %v2435_v10 = vadd.f32 1.0, %v3018_v7 }
 0x1fc   : > { %3023 = vrcp.f32 %v2436_v8  ;;  %v2437_v11 = vadd.f32 1.0, %v3020_v9 }
 0x1fd   : > { %3025 = vrcp.f32 %v2435_v10 }
 0x1fe   : > { %3027 = vrcp.f32 %v2437_v11 }
 0x205   : > { %v3022_v13 = vpop.eup %3021 }
 0x206   : > { %v3024_v14 = vpop.eup %3023  ;;  %2458 = vst [vmem:[%s3401_s27 + $0x20] sm:$0x3f] %v3022_v13 }
 0x207   : > { %v3026_v15 = vpop.eup %3025  ;;  %2460 = vst [vmem:[%s3401_s27 + $0x30] sm:$0x3f] %v3024_v14 }
 0x208   : > { %v3028_v16 = vpop.eup %3027  ;;  %2459 = vst [vmem:[%s3401_s27 + $0x28] sm:$0x3f] %v3026_v15 }
 0x209   : > { %2462 = vst.msk [vmem:[%s3401_s27 + $0x38] sm:$0x3f] %vm2461_vm0, %v3028_v16 }
 0x20a PF: > { %s13_s12 = sadd.s32 1, %s3036_s12  }
 0x20b   : > { %p10_p4 = scmp.ge.s32.totalorder %s13_s12, 4  }
 0x20d   :  { %12 = sbr.rel (!%p10_p4) target bundleno = 1 (0x1), region = 65 }

// kernel: lenet5_forward.4
= control target key start
LH: loop header
LB: loop body
LE: loop exit
PB: predicated region body
PF: predicated region fallthrough
CT: control target
= control target key end

     0   :  { %s1731_s12 = smov 0   ;;  %s1906_s0 = inlined_call_operand.vmem [shape: bf16[2,4,256,169], index: 0, kind: input, shape index: {}]   ;;  %s1907_s1 = inlined_call_operand.vmem [shape: bf16[16,256], index: 1, kind: input, shape index: {}]   ;;  %s1908_s2 = inlined_call_operand.vmem [shape: f32[16,1], index: 2, kind: input, shape index: {}]   ;;  %s1909_s3 = inlined_call_operand.vmem [shape: f32[2,16,169], index: 3, kind: output, shape index: {}]  }
   0x1 LB: > { %s1238_s13 = sadd.s32 4294967295, %s1708_s12   ;;  %p1242_p0 = scmp.ge.s32.totalorder %s1708_s12, 1  ;;  %s1708_s12 = sphi %s1731_s12, %s13_s12  }
   0x2   : > { %p137_p1 = scmp.lt.s32.totalorder %s1708_s12, 3 }
   0x4   : > { %p138_p2 = pnand %p1242_p0, %p137_p1 }
   0x5   : > { %p161_p3 = scmp.lt.s32.totalorder (!%p138_p2), %s1238_s13, 1  ;;  %v1742_v0 = vld [vmem:[%s1907_s1 + $0x4] ss:$8 sps:$4 sm:$0xff] (!%p138_p2)   ;;  %v1710_v9 = vmov (!%p138_p2), 0   ;;  %vm1179_vm0 = vcmask (!%p138_p2), 334848  }
   0x6   : > { %141 = sbr.rel (%p138_p2) target bundleno = 393 (0x189), region = 32  ;;  %407 = vmatprep.mubr.bf16.mxu0 (!%p138_p2), %v1742_v0  ;;  %643 = vmatprep.mubr.bf16.mxu1 (!%p138_p2), %v1742_v0 }
   0x7   : > { %1490 = vset.pattern.permute.xlu0 (!%p138_p2), %v1710_v9 }
   0xd   : > { %s1911_s13 = smov (!%p161_p3, %s1238_s13), 1 }
   0xe   : > { %s1479_s16 = sshll.u32 %s1911_s13, 10  ;;  %s1480_s26 = sshll.u32 %s1911_s13, 5 }
   0xf   : > { %s1752_s19 = scalar_lea.vmem %s1906_s0, %s1479_s16  ;;  %s170_s29 = scalar_lea.vmem %s1909_s3, %s1480_s26 }
  0x10   : > { %v1491_v1 = vld [vmem:[%s1752_s19 + $0x4] ss:$8 sps:$4 sm:$0xff]   ;;  %v1495_v3 = vld [vmem:[%s1752_s19] ss:$8 sps:$4 sm:$0xff]   ;;  %v1497_v5 = vld [vmem:[%s1752_s19 + $0x14] ss:$8 sps:$4 sm:$0xff]  }
  0x11   : > { %v1493_v2 = vld [vmem:[%s1752_s19 + $0x104] ss:$8 sps:$4 sm:$0xff]   ;;  %375 = vmatprep.subr.bf16.mxu0 %v1491_v1  ;;  %v1496_v4 = vld [vmem:[%s1752_s19 + $0x100] ss:$8 sps:$4 sm:$0xff]   ;;  %v1499_v6 = vld [vmem:[%s1752_s19 + $0x114] ss:$8 sps:$4 sm:$0xff]  }
  0x12   : > { %611 = vmatprep.subr.bf16.mxu1 %v1493_v2  ;;  %376 = vmatpush1.bf16.msra.mxu0 %v1495_v3  ;;  %v1501_v7 = vld [vmem:[%s1752_s19 + $0x10] ss:$8 sps:$4 sm:$0xff]   ;;  %v1503_v10 = vld [vmem:[%s1752_s19 + $0x24] ss:$8 sps:$4 sm:$0xff]   ;;  %v1507_v12 = vld [vmem:[%s1752_s19 + $0x20] ss:$8 sps:$4 sm:$0xff]  }
  0x13   : > { %612 = vmatpush1.bf16.msra.mxu1 %v1496_v4  ;;  %377 = vmatprep.subr.bf16.mxu0 %v1497_v5  ;;  %v1502_v8 = vld [vmem:[%s1752_s19 + $0x110] ss:$8 sps:$4 sm:$0xff]   ;;  %v1505_v11 = vld [vmem:[%s1752_s19 + $0x124] ss:$8 sps:$4 sm:$0xff]   ;;  %v1508_v13 = vld [vmem:[%s1752_s19 + $0x120] ss:$8 sps:$4 sm:$0xff]  }
  0x14   : > { %613 = vmatprep.subr.bf16.mxu1 %v1499_v6  ;;  %v1509_v14 = vld [vmem:[%s1752_s19 + $0x34] ss:$8 sps:$4 sm:$0xff]   ;;  %v1513_v16 = vld [vmem:[%s1752_s19 + $0x30] ss:$8 sps:$4 sm:$0xff]   ;;  %v1515_v18 = vld [vmem:[%s1752_s19 + $0x44] ss:$8 sps:$4 sm:$0xff]  }
  0x15   : > { %v1511_v15 = vld [vmem:[%s1752_s19 + $0x134] ss:$8 sps:$4 sm:$0xff]   ;;  %v1514_v17 = vld [vmem:[%s1752_s19 + $0x130] ss:$8 sps:$4 sm:$0xff]   ;;  %v1517_v19 = vld [vmem:[%s1752_s19 + $0x144] ss:$8 sps:$4 sm:$0xff]  }
  0x16   : > { %378 = vmatpush1.bf16.msra.mxu0 %v1501_v7  ;;  %v1519_v20 = vld [vmem:[%s1752_s19 + $0x40] ss:$8 sps:$4 sm:$0xff]   ;;  %v1521_v22 = vld [vmem:[%s1752_s19 + $0x54] ss:$8 sps:$4 sm:$0xff]   ;;  %v1525_v24 = vld [vmem:[%s1752_s19 + $0x50] ss:$8 sps:$4 sm:$0xff]  }
  0x17   : > { %614 = vmatpush1.bf16.msra.mxu1 %v1502_v8  ;;  %379 = vmatprep.subr.bf16.mxu0 %v1503_v10  ;;  %v1520_v21 = vld [vmem:[%s1752_s19 + $0x140] ss:$8 sps:$4 sm:$0xff]   ;;  %v1523_v23 = vld [vmem:[%s1752_s19 + $0x154] ss:$8 sps:$4 sm:$0xff]   ;;  %v1526_v25 = vld [vmem:[%s1752_s19 + $0x150] ss:$8 sps:$4 sm:$0xff]  }
  0x18   : > { %615 = vmatprep.subr.bf16.mxu1 %v1505_v11  ;;  %v1527_v26 = vld [vmem:[%s1752_s19 + $0x64] ss:$8 sps:$4 sm:$0xff]   ;;  %v1531_v28 = vld [vmem:[%s1752_s19 + $0x60] ss:$8 sps:$4 sm:$0xff]   ;;  %v1533_v30 = vld [vmem:[%s1752_s19 + $0x74] ss:$8 sps:$4 sm:$0xff]  }
  0x19   : > { %v1529_v27 = vld [vmem:[%s1752_s19 + $0x164] ss:$8 sps:$4 sm:$0xff]   ;;  %v1532_v29 = vld [vmem:[%s1752_s19 + $0x160] ss:$8 sps:$4 sm:$0xff]   ;;  %v1535_v31 = vld [vmem:[%s1752_s19 + $0x174] ss:$8 sps:$4 sm:$0xff]  }
  0x1a   : > { %380 = vmatpush1.bf16.msra.mxu0 %v1507_v12  ;;  %v1537_v32 = vld [vmem:[%s1752_s19 + $0x70] ss:$8 sps:$4 sm:$0xff]   ;;  %v1539_v34 = vld [vmem:[%s1752_s19 + $0x84] ss:$8 sps:$4 sm:$0xff]   ;;  %v1543_v36 = vld [vmem:[%s1752_s19 + $0x80] ss:$8 sps:$4 sm:$0xff]  }
  0x1b   : > { %616 = vmatpush1.bf16.msra.mxu1 %v1508_v13  ;;  %381 = vmatprep.subr.bf16.mxu0 %v1509_v14  ;;  %v1538_v33 = vld [vmem:[%s1752_s19 + $0x170] ss:$8 sps:$4 sm:$0xff]   ;;  %v1541_v35 = vld [vmem:[%s1752_s19 + $0x184] ss:$8 sps:$4 sm:$0xff]   ;;  %v1544_v37 = vld [vmem:[%s1752_s19 + $0x180] ss:$8 sps:$4 sm:$0xff]  }
  0x1c   : > { %617 = vmatprep.subr.bf16.mxu1 %v1511_v15  ;;  %v1545_v38 = vld [vmem:[%s1752_s19 + $0x94] ss:$8 sps:$4 sm:$0xff]   ;;  %v1549_v40 = vld [vmem:[%s1752_s19 + $0x90] ss:$8 sps:$4 sm:$0xff]   ;;  %v1551_v42 = vld [vmem:[%s1752_s19 + $0xa4] ss:$8 sps:$4 sm:$0xff]  }
  0x1d   : > { %v1547_v39 = vld [vmem:[%s1752_s19 + $0x194] ss:$8 sps:$4 sm:$0xff]   ;;  %v1550_v41 = vld [vmem:[%s1752_s19 + $0x190] ss:$8 sps:$4 sm:$0xff]   ;;  %v1553_v43 = vld [vmem:[%s1752_s19 + $0x1a4] ss:$8 sps:$4 sm:$0xff]  }
  0x1e   : > { %382 = vmatpush1.bf16.msra.mxu0 %v1513_v16  ;;  %v1555_v44 = vld [vmem:[%s1752_s19 + $0xa0] ss:$8 sps:$4 sm:$0xff]   ;;  %v1557_v46 = vld [vmem:[%s1752_s19 + $0xb4] ss:$8 sps:$4 sm:$0xff]   ;;  %v1561_v48 = vld [vmem:[%s1752_s19 + $0xb0] ss:$8 sps:$4 sm:$0xff]  }
  0x1f   : > { %618 = vmatpush1.bf16.msra.mxu1 %v1514_v17  ;;  %383 = vmatprep.subr.bf16.mxu0 %v1515_v18  ;;  %v1556_v45 = vld [vmem:[%s1752_s19 + $0x1a0] ss:$8 sps:$4 sm:$0xff]   ;;  %v1559_v47 = vld [vmem:[%s1752_s19 + $0x1b4] ss:$8 sps:$4 sm:$0xff]   ;;  %v1562_v49 = vld [vmem:[%s1752_s19 + $0x1b0] ss:$8 sps:$4 sm:$0xff]  }
  0x20   : > { %619 = vmatprep.subr.bf16.mxu1 %v1517_v19  ;;  %v1563_v50 = vld [vmem:[%s1752_s19 + $0xc4] ss:$8 sps:$4 sm:$0xff]   ;;  %v1567_v52 = vld [vmem:[%s1752_s19 + $0xc0] ss:$8 sps:$4 sm:$0xff]   ;;  %v1569_v54 = vld [vmem:[%s1752_s19 + $0xd4] ss:$8 sps:$4 sm:$0xff]  }
  0x21   : > { %v1565_v51 = vld [vmem:[%s1752_s19 + $0x1c4] ss:$8 sps:$4 sm:$0xff]   ;;  %v1568_v53 = vld [vmem:[%s1752_s19 + $0x1c0] ss:$8 sps:$4 sm:$0xff]   ;;  %v1571_v55 = vld [vmem:[%s1752_s19 + $0x1d4] ss:$8 sps:$4 sm:$0xff]  }
  0x22   : > { %384 = vmatpush1.bf16.msra.mxu0 %v1519_v20  ;;  %v1573_v56 = vld [vmem:[%s1752_s19 + $0xd0] ss:$8 sps:$4 sm:$0xff]   ;;  %v1575_v58 = vld [vmem:[%s1752_s19 + $0xe4] ss:$8 sps:$4 sm:$0xff]   ;;  %v1579_v60 = vld [vmem:[%s1752_s19 + $0xe0] ss:$8 sps:$4 sm:$0xff]  }
  0x23   : > { %620 = vmatpush1.bf16.msra.mxu1 %v1520_v21  ;;  %385 = vmatprep.subr.bf16.mxu0 %v1521_v22  ;;  %v1574_v57 = vld [vmem:[%s1752_s19 + $0x1d0] ss:$8 sps:$4 sm:$0xff]   ;;  %v1577_v59 = vld [vmem:[%s1752_s19 + $0x1e4] ss:$8 sps:$4 sm:$0xff]   ;;  %v1580_v61 = vld [vmem:[%s1752_s19 + $0x1e0] ss:$8 sps:$4 sm:$0xff]  }
  0x24   : > { %621 = vmatprep.subr.bf16.mxu1 %v1523_v23  ;;  %v1581_v62 = vld [vmem:[%s1752_s19 + $0xf4] ss:$8 sps:$4 sm:$0xff]   ;;  %v1585_v1 = vld [vmem:[%s1752_s19 + $0xf0] ss:$8 sps:$4 sm:$0xff]   ;;  %v1592_v3 = vld [vmem:[%s1752_s19 + $0x204] ss:$8 sps:$4 sm:$0xff]  }
  0x25   : > { %v1583_v63 = vld [vmem:[%s1752_s19 + $0x1f4] ss:$8 sps:$4 sm:$0xff]   ;;  %v1586_v2 = vld [vmem:[%s1752_s19 + $0x1f0] ss:$8 sps:$4 sm:$0xff]   ;;  %v1595_v4 = vld [vmem:[%s1752_s19 + $0x304] ss:$8 sps:$4 sm:$0xff]  }
  0x26   : > { %386 = vmatpush1.bf16.msra.mxu0 %v1525_v24  ;;  %v1823_v5 = vld [vmem:[%s1907_s1] ss:$8 sps:$4 sm:$0xff]   ;;  %v1598_v8 = vld [vmem:[%s1752_s19 + $0x214] ss:$8 sps:$4 sm:$0xff]   ;;  %v1596_v10 = vld [vmem:[%s1752_s19 + $0x210] ss:$8 sps:$4 sm:$0xff]  }
  0x27   : > { %622 = vmatpush1.bf16.msra.mxu1 %v1526_v25  ;;  %387 = vmatprep.subr.bf16.mxu0 %v1527_v26  ;;  %v1590_v6 = vld [vmem:[%s1752_s19 + $0x200] ss:$8 sps:$4 sm:$0xff]   ;;  %v1601_v9 = vld [vmem:[%s1752_s19 + $0x314] ss:$8 sps:$4 sm:$0xff]   ;;  %v1599_v11 = vld [vmem:[%s1752_s19 + $0x310] ss:$8 sps:$4 sm:$0xff]  }
  0x28   : > { %623 = vmatprep.subr.bf16.mxu1 %v1529_v27  ;;  %v1593_v7 = vld [vmem:[%s1752_s19 + $0x300] ss:$8 sps:$4 sm:$0xff]   ;;  %v1604_v12 = vld [vmem:[%s1752_s19 + $0x224] ss:$8 sps:$4 sm:$0xff]   ;;  %v1610_v16 = vld [vmem:[%s1752_s19 + $0x234] ss:$8 sps:$4 sm:$0xff]  }
  0x29   : > { %v1607_v13 = vld [vmem:[%s1752_s19 + $0x324] ss:$8 sps:$4 sm:$0xff]   ;;  %v1602_v14 = vld [vmem:[%s1752_s19 + $0x220] ss:$8 sps:$4 sm:$0xff]   ;;  %v1613_v17 = vld [vmem:[%s1752_s19 + $0x334] ss:$8 sps:$4 sm:$0xff]  }
  0x2a   : > { %388 = vmatpush1.bf16.msra.mxu0 %v1531_v28  ;;  %v1605_v15 = vld [vmem:[%s1752_s19 + $0x320] ss:$8 sps:$4 sm:$0xff]   ;;  %v1608_v18 = vld [vmem:[%s1752_s19 + $0x230] ss:$8 sps:$4 sm:$0xff]   ;;  %v1619_v20 = vld [vmem:[%s1752_s19 + $0x344] ss:$8 sps:$4 sm:$0xff]  }
  0x2b   : > { %624 = vmatpush1.bf16.msra.mxu1 %v1532_v29  ;;  %389 = vmatprep.subr.bf16.mxu0 %v1533_v30  ;;  %v1611_v19 = vld [vmem:[%s1752_s19 + $0x330] ss:$8 sps:$4 sm:$0xff]   ;;  %v1614_v21 = vld [vmem:[%s1752_s19 + $0x240] ss:$8 sps:$4 sm:$0xff]   ;;  %v1622_v23 = vld [vmem:[%s1752_s19 + $0x254] ss:$8 sps:$4 sm:$0xff]  }
  0x2c   : > { %625 = vmatprep.subr.bf16.mxu1 %v1535_v31  ;;  %v1617_v22 = vld [vmem:[%s1752_s19 + $0x340] ss:$8 sps:$4 sm:$0xff]   ;;  %v1625_v24 = vld [vmem:[%s1752_s19 + $0x354] ss:$8 sps:$4 sm:$0xff]   ;;  %v1620_v25 = vld [vmem:[%s1752_s19 + $0x250] ss:$8 sps:$4 sm:$0xff]  }
  0x2d   : > { %v1623_v26 = vld [vmem:[%s1752_s19 + $0x350] ss:$8 sps:$4 sm:$0xff]   ;;  %v1628_v27 = vld [vmem:[%s1752_s19 + $0x264] ss:$8 sps:$4 sm:$0xff]   ;;  %v1626_v31 = vld [vmem:[%s1752_s19 + $0x260] ss:$8 sps:$4 sm:$0xff]  }
  0x2e   : > { %390 = vmatpush1.bf16.msra.mxu0 %v1537_v32  ;;  %v1631_v28 = vld [vmem:[%s1752_s19 + $0x364] ss:$8 sps:$4 sm:$0xff]   ;;  %v1629_v32 = vld [vmem:[%s1752_s19 + $0x360] ss:$8 sps:$4 sm:$0xff]  }
  0x2f   : > { %626 = vmatpush1.bf16.msra.mxu1 %v1538_v33  ;;  %391 = vmatprep.subr.bf16.mxu0 %v1539_v34  ;;  %v1138_v29 = vld [vmem:[%s1908_s2] sm:$0xff]  ;;  %v1139_v30 = vld [vmem:[%s1908_s2 + $0x8] sm:$0xff]  ;;  %v1634_v33 = vld [vmem:[%s1752_s19 + $0x274] ss:$8 sps:$4 sm:$0xff]  }
  0x30   : > { %627 = vmatprep.subr.bf16.mxu1 %v1541_v35  ;;  %1142 = vperm.xlu0 %1490, %v1138_v29   ;;  %v1637_v34 = vld [vmem:[%s1752_s19 + $0x374] ss:$8 sps:$4 sm:$0xff]   ;;  %v1632_v35 = vld [vmem:[%s1752_s19 + $0x270] ss:$8 sps:$4 sm:$0xff]  }
  0x32   : > { %392 = vmatpush1.bf16.msra.mxu0 %v1543_v36  ;;  %v1635_v36 = vld [vmem:[%s1752_s19 + $0x370] ss:$8 sps:$4 sm:$0xff]  }
  0x33   : > { %628 = vmatpush1.bf16.msra.mxu1 %v1544_v37  ;;  %393 = vmatprep.subr.bf16.mxu0 %v1545_v38  ;;  %v1640_v37 = vld [vmem:[%s1752_s19 + $0x284] ss:$8 sps:$4 sm:$0xff]  }
  0x34   : > { %629 = vmatprep.subr.bf16.mxu1 %v1547_v39  ;;  %1147 = vperm.xlu0 %1490, %v1139_v30   ;;  %v1643_v38 = vld [vmem:[%s1752_s19 + $0x384] ss:$8 sps:$4 sm:$0xff]   ;;  %v1638_v39 = vld [vmem:[%s1752_s19 + $0x280] ss:$8 sps:$4 sm:$0xff]  }
  0x36   : > { %394 = vmatpush1.bf16.msra.mxu0 %v1549_v40  ;;  %v1641_v40 = vld [vmem:[%s1752_s19 + $0x380] ss:$8 sps:$4 sm:$0xff]  }
  0x37   : > { %630 = vmatpush1.bf16.msra.mxu1 %v1550_v41  ;;  %395 = vmatprep.subr.bf16.mxu0 %v1551_v42  ;;  %v1646_v41 = vld [vmem:[%s1752_s19 + $0x294] ss:$8 sps:$4 sm:$0xff]  }
  0x38   : > { %631 = vmatprep.subr.bf16.mxu1 %v1553_v43  ;;  %v1649_v42 = vld [vmem:[%s1752_s19 + $0x394] ss:$8 sps:$4 sm:$0xff]   ;;  %v1644_v43 = vld [vmem:[%s1752_s19 + $0x290] ss:$8 sps:$4 sm:$0xff]  }
  0x3a   : > { %396 = vmatpush1.bf16.msra.mxu0 %v1555_v44  ;;  %v1647_v44 = vld [vmem:[%s1752_s19 + $0x390] ss:$8 sps:$4 sm:$0xff]  }
  0x3b   : > { %632 = vmatpush1.bf16.msra.mxu1 %v1556_v45  ;;  %397 = vmatprep.subr.bf16.mxu0 %v1557_v46  ;;  %v1652_v45 = vld [vmem:[%s1752_s19 + $0x2a4] ss:$8 sps:$4 sm:$0xff]  }
  0x3c   : > { %633 = vmatprep.subr.bf16.mxu1 %v1559_v47  ;;  %v1655_v46 = vld [vmem:[%s1752_s19 + $0x3a4] ss:$8 sps:$4 sm:$0xff]   ;;  %v1650_v47 = vld [vmem:[%s1752_s19 + $0x2a0] ss:$8 sps:$4 sm:$0xff]  }
  0x3e   : > { %398 = vmatpush1.bf16.msra.mxu0 %v1561_v48  ;;  %v1653_v48 = vld [vmem:[%s1752_s19 + $0x3a0] ss:$8 sps:$4 sm:$0xff]  }
  0x3f   : > { %634 = vmatpush1.bf16.msra.mxu1 %v1562_v49  ;;  %399 = vmatprep.subr.bf16.mxu0 %v1563_v50  ;;  %v1658_v49 = vld [vmem:[%s1752_s19 + $0x2b4] ss:$8 sps:$4 sm:$0xff]  }
  0x40   : > { %635 = vmatprep.subr.bf16.mxu1 %v1565_v51  ;;  %v1661_v50 = vld [vmem:[%s1752_s19 + $0x3b4] ss:$8 sps:$4 sm:$0xff]   ;;  %v1656_v51 = vld [vmem:[%s1752_s19 + $0x2b0] ss:$8 sps:$4 sm:$0xff]  }
  0x42   : > { %400 = vmatpush1.bf16.msra.mxu0 %v1567_v52  ;;  %v1659_v52 = vld [vmem:[%s1752_s19 + $0x3b0] ss:$8 sps:$4 sm:$0xff]  }
  0x43   : > { %636 = vmatpush1.bf16.msra.mxu1 %v1568_v53  ;;  %401 = vmatprep.subr.bf16.mxu0 %v1569_v54  ;;  %v1664_v53 = vld [vmem:[%s1752_s19 + $0x2c4] ss:$8 sps:$4 sm:$0xff]  }
  0x44   : > { %637 = vmatprep.subr.bf16.mxu1 %v1571_v55  ;;  %v1667_v54 = vld [vmem:[%s1752_s19 + $0x3c4] ss:$8 sps:$4 sm:$0xff]   ;;  %v1662_v55 = vld [vmem:[%s1752_s19 + $0x2c0] ss:$8 sps:$4 sm:$0xff]  }
  0x46   : > { %402 = vmatpush1.bf16.msra.mxu0 %v1573_v56  ;;  %v1665_v56 = vld [vmem:[%s1752_s19 + $0x3c0] ss:$8 sps:$4 sm:$0xff]  }
  0x47   : > { %638 = vmatpush1.bf16.msra.mxu1 %v1574_v57  ;;  %403 = vmatprep.subr.bf16.mxu0 %v1575_v58  ;;  %v1670_v57 = vld [vmem:[%s1752_s19 + $0x2d4] ss:$8 sps:$4 sm:$0xff]  }
  0x48   : > { %639 = vmatprep.subr.bf16.mxu1 %v1577_v59  ;;  %v1673_v58 = vld [vmem:[%s1752_s19 + $0x3d4] ss:$8 sps:$4 sm:$0xff]   ;;  %v1668_v59 = vld [vmem:[%s1752_s19 + $0x2d0] ss:$8 sps:$4 sm:$0xff]  }
  0x4a   : > { %404 = vmatpush1.bf16.msra.mxu0 %v1579_v60  ;;  %v1671_v60 = vld [vmem:[%s1752_s19 + $0x3d0] ss:$8 sps:$4 sm:$0xff]  }
  0x4b   : > { %640 = vmatpush1.bf16.msra.mxu1 %v1580_v61  ;;  %405 = vmatprep.subr.bf16.mxu0 %v1581_v62  ;;  %v1676_v61 = vld [vmem:[%s1752_s19 + $0x2e4] ss:$8 sps:$4 sm:$0xff]  }
  0x4c   : > { %641 = vmatprep.subr.bf16.mxu1 %v1583_v63  ;;  %v1679_v62 = vld [vmem:[%s1752_s19 + $0x3e4] ss:$8 sps:$4 sm:$0xff]   ;;  %v1674_v63 = vld [vmem:[%s1752_s19 + $0x2e0] ss:$8 sps:$4 sm:$0xff]  }
  0x4e   : > { %406 = vmatpush1.bf16.msra.mxu0 %v1585_v1  ;;  %v1677_v1 = vld [vmem:[%s1752_s19 + $0x3e0] ss:$8 sps:$4 sm:$0xff]  }
  0x4f   : > { %642 = vmatpush1.bf16.msra.mxu1 %v1586_v2  ;;  %851 = vmatprep.subr.bf16.mxu0 %v1592_v3  ;;  %v1682_v2 = vld [vmem:[%s1752_s19 + $0x2f4] ss:$8 sps:$4 sm:$0xff]  }
  0x50   : > { %1091 = vmatprep.subr.bf16.mxu1 %v1595_v4  ;;  %v1685_v3 = vld [vmem:[%s1752_s19 + $0x3f4] ss:$8 sps:$4 sm:$0xff]   ;;  %v1680_v4 = vld [vmem:[%s1752_s19 + $0x2f0] ss:$8 sps:$4 sm:$0xff]  }
  0x51   : > { %408 = vmatmul.mubr.bf16.vlgmr.msra.gmra.mrb[0].mxu0 %v1823_v5 }
  0x52   : > { %644 = vmatmul.mubr.bf16.vlgmr.msra.gmra.mrb[0].mxu1 %v1823_v5  ;;  %852 = vmatpush1.bf16.msra.mxu0 %v1590_v6  ;;  %v1683_v6 = vld [vmem:[%s1752_s19 + $0x3f0] ss:$8 sps:$4 sm:$0xff]  }
  0x53   : > { %1092 = vmatpush1.bf16.msra.mxu1 %v1593_v7  ;;  %853 = vmatprep.subr.bf16.mxu0 %v1598_v8 }
  0x54   : > { %1093 = vmatprep.subr.bf16.mxu1 %v1601_v9  ;;  %883 = vmatprep.mubr.bf16.mxu0 %v1742_v0 }
  0x55   : > { %1123 = vmatprep.mubr.bf16.mxu1 %v1742_v0  ;;  %v1616_v0 = vld [vmem:[%s1752_s19 + $0x244] ss:$8 sps:$4 sm:$0xff]  }
  0x56   : > { %854 = vmatpush1.bf16.msra.mxu0 %v1596_v10 }
  0x57   : > { %1094 = vmatpush1.bf16.msra.mxu1 %v1599_v11  ;;  %855 = vmatprep.subr.bf16.mxu0 %v1604_v12 }
  0x58   : > { %1095 = vmatprep.subr.bf16.mxu1 %v1607_v13 }
  0x5a   : > { %856 = vmatpush1.bf16.msra.mxu0 %v1602_v14 }
  0x5b   : > { %1096 = vmatpush1.bf16.msra.mxu1 %v1605_v15  ;;  %857 = vmatprep.subr.bf16.mxu0 %v1610_v16 }
  0x5c   : > { %1097 = vmatprep.subr.bf16.mxu1 %v1613_v17 }
  0x5e   : > { %858 = vmatpush1.bf16.msra.mxu0 %v1608_v18 }
  0x5f   : > { %1098 = vmatpush1.bf16.msra.mxu1 %v1611_v19  ;;  %859 = vmatprep.subr.bf16.mxu0 %v1616_v0 }
  0x60   : > { %1099 = vmatprep.subr.bf16.mxu1 %v1619_v20 }
  0x62   : > { %860 = vmatpush1.bf16.msra.mxu0 %v1614_v21 }
  0x63   : > { %1100 = vmatpush1.bf16.msra.mxu1 %v1617_v22  ;;  %861 = vmatprep.subr.bf16.mxu0 %v1622_v23 }
  0x64   : > { %1101 = vmatprep.subr.bf16.mxu1 %v1625_v24 }
  0x66   : > { %862 = vmatpush1.bf16.msra.mxu0 %v1620_v25 }
  0x67   : > { %1102 = vmatpush1.bf16.msra.mxu1 %v1623_v26  ;;  %863 = vmatprep.subr.bf16.mxu0 %v1628_v27 }
  0x68   : > { %1103 = vmatprep.subr.bf16.mxu1 %v1631_v28 }
  0x6a   : > { %864 = vmatpush1.bf16.msra.mxu0 %v1626_v31 }
  0x6b   : > { %1104 = vmatpush1.bf16.msra.mxu1 %v1629_v32  ;;  %865 = vmatprep.subr.bf16.mxu0 %v1634_v33 }
  0x6c   : > { %1105 = vmatprep.subr.bf16.mxu1 %v1637_v34 }
  0x6e   : > { %866 = vmatpush1.bf16.msra.mxu0 %v1632_v35 }
  0x6f   : > { %1106 = vmatpush1.bf16.msra.mxu1 %v1635_v36  ;;  %867 = vmatprep.subr.bf16.mxu0 %v1640_v37 }
  0x70   : > { %1107 = vmatprep.subr.bf16.mxu1 %v1643_v38 }
  0x72   : > { %868 = vmatpush1.bf16.msra.mxu0 %v1638_v39 }
  0x73   : > { %1108 = vmatpush1.bf16.msra.mxu1 %v1641_v40  ;;  %869 = vmatprep.subr.bf16.mxu0 %v1646_v41 }
  0x74   : > { %1109 = vmatprep.subr.bf16.mxu1 %v1649_v42 }
  0x76   : > { %870 = vmatpush1.bf16.msra.mxu0 %v1644_v43 }
  0x77   : > { %1110 = vmatpush1.bf16.msra.mxu1 %v1647_v44  ;;  %871 = vmatprep.subr.bf16.mxu0 %v1652_v45 }
  0x78   : > { %1111 = vmatprep.subr.bf16.mxu1 %v1655_v46 }
  0x7a   : > { %872 = vmatpush1.bf16.msra.mxu0 %v1650_v47 }
  0x7b   : > { %1112 = vmatpush1.bf16.msra.mxu1 %v1653_v48  ;;  %873 = vmatprep.subr.bf16.mxu0 %v1658_v49 }
  0x7c   : > { %1113 = vmatprep.subr.bf16.mxu1 %v1661_v50 }
  0x7e   : > { %874 = vmatpush1.bf16.msra.mxu0 %v1656_v51 }
  0x7f   : > { %1114 = vmatpush1.bf16.msra.mxu1 %v1659_v52  ;;  %875 = vmatprep.subr.bf16.mxu0 %v1664_v53 }
  0x80   : > { %1115 = vmatprep.subr.bf16.mxu1 %v1667_v54 }
  0x82   : > { %876 = vmatpush1.bf16.msra.mxu0 %v1662_v55 }
  0x83   : > { %1116 = vmatpush1.bf16.msra.mxu1 %v1665_v56  ;;  %877 = vmatprep.subr.bf16.mxu0 %v1670_v57 }
  0x84   : > { %1117 = vmatprep.subr.bf16.mxu1 %v1673_v58 }
  0x86   : > { %878 = vmatpush1.bf16.msra.mxu0 %v1668_v59 }
  0x87   : > { %1118 = vmatpush1.bf16.msra.mxu1 %v1671_v60  ;;  %879 = vmatprep.subr.bf16.mxu0 %v1676_v61 }
  0x88   : > { %1119 = vmatprep.subr.bf16.mxu1 %v1679_v62 }
  0x8a   : > { %880 = vmatpush1.bf16.msra.mxu0 %v1674_v63 }
  0x8b   : > { %1120 = vmatpush1.bf16.msra.mxu1 %v1677_v1  ;;  %881 = vmatprep.subr.bf16.mxu0 %v1682_v2 }
  0x8c   : > { %1121 = vmatprep.subr.bf16.mxu1 %v1685_v3 }
  0x8e   : > { %882 = vmatpush1.bf16.msra.mxu0 %v1680_v4 }
  0x8f   : > { %1122 = vmatpush1.bf16.msra.mxu1 %v1683_v6 }
  0x91   : > { %884 = vmatmul.mubr.bf16.vlgmr.msra.gmra.mrb[4].mxu0 %v1823_v5 }
  0x92   : > { %1124 = vmatmul.mubr.bf16.vlgmr.msra.gmra.mrb[4].mxu1 %v1823_v5 }
  0xaf   : > { %v1143_v19 = vpop.permute.xlu0 %1142 }
  0xb3   : > { %v1148_v35 = vpop.permute.xlu0 %1147 }
 0x124   : > { %v409_v7 = vpop.f32.mrb[0].mxu0 }
 0x125   : > { %v645_v8 = vpop.f32.mrb[0].mxu1  ;;  %v411_v10 = vpop.f32.mrb[1].mxu0 }
 0x126   : > { %v654_v9 = vmax.f32 %v409_v7, %v645_v8  ;;  %v647_v11 = vpop.f32.mrb[1].mxu1  ;;  %v413_v13 = vpop.f32.mrb[2].mxu0 }
 0x127   : > { %v655_v12 = vmax.f32 %v411_v10, %v647_v11  ;;  %v649_v14 = vpop.f32.mrb[2].mxu1  ;;  %v415_v16 = vpop.f32.mrb[3].mxu0 }
 0x128   : > { %v656_v15 = vmax.f32 %v413_v13, %v649_v14  ;;  %v651_v17 = vpop.f32.mrb[3].mxu1 }
 0x129   : > { %v657_v18 = vmax.f32 %v415_v16, %v651_v17 }
 0x164   : > { %v885_v0 = vpop.f32.mrb[4].mxu0 }
 0x165   : > { %v1125_v20 = vpop.f32.mrb[4].mxu1  ;;  %v894_v21 = vmax.f32 %v654_v9, %v885_v0  ;;  %v887_v22 = vpop.f32.mrb[5].mxu0 }
 0x166   : > { %v1127_v23 = vpop.f32.mrb[5].mxu1  ;;  %v895_v24 = vmax.f32 %v655_v12, %v887_v22  ;;  %v889_v5 = vpop.f32.mrb[6].mxu0 }
 0x167   : > { %v1129_v25 = vpop.f32.mrb[6].mxu1  ;;  %v1134_v26 = vmax.f32 %v894_v21, %v1125_v20  ;;  %v896_v27 = vmax.f32 %v656_v15, %v889_v5  ;;  %v891_v28 = vpop.f32.mrb[7].mxu0 }
 0x168   : > { %v1131_v29 = vpop.f32.mrb[7].mxu1  ;;  %v1135_v30 = vmax.f32 %v895_v24, %v1127_v23  ;;  %v897_v31 = vmax.f32 %v657_v18, %v891_v28 }
 0x169   : > { %v1150_v32 = vadd.f32 %v1143_v19, %v1134_v26  ;;  %v1136_v33 = vmax.f32 %v896_v27, %v1129_v25 }
 0x16a   : > { %v1151_v34 = vadd.f32 %v1143_v19, %v1135_v30  ;;  %v1137_v36 = vmax.f32 %v897_v31, %v1131_v29 }
 0x16b   : > { %v1473_v37 = vmul.f32 -1.442695, %v1150_v32  ;;  %v1152_v38 = vadd.f32 %v1148_v35, %v1136_v33 }
 0x16c   : > { %v1474_v39 = vmul.f32 -1.442695, %v1151_v34  ;;  %v1153_v40 = vadd.f32 %v1148_v35, %v1137_v36 }
 0x16d   : > { %1686 = vpow2.f32 %v1473_v37  ;;  %v1475_v41 = vmul.f32 -1.442695, %v1152_v38 }
 0x16e   : > { %1688 = vpow2.f32 %v1474_v39  ;;  %v1476_v42 = vmul.f32 -1.442695, %v1153_v40 }
 0x16f   : > { %1690 = vpow2.f32 %v1475_v41 }
 0x170   : > { %1692 = vpow2.f32 %v1476_v42 }
 0x177   : > { %v1687_v43 = vpop.eup %1686 }
 0x178   : > { %v1689_v44 = vpop.eup %1688  ;;  %v1166_v45 = vadd.f32 1.0, %v1687_v43 }
 0x179   : > { %v1691_v46 = vpop.eup %1690  ;;  %v1167_v47 = vadd.f32 1.0, %v1689_v44 }
 0x17a   : > { %v1693_v48 = vpop.eup %1692  ;;  %1694 = vrcp.f32 %v1166_v45  ;;  %v1168_v49 = vadd.f32 1.0, %v1691_v46 }
 0x17b   : > { %1696 = vrcp.f32 %v1167_v47  ;;  %v1169_v50 = vadd.f32 1.0, %v1693_v48 }
 0x17c   : > { %1698 = vrcp.f32 %v1168_v49 }
 0x17d   : > { %1700 = vrcp.f32 %v1169_v50 }
 0x184   : > { %v1695_v51 = vpop.eup %1694 }
 0x185   : > { %v1697_v52 = vpop.eup %1696  ;;  %1178 = vst [vmem:[%s170_s29] sm:$0xff] %v1695_v51 }
 0x186   : > { %v1699_v53 = vpop.eup %1698  ;;  %1180 = vst.msk [vmem:[%s170_s29 + $0x8] sm:$0xff] %vm1179_vm0, %v1697_v52 }
 0x187   : > { %v1701_v54 = vpop.eup %1700  ;;  %1181 = vst [vmem:[%s170_s29 + $0x10] sm:$0xff] %v1699_v53 }
 0x188   : > { %1182 = vst.msk [vmem:[%s170_s29 + $0x18] sm:$0xff] %vm1179_vm0, %v1701_v54 }
 0x189 PF: > { %s13_s12 = sadd.s32 1, %s1708_s12  }
 0x18a   : > { %p10_p4 = scmp.ge.s32.totalorder %s13_s12, 4  }
 0x18c   :  { %12 = sbr.rel (!%p10_p4) target bundleno = 1 (0x1), region = 65 }

// kernel: lenet5_forward.5
= control target key start
LH: loop header
LB: loop body
LE: loop exit
PB: predicated region body
PF: predicated region fallthrough
CT: control target
= control target key end

     0   :  { %v3985_v36 = vmov 1983009808   ;;  %v44_v38 = vlaneseq  ;;  %s5230_s0 = inlined_call_operand.vmem [shape: f32[2,2704], index: 0, kind: input, shape index: {}]   ;;  %s5231_s1 = inlined_call_operand.vmem [shape: bf16[2704,256], index: 1, kind: input, shape index: {}]   ;;  %s5232_s2 = inlined_call_operand.vmem [shape: f32[1,256], index: 2, kind: input, shape index: {}]   ;;  %s5233_s3 = inlined_call_operand.vmem [shape: bf16[256,64], index: 3, kind: input, shape index: {}]   ;;  %s5234_s4 = inlined_call_operand.vmem [shape: f32[1,64], index: 4, kind: input, shape index: {}]   ;;  %s5235_s5 = inlined_call_operand.vmem [shape: bf16[64,128], index: 5, kind: input, shape index: {}]   ;;  %s5236_s6 = inlined_call_operand.vmem [shape: f32[1,128], index: 6, kind: input, shape index: {}]   ;;  %s5237_s7 = inlined_call_operand.hbm [shape: f32[2,128], index: 7, kind: output, shape index: {}]  }
   0x1   :  { %v3415_v0 = vld [vmem:[%s5231_s1 + $0x4] ss:$8 sps:$4 sm:$0xff]   ;;  %v3419_v2 = vld [vmem:[%s5231_s1] ss:$8 sps:$4 sm:$0xff]   ;;  %v3421_v4 = vld [vmem:[%s5231_s1 + $0x14] ss:$8 sps:$4 sm:$0xff]   ;;  %v42_v37 = vunpack.c.l.s4 %v3985_v36 }
   0x2   :  { %v3417_v1 = vld [vmem:[%s5231_s1 + $0x504] ss:$8 sps:$4 sm:$0xff]   ;;  %2221 = vmatprep.subr.bf16.mxu1 %v3415_v0  ;;  %v3420_v3 = vld [vmem:[%s5231_s1 + $0x500] ss:$8 sps:$4 sm:$0xff]   ;;  %v3423_v5 = vld [vmem:[%s5231_s1 + $0x514] ss:$8 sps:$4 sm:$0xff]  }
   0x3   :  { %2426 = vmatprep.subr.bf16.mxu0 %v3417_v1  ;;  %2222 = vmatpush1.bf16.msra.mxu1 %v3419_v2  ;;  %v3425_v6 = vld [vmem:[%s5231_s1 + $0x10] ss:$8 sps:$4 sm:$0xff]   ;;  %v3427_v8 = vld [vmem:[%s5231_s1 + $0x24] ss:$8 sps:$4 sm:$0xff]   ;;  %v3431_v10 = vld [vmem:[%s5231_s1 + $0x20] ss:$8 sps:$4 sm:$0xff]   ;;  %v43_v42 = vunpack.c.0.s8 %v42_v37 }
   0x4   :  { %2427 = vmatpush1.bf16.msra.mxu0 %v3420_v3  ;;  %2223 = vmatprep.subr.bf16.mxu1 %v3421_v4  ;;  %v3426_v7 = vld [vmem:[%s5231_s1 + $0x510] ss:$8 sps:$4 sm:$0xff]   ;;  %v3429_v9 = vld [vmem:[%s5231_s1 + $0x524] ss:$8 sps:$4 sm:$0xff]   ;;  %v3432_v11 = vld [vmem:[%s5231_s1 + $0x520] ss:$8 sps:$4 sm:$0xff]  }
   0x5   :  { %2428 = vmatprep.subr.bf16.mxu0 %v3423_v5  ;;  %v3433_v12 = vld [vmem:[%s5231_s1 + $0x34] ss:$8 sps:$4 sm:$0xff]   ;;  %v3437_v14 = vld [vmem:[%s5231_s1 + $0x30] ss:$8 sps:$4 sm:$0xff]   ;;  %v3439_v16 = vld [vmem:[%s5231_s1 + $0x44] ss:$8 sps:$4 sm:$0xff]  }
   0x6   :  { %v3435_v13 = vld [vmem:[%s5231_s1 + $0x534] ss:$8 sps:$4 sm:$0xff]   ;;  %v3438_v15 = vld [vmem:[%s5231_s1 + $0x530] ss:$8 sps:$4 sm:$0xff]   ;;  %v3441_v17 = vld [vmem:[%s5231_s1 + $0x544] ss:$8 sps:$4 sm:$0xff]  }
   0x7   :  { %2224 = vmatpush1.bf16.msra.mxu1 %v3425_v6  ;;  %v3443_v18 = vld [vmem:[%s5231_s1 + $0x40] ss:$8 sps:$4 sm:$0xff]   ;;  %v3445_v20 = vld [vmem:[%s5231_s1 + $0x54] ss:$8 sps:$4 sm:$0xff]   ;;  %v3449_v22 = vld [vmem:[%s5231_s1 + $0x50] ss:$8 sps:$4 sm:$0xff]  }
   0x8   :  { %2429 = vmatpush1.bf16.msra.mxu0 %v3426_v7  ;;  %2225 = vmatprep.subr.bf16.mxu1 %v3427_v8  ;;  %v3444_v19 = vld [vmem:[%s5231_s1 + $0x540] ss:$8 sps:$4 sm:$0xff]   ;;  %v3447_v21 = vld [vmem:[%s5231_s1 + $0x554] ss:$8 sps:$4 sm:$0xff]   ;;  %v3450_v23 = vld [vmem:[%s5231_s1 + $0x550] ss:$8 sps:$4 sm:$0xff]  }
   0x9   :  { %2430 = vmatprep.subr.bf16.mxu0 %v3429_v9  ;;  %v3451_v24 = vld [vmem:[%s5231_s1 + $0x64] ss:$8 sps:$4 sm:$0xff]   ;;  %v3455_v26 = vld [vmem:[%s5231_s1 + $0x60] ss:$8 sps:$4 sm:$0xff]   ;;  %v3457_v28 = vld [vmem:[%s5231_s1 + $0x74] ss:$8 sps:$4 sm:$0xff]  }
   0xa   :  { %v3453_v25 = vld [vmem:[%s5231_s1 + $0x564] ss:$8 sps:$4 sm:$0xff]   ;;  %v3456_v27 = vld [vmem:[%s5231_s1 + $0x560] ss:$8 sps:$4 sm:$0xff]   ;;  %v3459_v29 = vld [vmem:[%s5231_s1 + $0x574] ss:$8 sps:$4 sm:$0xff]  }
   0xb   :  { %2226 = vmatpush1.bf16.msra.mxu1 %v3431_v10  ;;  %v3461_v30 = vld [vmem:[%s5231_s1 + $0x70] ss:$8 sps:$4 sm:$0xff]   ;;  %v3463_v32 = vld [vmem:[%s5231_s1 + $0x84] ss:$8 sps:$4 sm:$0xff]   ;;  %v3467_v34 = vld [vmem:[%s5231_s1 + $0x80] ss:$8 sps:$4 sm:$0xff]  }
   0xc   :  { %2431 = vmatpush1.bf16.msra.mxu0 %v3432_v11  ;;  %2227 = vmatprep.subr.bf16.mxu1 %v3433_v12  ;;  %v3462_v31 = vld [vmem:[%s5231_s1 + $0x570] ss:$8 sps:$4 sm:$0xff]   ;;  %v3465_v33 = vld [vmem:[%s5231_s1 + $0x584] ss:$8 sps:$4 sm:$0xff]   ;;  %v3468_v35 = vld [vmem:[%s5231_s1 + $0x580] ss:$8 sps:$4 sm:$0xff]  }
   0xd   :  { %2432 = vmatprep.subr.bf16.mxu0 %v3435_v13  ;;  %v3469_v39 = vld [vmem:[%s5231_s1 + $0x94] ss:$8 sps:$4 sm:$0xff]   ;;  %v3473_v41 = vld [vmem:[%s5231_s1 + $0x90] ss:$8 sps:$4 sm:$0xff]   ;;  %v4146_v43 = vshrl.u32 %v44_v38, 7  ;;  %v28_v52 = vld [vmem:[%s5230_s0] sm:$0xff] }
   0xe   :  { %v3471_v40 = vld [vmem:[%s5231_s1 + $0x594] ss:$8 sps:$4 sm:$0xff]   ;;  %v3474_v44 = vld [vmem:[%s5231_s1 + $0x590] ss:$8 sps:$4 sm:$0xff]   ;;  %v3475_v45 = vld [vmem:[%s5231_s1 + $0xa4] ss:$8 sps:$4 sm:$0xff]   ;;  %v40_v9 = vcombine.high %v28_v52, %v28_v52 }
   0xf   :  { %2228 = vmatpush1.bf16.msra.mxu1 %v3437_v14  ;;  %v3477_v46 = vld [vmem:[%s5231_s1 + $0x5a4] ss:$8 sps:$4 sm:$0xff]   ;;  %v3479_v47 = vld [vmem:[%s5231_s1 + $0xa0] ss:$8 sps:$4 sm:$0xff]   ;;  %v4164_v49 = vsub.s32 %v43_v42, %v4146_v43  ;;  %v3481_v50 = vld [vmem:[%s5231_s1 + $0xb4] ss:$8 sps:$4 sm:$0xff]  }
  0x10   :  { %2433 = vmatpush1.bf16.msra.mxu0 %v3438_v15  ;;  %2229 = vmatprep.subr.bf16.mxu1 %v3439_v16  ;;  %v3480_v48 = vld [vmem:[%s5231_s1 + $0x5a0] ss:$8 sps:$4 sm:$0xff]   ;;  %v3483_v51 = vld [vmem:[%s5231_s1 + $0x5b4] ss:$8 sps:$4 sm:$0xff]   ;;  %v3485_v53 = vld [vmem:[%s5231_s1 + $0xb0] ss:$8 sps:$4 sm:$0xff]  }
  0x11   :  { %2434 = vmatprep.subr.bf16.mxu0 %v3441_v17  ;;  %v4179_v54 = vrot.slane %v28_v52, %v4164_v49  ;;  %v3486_v55 = vld [vmem:[%s5231_s1 + $0x5b0] ss:$8 sps:$4 sm:$0xff]   ;;  %v3487_v57 = vld [vmem:[%s5231_s1 + $0xc4] ss:$8 sps:$4 sm:$0xff]   ;;  %v3491_v63 = vld [vmem:[%s5231_s1 + $0xc0] ss:$8 sps:$4 sm:$0xff]   ;;  %v4233_v14 = vrot.slane %v40_v9, %v4164_v49 }
  0x12   :  { %v30_v56 = vld [vmem:[%s5230_s0 + $0x10] sm:$0xff]  ;;  %v3489_v58 = vld [vmem:[%s5231_s1 + $0x5c4] ss:$8 sps:$4 sm:$0xff]   ;;  %v3492_v0 = vld [vmem:[%s5231_s1 + $0x5c0] ss:$8 sps:$4 sm:$0xff]  }
  0x13   :  { %2230 = vmatpush1.bf16.msra.mxu1 %v3443_v18  ;;  %v55_v59 = vcombine.high %v4179_v54, %v4179_v54  ;;  %v74_v60 = vcombine.high %v30_v56, %v30_v56  ;;  %v3493_v1 = vld [vmem:[%s5231_s1 + $0xd4] ss:$8 sps:$4 sm:$0xff]   ;;  %v3497_v5 = vld [vmem:[%s5231_s1 + $0xd0] ss:$8 sps:$4 sm:$0xff]   ;;  %v3499_v7 = vld [vmem:[%s5231_s1 + $0xe4] ss:$8 sps:$4 sm:$0xff]  }
  0x14   :  { %2435 = vmatpush1.bf16.msra.mxu0 %v3444_v19  ;;  %2231 = vmatprep.subr.bf16.mxu1 %v3445_v20  ;;  %v3495_v2 = vld [vmem:[%s5231_s1 + $0x5d4] ss:$8 sps:$4 sm:$0xff]   ;;  %v3498_v6 = vld [vmem:[%s5231_s1 + $0x5d0] ss:$8 sps:$4 sm:$0xff]   ;;  %v3501_v8 = vld [vmem:[%s5231_s1 + $0x5e4] ss:$8 sps:$4 sm:$0xff]   ;;  %v56_v19 = vcombine.high %v4233_v14, %v4233_v14  ;;  %v155_v20 = vpack.c.bf16 %v4179_v54, %v4179_v54 }
  0x15   :  { %2436 = vmatprep.subr.bf16.mxu0 %v3447_v21  ;;  %v156_v61 = vpack.c.bf16 %v55_v59, %v55_v59  ;;  %v88_v62 = vrot.slane %v74_v60, %v4164_v49  ;;  %v3503_v10 = vld [vmem:[%s5231_s1 + $0xe0] ss:$8 sps:$4 sm:$0xff]   ;;  %v3505_v12 = vld [vmem:[%s5231_s1 + $0xf4] ss:$8 sps:$4 sm:$0xff]   ;;  %v3509_v15 = vld [vmem:[%s5231_s1 + $0xf0] ss:$8 sps:$4 sm:$0xff]  }
  0x16   :  { %v3504_v11 = vld [vmem:[%s5231_s1 + $0x5e0] ss:$8 sps:$4 sm:$0xff]   ;;  %v3507_v13 = vld [vmem:[%s5231_s1 + $0x5f4] ss:$8 sps:$4 sm:$0xff]   ;;  %v3510_v16 = vld [vmem:[%s5231_s1 + $0x5f0] ss:$8 sps:$4 sm:$0xff]  }
  0x17   :  { %2232 = vmatpush1.bf16.msra.mxu1 %v3449_v22  ;;  %v90_v3 = vcombine.high %v88_v62, %v88_v62  ;;  %2253 = vmatprep.mubr.bf16.mxu1 %v156_v61  ;;  %v3514_v17 = vld [vmem:[%s5231_s1 + $0x104] ss:$8 sps:$4 sm:$0xff]   ;;  %v165_v21 = vpack.c.bf16 %v88_v62, %v88_v62  ;;  %v3512_v22 = vld [vmem:[%s5231_s1 + $0x100] ss:$8 sps:$4 sm:$0xff]   ;;  %v3534_v36 = vld [vmem:[%s5231_s1 + $0x630] ss:$8 sps:$4 sm:$0xff]  }
  0x18   :  { %2437 = vmatpush1.bf16.msra.mxu0 %v3450_v23  ;;  %2233 = vmatprep.subr.bf16.mxu1 %v3451_v24  ;;  %v3518_v18 = vld [vmem:[%s5231_s1 + $0x604] ss:$8 sps:$4 sm:$0xff]   ;;  %v3516_v23 = vld [vmem:[%s5231_s1 + $0x600] ss:$8 sps:$4 sm:$0xff]   ;;  %v3521_v24 = vld [vmem:[%s5231_s1 + $0x114] ss:$8 sps:$4 sm:$0xff]  }
  0x19   :  { %2438 = vmatprep.subr.bf16.mxu0 %v3453_v25  ;;  %v166_v4 = vpack.c.bf16 %v90_v3, %v90_v3  ;;  %v3524_v25 = vld [vmem:[%s5231_s1 + $0x614] ss:$8 sps:$4 sm:$0xff]   ;;  %v3539_v37 = vld [vmem:[%s5231_s1 + $0x144] ss:$8 sps:$4 sm:$0xff]   ;;  %v3555_v56 = vld [vmem:[%s5231_s1 + $0x170] ss:$8 sps:$4 sm:$0xff]  }
  0x1a   :  { %v3542_v38 = vld [vmem:[%s5231_s1 + $0x644] ss:$8 sps:$4 sm:$0xff]   ;;  %v3548_v42 = vld [vmem:[%s5231_s1 + $0x654] ss:$8 sps:$4 sm:$0xff]   ;;  %v3561_v61 = vld [vmem:[%s5231_s1 + $0x180] ss:$8 sps:$4 sm:$0xff]  }
  0x1b   :  { %2234 = vmatpush1.bf16.msra.mxu1 %v3455_v26  ;;  %2458 = vmatprep.mubr.bf16.mxu0 %v166_v4  ;;  %v158_v26 = vpack.c.bf16 %v56_v19, %v56_v19  ;;  %v3557_v52 = vld [vmem:[%s5231_s1 + $0x174] ss:$8 sps:$4 sm:$0xff]   ;;  %v3566_v60 = vld [vmem:[%s5231_s1 + $0x684] ss:$8 sps:$4 sm:$0xff]   ;;  %v3564_v62 = vld [vmem:[%s5231_s1 + $0x680] ss:$8 sps:$4 sm:$0xff]  }
  0x1c   :  { %2439 = vmatpush1.bf16.msra.mxu0 %v3456_v27  ;;  %2235 = vmatprep.subr.bf16.mxu1 %v3457_v28  ;;  %v3519_v27 = vld [vmem:[%s5231_s1 + $0x110] ss:$8 sps:$4 sm:$0xff]   ;;  %v3560_v54 = vld [vmem:[%s5231_s1 + $0x674] ss:$8 sps:$4 sm:$0xff]   ;;  %v3575_v3 = vld [vmem:[%s5231_s1 + $0x1a4] ss:$8 sps:$4 sm:$0xff]  }
  0x1d   :  { %2440 = vmatprep.subr.bf16.mxu0 %v3459_v29  ;;  %v3522_v28 = vld [vmem:[%s5231_s1 + $0x610] ss:$8 sps:$4 sm:$0xff]   ;;  %v3527_v29 = vld [vmem:[%s5231_s1 + $0x124] ss:$8 sps:$4 sm:$0xff]  }
  0x1e   :  { %v3578_v4 = vld [vmem:[%s5231_s1 + $0x6a4] ss:$8 sps:$4 sm:$0xff]   ;;  %v3579_v9 = vld [vmem:[%s5231_s1 + $0x1b0] ss:$8 sps:$4 sm:$0xff]  }
  0x1f   :  { %2236 = vmatpush1.bf16.msra.mxu1 %v3461_v30  ;;  %v3530_v30 = vld [vmem:[%s5231_s1 + $0x624] ss:$8 sps:$4 sm:$0xff]   ;;  %v3594_v19 = vld [vmem:[%s5231_s1 + $0x6d0] ss:$8 sps:$4 sm:$0xff]  }
  0x20   :  { %2441 = vmatpush1.bf16.msra.mxu0 %v3462_v31  ;;  %2237 = vmatprep.subr.bf16.mxu1 %v3463_v32  ;;  %v3525_v31 = vld [vmem:[%s5231_s1 + $0x120] ss:$8 sps:$4 sm:$0xff]  }
  0x21   :  { %2442 = vmatprep.subr.bf16.mxu0 %v3465_v33  ;;  %v3528_v32 = vld [vmem:[%s5231_s1 + $0x620] ss:$8 sps:$4 sm:$0xff]   ;;  %v3533_v33 = vld [vmem:[%s5231_s1 + $0x134] ss:$8 sps:$4 sm:$0xff]  }
  0x23   :  { %2238 = vmatpush1.bf16.msra.mxu1 %v3467_v34  ;;  %v3536_v34 = vld [vmem:[%s5231_s1 + $0x634] ss:$8 sps:$4 sm:$0xff]  }
  0x24   :  { %2443 = vmatpush1.bf16.msra.mxu0 %v3468_v35  ;;  %2239 = vmatprep.subr.bf16.mxu1 %v3469_v39  ;;  %v3531_v35 = vld [vmem:[%s5231_s1 + $0x130] ss:$8 sps:$4 sm:$0xff]   ;;  %v3537_v39 = vld [vmem:[%s5231_s1 + $0x140] ss:$8 sps:$4 sm:$0xff]  }
  0x25   :  { %2444 = vmatprep.subr.bf16.mxu0 %v3471_v40  ;;  %v3540_v40 = vld [vmem:[%s5231_s1 + $0x640] ss:$8 sps:$4 sm:$0xff]  }
  0x27   :  { %2240 = vmatpush1.bf16.msra.mxu1 %v3473_v41  ;;  %v3545_v41 = vld [vmem:[%s5231_s1 + $0x154] ss:$8 sps:$4 sm:$0xff]  }
  0x28   :  { %2445 = vmatpush1.bf16.msra.mxu0 %v3474_v44  ;;  %2241 = vmatprep.subr.bf16.mxu1 %v3475_v45  ;;  %v3543_v44 = vld [vmem:[%s5231_s1 + $0x150] ss:$8 sps:$4 sm:$0xff]  }
  0x29   :  { %2446 = vmatprep.subr.bf16.mxu0 %v3477_v46  ;;  %v3546_v45 = vld [vmem:[%s5231_s1 + $0x650] ss:$8 sps:$4 sm:$0xff]   ;;  %v3551_v46 = vld [vmem:[%s5231_s1 + $0x164] ss:$8 sps:$4 sm:$0xff]  }
  0x2b   :  { %2242 = vmatpush1.bf16.msra.mxu1 %v3479_v47  ;;  %v3554_v47 = vld [vmem:[%s5231_s1 + $0x664] ss:$8 sps:$4 sm:$0xff]  }
  0x2c   :  { %2447 = vmatpush1.bf16.msra.mxu0 %v3480_v48  ;;  %2243 = vmatprep.subr.bf16.mxu1 %v3481_v50  ;;  %v3549_v48 = vld [vmem:[%s5231_s1 + $0x160] ss:$8 sps:$4 sm:$0xff]   ;;  %v4329_v50 = vld [vmem:[%s5230_s0 + $0x18] sm:$0xff] }
  0x2d   :  { %2448 = vmatprep.subr.bf16.mxu0 %v3483_v51  ;;  %v3552_v51 = vld [vmem:[%s5231_s1 + $0x660] ss:$8 sps:$4 sm:$0xff]  }
  0x2f   :  { %2244 = vmatpush1.bf16.msra.mxu1 %v3485_v53  ;;  %v4339_v53 = vrot.slane %v4329_v50, %v4164_v49 }
  0x30   :  { %2449 = vmatpush1.bf16.msra.mxu0 %v3486_v55  ;;  %2245 = vmatprep.subr.bf16.mxu1 %v3487_v57  ;;  %v3558_v57 = vld [vmem:[%s5231_s1 + $0x670] ss:$8 sps:$4 sm:$0xff]  }
  0x31   :  { %2450 = vmatprep.subr.bf16.mxu0 %v3489_v58  ;;  %v106_v55 = vcombine.high %v4339_v53, %v4339_v53  ;;  %v3563_v58 = vld [vmem:[%s5231_s1 + $0x184] ss:$8 sps:$4 sm:$0xff]  }
  0x33   :  { %2246 = vmatpush1.bf16.msra.mxu1 %v3491_v63  ;;  %v168_v59 = vpack.c.bf16 %v106_v55, %v106_v55  ;;  %v3569_v63 = vld [vmem:[%s5231_s1 + $0x194] ss:$8 sps:$4 sm:$0xff]   ;;  %v3635_v55 = vld [vmem:[%s5231_s1 + $0x244] ss:$8 sps:$4 sm:$0xff]  }
  0x34   :  { %2451 = vmatpush1.bf16.msra.mxu0 %v3492_v0  ;;  %2247 = vmatprep.subr.bf16.mxu1 %v3493_v1  ;;  %v3572_v0 = vld [vmem:[%s5231_s1 + $0x694] ss:$8 sps:$4 sm:$0xff]   ;;  %v3567_v1 = vld [vmem:[%s5231_s1 + $0x190] ss:$8 sps:$4 sm:$0xff]  }
  0x35   :  { %2452 = vmatprep.subr.bf16.mxu0 %v3495_v2  ;;  %v3570_v2 = vld [vmem:[%s5231_s1 + $0x690] ss:$8 sps:$4 sm:$0xff]  }
  0x37   :  { %2248 = vmatpush1.bf16.msra.mxu1 %v3497_v5  ;;  %v3573_v5 = vld [vmem:[%s5231_s1 + $0x1a0] ss:$8 sps:$4 sm:$0xff]  }
  0x38   :  { %2453 = vmatpush1.bf16.msra.mxu0 %v3498_v6  ;;  %2249 = vmatprep.subr.bf16.mxu1 %v3499_v7  ;;  %v3576_v6 = vld [vmem:[%s5231_s1 + $0x6a0] ss:$8 sps:$4 sm:$0xff]   ;;  %v3581_v7 = vld [vmem:[%s5231_s1 + $0x1b4] ss:$8 sps:$4 sm:$0xff]  }
  0x39   :  { %2454 = vmatprep.subr.bf16.mxu0 %v3501_v8  ;;  %v3584_v8 = vld [vmem:[%s5231_s1 + $0x6b4] ss:$8 sps:$4 sm:$0xff]  }
  0x3b   :  { %2250 = vmatpush1.bf16.msra.mxu1 %v3503_v10  ;;  %v3582_v10 = vld [vmem:[%s5231_s1 + $0x6b0] ss:$8 sps:$4 sm:$0xff]  }
  0x3c   :  { %2455 = vmatpush1.bf16.msra.mxu0 %v3504_v11  ;;  %2251 = vmatprep.subr.bf16.mxu1 %v3505_v12  ;;  %v3587_v11 = vld [vmem:[%s5231_s1 + $0x1c4] ss:$8 sps:$4 sm:$0xff]  }
  0x3d   :  { %2456 = vmatprep.subr.bf16.mxu0 %v3507_v13  ;;  %v3590_v12 = vld [vmem:[%s5231_s1 + $0x6c4] ss:$8 sps:$4 sm:$0xff]   ;;  %v3585_v13 = vld [vmem:[%s5231_s1 + $0x1c0] ss:$8 sps:$4 sm:$0xff]  }
  0x3f   :  { %2252 = vmatpush1.bf16.msra.mxu1 %v3509_v15  ;;  %v3588_v15 = vld [vmem:[%s5231_s1 + $0x6c0] ss:$8 sps:$4 sm:$0xff]  }
  0x40   :  { %2457 = vmatpush1.bf16.msra.mxu0 %v3510_v16  ;;  %2262 = vmatprep.subr.bf16.mxu1 %v3514_v17  ;;  %v3593_v16 = vld [vmem:[%s5231_s1 + $0x1d4] ss:$8 sps:$4 sm:$0xff]  }
  0x41   :  { %2467 = vmatprep.subr.bf16.mxu0 %v3518_v18  ;;  %v3596_v17 = vld [vmem:[%s5231_s1 + $0x6d4] ss:$8 sps:$4 sm:$0xff]   ;;  %v3591_v18 = vld [vmem:[%s5231_s1 + $0x1d0] ss:$8 sps:$4 sm:$0xff]  }
  0x42   :  { %2254 = vmatmul.mubr.bf16.vlgmr.msra.gmra.mrb[0].mxu1 %v155_v20  ;;  %v3599_v20 = vld [vmem:[%s5231_s1 + $0x1e4] ss:$8 sps:$4 sm:$0xff]  }
  0x43   :  { %2459 = vmatmul.mubr.bf16.vlgmr.msra.gmra.mrb[0].mxu0 %v165_v21  ;;  %2263 = vmatpush1.bf16.msra.mxu1 %v3512_v22  ;;  %v3602_v21 = vld [vmem:[%s5231_s1 + $0x6e4] ss:$8 sps:$4 sm:$0xff]   ;;  %v91_v22 = vcombine.high %v4329_v50, %v4329_v50  ;;  %v3624_v50 = vld [vmem:[%s5231_s1 + $0x720] ss:$8 sps:$4 sm:$0xff]  }
  0x44   :  { %2468 = vmatpush1.bf16.msra.mxu0 %v3516_v23  ;;  %2264 = vmatprep.subr.bf16.mxu1 %v3521_v24  ;;  %v3597_v23 = vld [vmem:[%s5231_s1 + $0x1e0] ss:$8 sps:$4 sm:$0xff]  }
  0x45   :  { %2469 = vmatprep.subr.bf16.mxu0 %v3524_v25  ;;  %2294 = vmatprep.mubr.bf16.mxu1 %v158_v26  ;;  %v3600_v24 = vld [vmem:[%s5231_s1 + $0x6e0] ss:$8 sps:$4 sm:$0xff]   ;;  %v3605_v25 = vld [vmem:[%s5231_s1 + $0x1f4] ss:$8 sps:$4 sm:$0xff]  }
  0x46   :  { %2499 = vmatprep.mubr.bf16.mxu0 %v168_v59  ;;  %v3608_v26 = vld [vmem:[%s5231_s1 + $0x6f4] ss:$8 sps:$4 sm:$0xff]  }
  0x47   :  { %2265 = vmatpush1.bf16.msra.mxu1 %v3519_v27  ;;  %v4445_v27 = vrot.slane %v91_v22, %v4164_v49  ;;  %v3641_v59 = vld [vmem:[%s5231_s1 + $0x254] ss:$8 sps:$4 sm:$0xff]   ;;  %v3675_v22 = vld [vmem:[%s5231_s1 + $0x2b0] ss:$8 sps:$4 sm:$0xff]  }
  0x48   :  { %2470 = vmatpush1.bf16.msra.mxu0 %v3522_v28  ;;  %2266 = vmatprep.subr.bf16.mxu1 %v3527_v29  ;;  %v3603_v28 = vld [vmem:[%s5231_s1 + $0x1f0] ss:$8 sps:$4 sm:$0xff]  }
  0x49   :  { %2471 = vmatprep.subr.bf16.mxu0 %v3530_v30  ;;  %v3606_v29 = vld [vmem:[%s5231_s1 + $0x6f0] ss:$8 sps:$4 sm:$0xff]   ;;  %v3611_v30 = vld [vmem:[%s5231_s1 + $0x204] ss:$8 sps:$4 sm:$0xff]  }
  0x4b   :  { %2267 = vmatpush1.bf16.msra.mxu1 %v3525_v31  ;;  %v3614_v31 = vld [vmem:[%s5231_s1 + $0x704] ss:$8 sps:$4 sm:$0xff]  }
  0x4c   :  { %2472 = vmatpush1.bf16.msra.mxu0 %v3528_v32  ;;  %2268 = vmatprep.subr.bf16.mxu1 %v3533_v33  ;;  %v107_v32 = vcombine.high %v4445_v27, %v4445_v27  ;;  %v3609_v33 = vld [vmem:[%s5231_s1 + $0x200] ss:$8 sps:$4 sm:$0xff]  }
  0x4d   :  { %2473 = vmatprep.subr.bf16.mxu0 %v3536_v34  ;;  %v3612_v34 = vld [vmem:[%s5231_s1 + $0x700] ss:$8 sps:$4 sm:$0xff]  }
  0x4f   :  { %2269 = vmatpush1.bf16.msra.mxu1 %v3531_v35  ;;  %v157_v35 = vpack.c.bf16 %v4233_v14, %v4233_v14 }
  0x50   :  { %2474 = vmatpush1.bf16.msra.mxu0 %v3534_v36  ;;  %2270 = vmatprep.subr.bf16.mxu1 %v3539_v37  ;;  %v167_v36 = vpack.c.bf16 %v4339_v53, %v4339_v53  ;;  %v3617_v37 = vld [vmem:[%s5231_s1 + $0x214] ss:$8 sps:$4 sm:$0xff]   ;;  %v3627_v53 = vld [vmem:[%s5231_s1 + $0x230] ss:$8 sps:$4 sm:$0xff]  }
  0x51   :  { %2475 = vmatprep.subr.bf16.mxu0 %v3542_v38  ;;  %v3620_v38 = vld [vmem:[%s5231_s1 + $0x714] ss:$8 sps:$4 sm:$0xff]  }
  0x53   :  { %2271 = vmatpush1.bf16.msra.mxu1 %v3537_v39  ;;  %v4480_v39 = vld [vmem:[%s5230_s0 + $0x8] sm:$0xff] }
  0x54   :  { %2476 = vmatpush1.bf16.msra.mxu0 %v3540_v40  ;;  %2272 = vmatprep.subr.bf16.mxu1 %v3545_v41  ;;  %v4484_v14 = vrot.slane %v4480_v39, %v4164_v49  ;;  %v170_v40 = vpack.c.bf16 %v107_v32, %v107_v32  ;;  %v3615_v41 = vld [vmem:[%s5231_s1 + $0x210] ss:$8 sps:$4 sm:$0xff]  }
  0x55   :  { %2477 = vmatprep.subr.bf16.mxu0 %v3548_v42  ;;  %v3618_v42 = vld [vmem:[%s5231_s1 + $0x710] ss:$8 sps:$4 sm:$0xff]  }
  0x56   :  { %v3690_v32 = vld [vmem:[%s5231_s1 + $0x7d0] ss:$8 sps:$4 sm:$0xff]  }
  0x57   :  { %2273 = vmatpush1.bf16.msra.mxu1 %v3543_v44  ;;  %v3623_v44 = vld [vmem:[%s5231_s1 + $0x224] ss:$8 sps:$4 sm:$0xff]  }
  0x58   :  { %2478 = vmatpush1.bf16.msra.mxu0 %v3546_v45  ;;  %2274 = vmatprep.subr.bf16.mxu1 %v3551_v46  ;;  %v72_v45 = vcombine.high %v4484_v14, %v4484_v14  ;;  %v3626_v46 = vld [vmem:[%s5231_s1 + $0x724] ss:$8 sps:$4 sm:$0xff]  }
  0x59   :  { %2479 = vmatprep.subr.bf16.mxu0 %v3554_v47 }
  0x5a   :  { %v160_v47 = vpack.c.bf16 %v72_v45, %v72_v45  ;;  %v3702_v45 = vld [vmem:[%s5231_s1 + $0x7f0] ss:$8 sps:$4 sm:$0xff]  }
  0x5b   :  { %2275 = vmatpush1.bf16.msra.mxu1 %v3549_v48  ;;  %v3621_v48 = vld [vmem:[%s5231_s1 + $0x220] ss:$8 sps:$4 sm:$0xff]  }
  0x5c   :  { %2480 = vmatpush1.bf16.msra.mxu0 %v3552_v51  ;;  %2276 = vmatprep.subr.bf16.mxu1 %v3557_v52  ;;  %v3629_v51 = vld [vmem:[%s5231_s1 + $0x234] ss:$8 sps:$4 sm:$0xff]  }
  0x5d   :  { %2481 = vmatprep.subr.bf16.mxu0 %v3560_v54  ;;  %v3632_v52 = vld [vmem:[%s5231_s1 + $0x734] ss:$8 sps:$4 sm:$0xff]   ;;  %v3630_v54 = vld [vmem:[%s5231_s1 + $0x730] ss:$8 sps:$4 sm:$0xff]  }
  0x5f   :  { %2277 = vmatpush1.bf16.msra.mxu1 %v3555_v56  ;;  %v3638_v56 = vld [vmem:[%s5231_s1 + $0x744] ss:$8 sps:$4 sm:$0xff]  }
  0x60   :  { %2482 = vmatpush1.bf16.msra.mxu0 %v3558_v57  ;;  %2278 = vmatprep.subr.bf16.mxu1 %v3563_v58  ;;  %v3633_v57 = vld [vmem:[%s5231_s1 + $0x240] ss:$8 sps:$4 sm:$0xff]  }
  0x61   :  { %2483 = vmatprep.subr.bf16.mxu0 %v3566_v60  ;;  %v3636_v58 = vld [vmem:[%s5231_s1 + $0x740] ss:$8 sps:$4 sm:$0xff]   ;;  %v3644_v60 = vld [vmem:[%s5231_s1 + $0x754] ss:$8 sps:$4 sm:$0xff]  }
  0x63   :  { %2279 = vmatpush1.bf16.msra.mxu1 %v3561_v61  ;;  %v3639_v61 = vld [vmem:[%s5231_s1 + $0x250] ss:$8 sps:$4 sm:$0xff]  }
  0x64   :  { %2484 = vmatpush1.bf16.msra.mxu0 %v3564_v62  ;;  %2280 = vmatprep.subr.bf16.mxu1 %v3569_v63  ;;  %v3642_v62 = vld [vmem:[%s5231_s1 + $0x750] ss:$8 sps:$4 sm:$0xff]   ;;  %v3647_v63 = vld [vmem:[%s5231_s1 + $0x264] ss:$8 sps:$4 sm:$0xff]  }
  0x65   :  { %2485 = vmatprep.subr.bf16.mxu0 %v3572_v0  ;;  %v3650_v0 = vld [vmem:[%s5231_s1 + $0x764] ss:$8 sps:$4 sm:$0xff]  }
  0x67   :  { %2281 = vmatpush1.bf16.msra.mxu1 %v3567_v1  ;;  %v3645_v1 = vld [vmem:[%s5231_s1 + $0x260] ss:$8 sps:$4 sm:$0xff]  }
  0x68   :  { %2486 = vmatpush1.bf16.msra.mxu0 %v3570_v2  ;;  %2282 = vmatprep.subr.bf16.mxu1 %v3575_v3  ;;  %v3648_v2 = vld [vmem:[%s5231_s1 + $0x760] ss:$8 sps:$4 sm:$0xff]   ;;  %v3653_v3 = vld [vmem:[%s5231_s1 + $0x274] ss:$8 sps:$4 sm:$0xff]  }
  0x69   :  { %2487 = vmatprep.subr.bf16.mxu0 %v3578_v4  ;;  %v3656_v4 = vld [vmem:[%s5231_s1 + $0x774] ss:$8 sps:$4 sm:$0xff]  }
  0x6b   :  { %2283 = vmatpush1.bf16.msra.mxu1 %v3573_v5  ;;  %v3651_v5 = vld [vmem:[%s5231_s1 + $0x270] ss:$8 sps:$4 sm:$0xff]  }
  0x6c   :  { %2488 = vmatpush1.bf16.msra.mxu0 %v3576_v6  ;;  %2284 = vmatprep.subr.bf16.mxu1 %v3581_v7  ;;  %v3654_v6 = vld [vmem:[%s5231_s1 + $0x770] ss:$8 sps:$4 sm:$0xff]   ;;  %v3659_v7 = vld [vmem:[%s5231_s1 + $0x284] ss:$8 sps:$4 sm:$0xff]  }
  0x6d   :  { %2489 = vmatprep.subr.bf16.mxu0 %v3584_v8  ;;  %v3662_v8 = vld [vmem:[%s5231_s1 + $0x784] ss:$8 sps:$4 sm:$0xff]  }
  0x6f   :  { %2285 = vmatpush1.bf16.msra.mxu1 %v3579_v9  ;;  %v3657_v9 = vld [vmem:[%s5231_s1 + $0x280] ss:$8 sps:$4 sm:$0xff]  }
  0x70   :  { %2490 = vmatpush1.bf16.msra.mxu0 %v3582_v10  ;;  %2286 = vmatprep.subr.bf16.mxu1 %v3587_v11  ;;  %v3660_v10 = vld [vmem:[%s5231_s1 + $0x780] ss:$8 sps:$4 sm:$0xff]   ;;  %v3665_v11 = vld [vmem:[%s5231_s1 + $0x294] ss:$8 sps:$4 sm:$0xff]  }
  0x71   :  { %2491 = vmatprep.subr.bf16.mxu0 %v3590_v12  ;;  %v3668_v12 = vld [vmem:[%s5231_s1 + $0x794] ss:$8 sps:$4 sm:$0xff]  }
  0x73   :  { %2287 = vmatpush1.bf16.msra.mxu1 %v3585_v13  ;;  %v3663_v13 = vld [vmem:[%s5231_s1 + $0x290] ss:$8 sps:$4 sm:$0xff]  }
  0x74   :  { %2492 = vmatpush1.bf16.msra.mxu0 %v3588_v15  ;;  %2288 = vmatprep.subr.bf16.mxu1 %v3593_v16  ;;  %v3666_v15 = vld [vmem:[%s5231_s1 + $0x790] ss:$8 sps:$4 sm:$0xff]   ;;  %v3671_v16 = vld [vmem:[%s5231_s1 + $0x2a4] ss:$8 sps:$4 sm:$0xff]  }
  0x75   :  { %2493 = vmatprep.subr.bf16.mxu0 %v3596_v17  ;;  %v3674_v17 = vld [vmem:[%s5231_s1 + $0x7a4] ss:$8 sps:$4 sm:$0xff]  }
  0x77   :  { %2289 = vmatpush1.bf16.msra.mxu1 %v3591_v18  ;;  %v3669_v18 = vld [vmem:[%s5231_s1 + $0x2a0] ss:$8 sps:$4 sm:$0xff]  }
  0x78   :  { %2494 = vmatpush1.bf16.msra.mxu0 %v3594_v19  ;;  %2290 = vmatprep.subr.bf16.mxu1 %v3599_v20  ;;  %v3672_v19 = vld [vmem:[%s5231_s1 + $0x7a0] ss:$8 sps:$4 sm:$0xff]   ;;  %v3677_v20 = vld [vmem:[%s5231_s1 + $0x2b4] ss:$8 sps:$4 sm:$0xff]  }
  0x79   :  { %2495 = vmatprep.subr.bf16.mxu0 %v3602_v21  ;;  %v3680_v21 = vld [vmem:[%s5231_s1 + $0x7b4] ss:$8 sps:$4 sm:$0xff]  }
  0x7b   :  { %2291 = vmatpush1.bf16.msra.mxu1 %v3597_v23  ;;  %v3678_v23 = vld [vmem:[%s5231_s1 + $0x7b0] ss:$8 sps:$4 sm:$0xff]  }
  0x7c   :  { %2496 = vmatpush1.bf16.msra.mxu0 %v3600_v24  ;;  %2292 = vmatprep.subr.bf16.mxu1 %v3605_v25  ;;  %v3683_v24 = vld [vmem:[%s5231_s1 + $0x2c4] ss:$8 sps:$4 sm:$0xff]  }
  0x7d   :  { %2497 = vmatprep.subr.bf16.mxu0 %v3608_v26  ;;  %v3686_v25 = vld [vmem:[%s5231_s1 + $0x7c4] ss:$8 sps:$4 sm:$0xff]   ;;  %v3681_v26 = vld [vmem:[%s5231_s1 + $0x2c0] ss:$8 sps:$4 sm:$0xff]  }
  0x7f   :  { %2293 = vmatpush1.bf16.msra.mxu1 %v3603_v28  ;;  %v3684_v28 = vld [vmem:[%s5231_s1 + $0x7c0] ss:$8 sps:$4 sm:$0xff]  }
  0x80   :  { %2498 = vmatpush1.bf16.msra.mxu0 %v3606_v29  ;;  %2303 = vmatprep.subr.bf16.mxu1 %v3611_v30  ;;  %v3689_v29 = vld [vmem:[%s5231_s1 + $0x2d4] ss:$8 sps:$4 sm:$0xff]  }
  0x81   :  { %2508 = vmatprep.subr.bf16.mxu0 %v3614_v31  ;;  %v3692_v30 = vld [vmem:[%s5231_s1 + $0x7d4] ss:$8 sps:$4 sm:$0xff]   ;;  %v3687_v31 = vld [vmem:[%s5231_s1 + $0x2d0] ss:$8 sps:$4 sm:$0xff]  }
  0x82   :  { %2295 = vmatmul.mubr.bf16.vlgmr.msra.gmra.mrb[0].mxu1 %v157_v35  ;;  %v3693_v35 = vld [vmem:[%s5231_s1 + $0x2e0] ss:$8 sps:$4 sm:$0xff]  }
  0x83   :  { %2500 = vmatmul.mubr.bf16.vlgmr.msra.gmra.mrb[0].mxu0 %v167_v36  ;;  %2304 = vmatpush1.bf16.msra.mxu1 %v3609_v33  ;;  %v3695_v33 = vld [vmem:[%s5231_s1 + $0x2e4] ss:$8 sps:$4 sm:$0xff]   ;;  %v57_v36 = vcombine.high %v4480_v39, %v4480_v39  ;;  %v3704_v39 = vld [vmem:[%s5231_s1 + $0x7f4] ss:$8 sps:$4 sm:$0xff]  }
  0x84   :  { %2509 = vmatpush1.bf16.msra.mxu0 %v3612_v34  ;;  %2305 = vmatprep.subr.bf16.mxu1 %v3617_v37  ;;  %v3698_v34 = vld [vmem:[%s5231_s1 + $0x7e4] ss:$8 sps:$4 sm:$0xff]  }
  0x85   :  { %2510 = vmatprep.subr.bf16.mxu0 %v3620_v38  ;;  %2540 = vmatprep.mubr.bf16.mxu0 %v170_v40  ;;  %v4652_v37 = vld [vmem:[%s5230_s0 + $0x20] sm:$0xff]  ;;  %v3701_v40 = vld [vmem:[%s5231_s1 + $0x2f4] ss:$8 sps:$4 sm:$0xff]  }
  0x86   :  { %2335 = vmatprep.mubr.bf16.mxu1 %v160_v47  ;;  %v3696_v38 = vld [vmem:[%s5231_s1 + $0x7e0] ss:$8 sps:$4 sm:$0xff]   ;;  %v3711_v47 = vld [vmem:[%s5231_s1 + $0x804] ss:$8 sps:$4 sm:$0xff]  }
  0x87   :  { %2306 = vmatpush1.bf16.msra.mxu1 %v3615_v41  ;;  %v4664_v41 = vrot.slane %v57_v36, %v4164_v49  ;;  %v3775_v36 = vld [vmem:[%s5231_s1 + $0x8b0] ss:$8 sps:$4 sm:$0xff]  }
  0x88   :  { %2511 = vmatpush1.bf16.msra.mxu0 %v3618_v42  ;;  %2307 = vmatprep.subr.bf16.mxu1 %v3623_v44  ;;  %v4668_v42 = vrot.slane %v4652_v37, %v4164_v49  ;;  %v3699_v44 = vld [vmem:[%s5231_s1 + $0x2f0] ss:$8 sps:$4 sm:$0xff]  }
  0x89   :  { %2512 = vmatprep.subr.bf16.mxu0 %v3626_v46  ;;  %v3707_v46 = vld [vmem:[%s5231_s1 + $0x304] ss:$8 sps:$4 sm:$0xff]  }
  0x8b   :  { %2308 = vmatpush1.bf16.msra.mxu1 %v3621_v48  ;;  %v73_v48 = vcombine.high %v4664_v41, %v4664_v41 }
  0x8c   :  { %2513 = vmatpush1.bf16.msra.mxu0 %v3624_v50  ;;  %2309 = vmatprep.subr.bf16.mxu1 %v3629_v51  ;;  %v123_v50 = vcombine.high %v4668_v42, %v4668_v42  ;;  %v3705_v51 = vld [vmem:[%s5231_s1 + $0x300] ss:$8 sps:$4 sm:$0xff]  }
  0x8d   :  { %2514 = vmatprep.subr.bf16.mxu0 %v3632_v52  ;;  %v159_v52 = vpack.c.bf16 %v4484_v14, %v4484_v14  ;;  %v162_v14 = vpack.c.bf16 %v73_v48, %v73_v48 }
  0x8f   :  { %2310 = vmatpush1.bf16.msra.mxu1 %v3627_v53  ;;  %v169_v53 = vpack.c.bf16 %v4445_v27, %v4445_v27  ;;  %v3712_v27 = vld [vmem:[%s5231_s1 + $0x310] ss:$8 sps:$4 sm:$0xff]  }
  0x90   :  { %2515 = vmatpush1.bf16.msra.mxu0 %v3630_v54  ;;  %2311 = vmatprep.subr.bf16.mxu1 %v3635_v55  ;;  %v3709_v54 = vld [vmem:[%s5231_s1 + $0x800] ss:$8 sps:$4 sm:$0xff]   ;;  %v3714_v55 = vld [vmem:[%s5231_s1 + $0x314] ss:$8 sps:$4 sm:$0xff]  }
  0x91   :  { %2516 = vmatprep.subr.bf16.mxu0 %v3638_v56  ;;  %v3717_v56 = vld [vmem:[%s5231_s1 + $0x814] ss:$8 sps:$4 sm:$0xff]  }
  0x93   :  { %2312 = vmatpush1.bf16.msra.mxu1 %v3633_v57  ;;  %v172_v57 = vpack.c.bf16 %v123_v50, %v123_v50 }
  0x94   :  { %2517 = vmatpush1.bf16.msra.mxu0 %v3636_v58  ;;  %2313 = vmatprep.subr.bf16.mxu1 %v3641_v59  ;;  %v3715_v58 = vld [vmem:[%s5231_s1 + $0x810] ss:$8 sps:$4 sm:$0xff]   ;;  %v3720_v59 = vld [vmem:[%s5231_s1 + $0x324] ss:$8 sps:$4 sm:$0xff]  }
  0x95   :  { %2518 = vmatprep.subr.bf16.mxu0 %v3644_v60  ;;  %v3723_v60 = vld [vmem:[%s5231_s1 + $0x824] ss:$8 sps:$4 sm:$0xff]  }
  0x97   :  { %2314 = vmatpush1.bf16.msra.mxu1 %v3639_v61  ;;  %v3718_v61 = vld [vmem:[%s5231_s1 + $0x320] ss:$8 sps:$4 sm:$0xff]  }
  0x98   :  { %2519 = vmatpush1.bf16.msra.mxu0 %v3642_v62  ;;  %2315 = vmatprep.subr.bf16.mxu1 %v3647_v63  ;;  %v3721_v62 = vld [vmem:[%s5231_s1 + $0x820] ss:$8 sps:$4 sm:$0xff]   ;;  %v3726_v63 = vld [vmem:[%s5231_s1 + $0x334] ss:$8 sps:$4 sm:$0xff]  }
  0x99   :  { %2520 = vmatprep.subr.bf16.mxu0 %v3650_v0  ;;  %v3729_v0 = vld [vmem:[%s5231_s1 + $0x834] ss:$8 sps:$4 sm:$0xff]  }
  0x9b   :  { %2316 = vmatpush1.bf16.msra.mxu1 %v3645_v1  ;;  %v3724_v1 = vld [vmem:[%s5231_s1 + $0x330] ss:$8 sps:$4 sm:$0xff]  }
  0x9c   :  { %2521 = vmatpush1.bf16.msra.mxu0 %v3648_v2  ;;  %2317 = vmatprep.subr.bf16.mxu1 %v3653_v3  ;;  %v3727_v2 = vld [vmem:[%s5231_s1 + $0x830] ss:$8 sps:$4 sm:$0xff]   ;;  %v3732_v3 = vld [vmem:[%s5231_s1 + $0x344] ss:$8 sps:$4 sm:$0xff]  }
  0x9d   :  { %2522 = vmatprep.subr.bf16.mxu0 %v3656_v4  ;;  %v3735_v4 = vld [vmem:[%s5231_s1 + $0x844] ss:$8 sps:$4 sm:$0xff]  }
  0x9f   :  { %2318 = vmatpush1.bf16.msra.mxu1 %v3651_v5  ;;  %v3730_v5 = vld [vmem:[%s5231_s1 + $0x340] ss:$8 sps:$4 sm:$0xff]  }
  0xa0   :  { %2523 = vmatpush1.bf16.msra.mxu0 %v3654_v6  ;;  %2319 = vmatprep.subr.bf16.mxu1 %v3659_v7  ;;  %v3733_v6 = vld [vmem:[%s5231_s1 + $0x840] ss:$8 sps:$4 sm:$0xff]   ;;  %v3738_v7 = vld [vmem:[%s5231_s1 + $0x354] ss:$8 sps:$4 sm:$0xff]  }
  0xa1   :  { %2524 = vmatprep.subr.bf16.mxu0 %v3662_v8  ;;  %v3741_v8 = vld [vmem:[%s5231_s1 + $0x854] ss:$8 sps:$4 sm:$0xff]  }
  0xa3   :  { %2320 = vmatpush1.bf16.msra.mxu1 %v3657_v9  ;;  %v3736_v9 = vld [vmem:[%s5231_s1 + $0x350] ss:$8 sps:$4 sm:$0xff]  }
  0xa4   :  { %2525 = vmatpush1.bf16.msra.mxu0 %v3660_v10  ;;  %2321 = vmatprep.subr.bf16.mxu1 %v3665_v11  ;;  %v3739_v10 = vld [vmem:[%s5231_s1 + $0x850] ss:$8 sps:$4 sm:$0xff]   ;;  %v3744_v11 = vld [vmem:[%s5231_s1 + $0x364] ss:$8 sps:$4 sm:$0xff]  }
  0xa5   :  { %2526 = vmatprep.subr.bf16.mxu0 %v3668_v12  ;;  %v3747_v12 = vld [vmem:[%s5231_s1 + $0x864] ss:$8 sps:$4 sm:$0xff]  }
  0xa7   :  { %2322 = vmatpush1.bf16.msra.mxu1 %v3663_v13  ;;  %v3742_v13 = vld [vmem:[%s5231_s1 + $0x360] ss:$8 sps:$4 sm:$0xff]  }
  0xa8   :  { %2527 = vmatpush1.bf16.msra.mxu0 %v3666_v15  ;;  %2323 = vmatprep.subr.bf16.mxu1 %v3671_v16  ;;  %v3745_v15 = vld [vmem:[%s5231_s1 + $0x860] ss:$8 sps:$4 sm:$0xff]   ;;  %v3750_v16 = vld [vmem:[%s5231_s1 + $0x374] ss:$8 sps:$4 sm:$0xff]  }
  0xa9   :  { %2528 = vmatprep.subr.bf16.mxu0 %v3674_v17  ;;  %v3753_v17 = vld [vmem:[%s5231_s1 + $0x874] ss:$8 sps:$4 sm:$0xff]  }
  0xab   :  { %2324 = vmatpush1.bf16.msra.mxu1 %v3669_v18  ;;  %v3748_v18 = vld [vmem:[%s5231_s1 + $0x370] ss:$8 sps:$4 sm:$0xff]  }
  0xac   :  { %2529 = vmatpush1.bf16.msra.mxu0 %v3672_v19  ;;  %2325 = vmatprep.subr.bf16.mxu1 %v3677_v20  ;;  %v3751_v19 = vld [vmem:[%s5231_s1 + $0x870] ss:$8 sps:$4 sm:$0xff]   ;;  %v3756_v20 = vld [vmem:[%s5231_s1 + $0x384] ss:$8 sps:$4 sm:$0xff]  }
  0xad   :  { %2530 = vmatprep.subr.bf16.mxu0 %v3680_v21  ;;  %v3759_v21 = vld [vmem:[%s5231_s1 + $0x884] ss:$8 sps:$4 sm:$0xff]  }
  0xaf   :  { %2326 = vmatpush1.bf16.msra.mxu1 %v3675_v22  ;;  %v3754_v22 = vld [vmem:[%s5231_s1 + $0x380] ss:$8 sps:$4 sm:$0xff]  }
  0xb0   :  { %2531 = vmatpush1.bf16.msra.mxu0 %v3678_v23  ;;  %2327 = vmatprep.subr.bf16.mxu1 %v3683_v24  ;;  %v3757_v23 = vld [vmem:[%s5231_s1 + $0x880] ss:$8 sps:$4 sm:$0xff]   ;;  %v3762_v24 = vld [vmem:[%s5231_s1 + $0x394] ss:$8 sps:$4 sm:$0xff]  }
  0xb1   :  { %2532 = vmatprep.subr.bf16.mxu0 %v3686_v25  ;;  %v3765_v25 = vld [vmem:[%s5231_s1 + $0x894] ss:$8 sps:$4 sm:$0xff]  }
  0xb3   :  { %2328 = vmatpush1.bf16.msra.mxu1 %v3681_v26  ;;  %v3760_v26 = vld [vmem:[%s5231_s1 + $0x390] ss:$8 sps:$4 sm:$0xff]  }
  0xb4   :  { %2533 = vmatpush1.bf16.msra.mxu0 %v3684_v28  ;;  %2329 = vmatprep.subr.bf16.mxu1 %v3689_v29  ;;  %v3763_v28 = vld [vmem:[%s5231_s1 + $0x890] ss:$8 sps:$4 sm:$0xff]   ;;  %v3768_v29 = vld [vmem:[%s5231_s1 + $0x3a4] ss:$8 sps:$4 sm:$0xff]  }
  0xb5   :  { %2534 = vmatprep.subr.bf16.mxu0 %v3692_v30  ;;  %v3771_v30 = vld [vmem:[%s5231_s1 + $0x8a4] ss:$8 sps:$4 sm:$0xff]  }
  0xb7   :  { %2330 = vmatpush1.bf16.msra.mxu1 %v3687_v31  ;;  %v3766_v31 = vld [vmem:[%s5231_s1 + $0x3a0] ss:$8 sps:$4 sm:$0xff]  }
  0xb8   :  { %2535 = vmatpush1.bf16.msra.mxu0 %v3690_v32  ;;  %2331 = vmatprep.subr.bf16.mxu1 %v3695_v33  ;;  %v3769_v32 = vld [vmem:[%s5231_s1 + $0x8a0] ss:$8 sps:$4 sm:$0xff]   ;;  %v3774_v33 = vld [vmem:[%s5231_s1 + $0x3b4] ss:$8 sps:$4 sm:$0xff]  }
  0xb9   :  { %2536 = vmatprep.subr.bf16.mxu0 %v3698_v34  ;;  %v3777_v34 = vld [vmem:[%s5231_s1 + $0x8b4] ss:$8 sps:$4 sm:$0xff]  }
  0xbb   :  { %2332 = vmatpush1.bf16.msra.mxu1 %v3693_v35  ;;  %v3772_v35 = vld [vmem:[%s5231_s1 + $0x3b0] ss:$8 sps:$4 sm:$0xff]  }
  0xbc   :  { %2537 = vmatpush1.bf16.msra.mxu0 %v3696_v38  ;;  %2333 = vmatprep.subr.bf16.mxu1 %v3701_v40  ;;  %v3780_v38 = vld [vmem:[%s5231_s1 + $0x3c4] ss:$8 sps:$4 sm:$0xff]  }
  0xbd   :  { %2538 = vmatprep.subr.bf16.mxu0 %v3704_v39  ;;  %v3783_v40 = vld [vmem:[%s5231_s1 + $0x8c4] ss:$8 sps:$4 sm:$0xff]   ;;  %v3778_v39 = vld [vmem:[%s5231_s1 + $0x3c0] ss:$8 sps:$4 sm:$0xff]  }
  0xbf   :  { %2334 = vmatpush1.bf16.msra.mxu1 %v3699_v44  ;;  %v3781_v44 = vld [vmem:[%s5231_s1 + $0x8c0] ss:$8 sps:$4 sm:$0xff]  }
  0xc0   :  { %2539 = vmatpush1.bf16.msra.mxu0 %v3702_v45  ;;  %2344 = vmatprep.subr.bf16.mxu1 %v3707_v46  ;;  %v3786_v45 = vld [vmem:[%s5231_s1 + $0x3d4] ss:$8 sps:$4 sm:$0xff]  }
  0xc1   :  { %2549 = vmatprep.subr.bf16.mxu0 %v3711_v47  ;;  %v3789_v46 = vld [vmem:[%s5231_s1 + $0x8d4] ss:$8 sps:$4 sm:$0xff]  }
  0xc2   :  { %2336 = vmatmul.mubr.bf16.vlgmr.msra.gmra.mrb[0].mxu1 %v159_v52 }
  0xc3   :  { %2541 = vmatmul.mubr.bf16.vlgmr.msra.gmra.mrb[0].mxu0 %v169_v53  ;;  %2345 = vmatpush1.bf16.msra.mxu1 %v3705_v51 }
  0xc4   :  { %2550 = vmatpush1.bf16.msra.mxu0 %v3709_v54  ;;  %2346 = vmatprep.subr.bf16.mxu1 %v3714_v55 }
  0xc5   :  { %2551 = vmatprep.subr.bf16.mxu0 %v3717_v56  ;;  %2376 = vmatprep.mubr.bf16.mxu1 %v162_v14 }
  0xc6   :  { %2581 = vmatprep.mubr.bf16.mxu0 %v172_v57 }
  0xc7   :  { %2347 = vmatpush1.bf16.msra.mxu1 %v3712_v27 }
  0xc8   :  { %2552 = vmatpush1.bf16.msra.mxu0 %v3715_v58  ;;  %2348 = vmatprep.subr.bf16.mxu1 %v3720_v59 }
  0xc9   :  { %2553 = vmatprep.subr.bf16.mxu0 %v3723_v60 }
  0xcb   :  { %2349 = vmatpush1.bf16.msra.mxu1 %v3718_v61 }
  0xcc   :  { %2554 = vmatpush1.bf16.msra.mxu0 %v3721_v62  ;;  %2350 = vmatprep.subr.bf16.mxu1 %v3726_v63 }
  0xcd   :  { %2555 = vmatprep.subr.bf16.mxu0 %v3729_v0 }
  0xcf   :  { %2351 = vmatpush1.bf16.msra.mxu1 %v3724_v1 }
  0xd0   :  { %2556 = vmatpush1.bf16.msra.mxu0 %v3727_v2  ;;  %2352 = vmatprep.subr.bf16.mxu1 %v3732_v3 }
  0xd1   :  { %2557 = vmatprep.subr.bf16.mxu0 %v3735_v4 }
  0xd3   :  { %2353 = vmatpush1.bf16.msra.mxu1 %v3730_v5 }
  0xd4   :  { %2558 = vmatpush1.bf16.msra.mxu0 %v3733_v6  ;;  %2354 = vmatprep.subr.bf16.mxu1 %v3738_v7 }
  0xd5   :  { %2559 = vmatprep.subr.bf16.mxu0 %v3741_v8 }
  0xd7   :  { %2355 = vmatpush1.bf16.msra.mxu1 %v3736_v9 }
  0xd8   :  { %2560 = vmatpush1.bf16.msra.mxu0 %v3739_v10  ;;  %2356 = vmatprep.subr.bf16.mxu1 %v3744_v11 }
  0xd9   :  { %2561 = vmatprep.subr.bf16.mxu0 %v3747_v12 }
  0xdb   :  { %2357 = vmatpush1.bf16.msra.mxu1 %v3742_v13 }
  0xdc   :  { %2562 = vmatpush1.bf16.msra.mxu0 %v3745_v15  ;;  %2358 = vmatprep.subr.bf16.mxu1 %v3750_v16 }
  0xdd   :  { %2563 = vmatprep.subr.bf16.mxu0 %v3753_v17 }
  0xdf   :  { %2359 = vmatpush1.bf16.msra.mxu1 %v3748_v18 }
  0xe0   :  { %2564 = vmatpush1.bf16.msra.mxu0 %v3751_v19  ;;  %2360 = vmatprep.subr.bf16.mxu1 %v3756_v20 }
  0xe1   :  { %2565 = vmatprep.subr.bf16.mxu0 %v3759_v21 }
  0xe3   :  { %2361 = vmatpush1.bf16.msra.mxu1 %v3754_v22 }
  0xe4   :  { %2566 = vmatpush1.bf16.msra.mxu0 %v3757_v23  ;;  %2362 = vmatprep.subr.bf16.mxu1 %v3762_v24 }
  0xe5   :  { %2567 = vmatprep.subr.bf16.mxu0 %v3765_v25 }
  0xe7   :  { %2363 = vmatpush1.bf16.msra.mxu1 %v3760_v26 }
  0xe8   :  { %2568 = vmatpush1.bf16.msra.mxu0 %v3763_v28  ;;  %2364 = vmatprep.subr.bf16.mxu1 %v3768_v29 }
  0xe9   :  { %2569 = vmatprep.subr.bf16.mxu0 %v3771_v30 }
  0xeb   :  { %2365 = vmatpush1.bf16.msra.mxu1 %v3766_v31 }
  0xec   :  { %2570 = vmatpush1.bf16.msra.mxu0 %v3769_v32  ;;  %2366 = vmatprep.subr.bf16.mxu1 %v3774_v33 }
  0xed   :  { %2571 = vmatprep.subr.bf16.mxu0 %v3777_v34 }
  0xef   :  { %2367 = vmatpush1.bf16.msra.mxu1 %v3772_v35 }
  0xf0   :  { %2572 = vmatpush1.bf16.msra.mxu0 %v3775_v36  ;;  %2368 = vmatprep.subr.bf16.mxu1 %v3780_v38 }
  0xf1   :  { %2573 = vmatprep.subr.bf16.mxu0 %v3783_v40 }
  0xf2   :  { %12 = vsyncpa [#allocation3], 0  ;;  %v3784_v47 = vld [vmem:[%s5231_s1 + $0x3d0] ss:$8 sps:$4 sm:$0xff]   ;;  %v3792_v50 = vld [vmem:[%s5231_s1 + $0x3e4] ss:$8 sps:$4 sm:$0xff]   ;;  %v108_v52 = vcombine.high %v4652_v37, %v4652_v37  ;;  %v161_v61 = vpack.c.bf16 %v4664_v41, %v4664_v41  ;;  %v171_v62 = vpack.c.bf16 %v4668_v42, %v4668_v42 }
  0xf3   :  { %2369 = vmatpush1.bf16.msra.mxu1 %v3778_v39  ;;  %v3787_v48 = vld [vmem:[%s5231_s1 + $0x8d0] ss:$8 sps:$4 sm:$0xff]   ;;  %v3795_v51 = vld [vmem:[%s5231_s1 + $0x8e4] ss:$8 sps:$4 sm:$0xff]   ;;  %v3790_v53 = vld [vmem:[%s5231_s1 + $0x3e0] ss:$8 sps:$4 sm:$0xff]  }
  0xf4   :  { %2574 = vmatpush1.bf16.msra.mxu0 %v3781_v44  ;;  %2370 = vmatprep.subr.bf16.mxu1 %v3786_v45  ;;  %v3793_v54 = vld [vmem:[%s5231_s1 + $0x8e0] ss:$8 sps:$4 sm:$0xff]   ;;  %v3798_v55 = vld [vmem:[%s5231_s1 + $0x3f4] ss:$8 sps:$4 sm:$0xff]   ;;  %v4878_v14 = vrot.slane %v108_v52, %v4164_v49  ;;  %v3796_v57 = vld [vmem:[%s5231_s1 + $0x3f0] ss:$8 sps:$4 sm:$0xff]  }
  0xf5   :  { %2575 = vmatprep.subr.bf16.mxu0 %v3789_v46  ;;  %v3801_v37 = vld [vmem:[%s5231_s1 + $0x8f4] ss:$8 sps:$4 sm:$0xff]   ;;  %v3799_v27 = vld [vmem:[%s5231_s1 + $0x8f0] ss:$8 sps:$4 sm:$0xff]   ;;  %v3805_v58 = vld [vmem:[%s5231_s1 + $0x404] ss:$8 sps:$4 sm:$0xff]  }
  0xf6   :  { %v4875_v56 = vld.sshfl [vmem:[%s5230_s0 + $0x10] sm:$0xff pattern:$0x76325410]  ;;  %v3808_v49 = vld [vmem:[%s5231_s1 + $0x904] ss:$8 sps:$4 sm:$0xff]   ;;  %v124_v60 = vcombine.high %v4878_v14, %v4878_v14  ;;  %vm2217_vm0 = vcmask 130048  }
  0xf7   :  { %2371 = vmatpush1.bf16.msra.mxu1 %v3784_v47  ;;  %v89_v59 = vcombine.high %v4875_v56, %v4875_v56  ;;  %v3803_v63 = vld [vmem:[%s5231_s1 + $0x400] ss:$8 sps:$4 sm:$0xff]   ;;  %v3811_v1 = vld [vmem:[%s5231_s1 + $0x414] ss:$8 sps:$4 sm:$0xff]   ;;  %v3809_v3 = vld [vmem:[%s5231_s1 + $0x410] ss:$8 sps:$4 sm:$0xff]  }
  0xf8   :  { %2576 = vmatpush1.bf16.msra.mxu0 %v3787_v48  ;;  %2372 = vmatprep.subr.bf16.mxu1 %v3792_v50  ;;  %v3806_v0 = vld [vmem:[%s5231_s1 + $0x900] ss:$8 sps:$4 sm:$0xff]   ;;  %v3814_v41 = vld [vmem:[%s5231_s1 + $0x914] ss:$8 sps:$4 sm:$0xff]   ;;  %v174_v2 = vpack.c.bf16 %v124_v60, %v124_v60  ;;  %v3812_v4 = vld [vmem:[%s5231_s1 + $0x910] ss:$8 sps:$4 sm:$0xff]  }
  0xf9   :  { %2577 = vmatprep.subr.bf16.mxu0 %v3795_v51  ;;  %v164_v42 = vpack.c.bf16 %v89_v59, %v89_v59  ;;  %v3817_v5 = vld [vmem:[%s5231_s1 + $0x424] ss:$8 sps:$4 sm:$0xff]   ;;  %v3815_v7 = vld [vmem:[%s5231_s1 + $0x420] ss:$8 sps:$4 sm:$0xff]   ;;  %v3823_v9 = vld [vmem:[%s5231_s1 + $0x434] ss:$8 sps:$4 sm:$0xff]  }
  0xfa   :  { %v3820_v6 = vld [vmem:[%s5231_s1 + $0x924] ss:$8 sps:$4 sm:$0xff]   ;;  %v3818_v8 = vld [vmem:[%s5231_s1 + $0x920] ss:$8 sps:$4 sm:$0xff]   ;;  %v3826_v10 = vld [vmem:[%s5231_s1 + $0x934] ss:$8 sps:$4 sm:$0xff]  }
  0xfb   :  { %2373 = vmatpush1.bf16.msra.mxu1 %v3790_v53  ;;  %v3821_v11 = vld [vmem:[%s5231_s1 + $0x430] ss:$8 sps:$4 sm:$0xff]   ;;  %v3829_v13 = vld [vmem:[%s5231_s1 + $0x444] ss:$8 sps:$4 sm:$0xff]   ;;  %v3827_v16 = vld [vmem:[%s5231_s1 + $0x440] ss:$8 sps:$4 sm:$0xff]  }
  0xfc   :  { %2578 = vmatpush1.bf16.msra.mxu0 %v3793_v54  ;;  %2374 = vmatprep.subr.bf16.mxu1 %v3798_v55  ;;  %v3824_v12 = vld [vmem:[%s5231_s1 + $0x930] ss:$8 sps:$4 sm:$0xff]   ;;  %v3832_v15 = vld [vmem:[%s5231_s1 + $0x944] ss:$8 sps:$4 sm:$0xff]   ;;  %v3830_v17 = vld [vmem:[%s5231_s1 + $0x940] ss:$8 sps:$4 sm:$0xff]  }
  0xfd   :  { %2579 = vmatprep.subr.bf16.mxu0 %v3801_v37  ;;  %v3835_v18 = vld [vmem:[%s5231_s1 + $0x454] ss:$8 sps:$4 sm:$0xff]   ;;  %v3833_v20 = vld [vmem:[%s5231_s1 + $0x450] ss:$8 sps:$4 sm:$0xff]   ;;  %v3841_v22 = vld [vmem:[%s5231_s1 + $0x464] ss:$8 sps:$4 sm:$0xff]  }
  0xfe   :  { %v3838_v19 = vld [vmem:[%s5231_s1 + $0x954] ss:$8 sps:$4 sm:$0xff]   ;;  %v3836_v21 = vld [vmem:[%s5231_s1 + $0x950] ss:$8 sps:$4 sm:$0xff]   ;;  %v3844_v23 = vld [vmem:[%s5231_s1 + $0x964] ss:$8 sps:$4 sm:$0xff]  }
  0xff   :  { %2375 = vmatpush1.bf16.msra.mxu1 %v3796_v57  ;;  %v3839_v24 = vld [vmem:[%s5231_s1 + $0x460] ss:$8 sps:$4 sm:$0xff]   ;;  %v3847_v26 = vld [vmem:[%s5231_s1 + $0x474] ss:$8 sps:$4 sm:$0xff]   ;;  %v3845_v29 = vld [vmem:[%s5231_s1 + $0x470] ss:$8 sps:$4 sm:$0xff]  }
 0x100   :  { %2580 = vmatpush1.bf16.msra.mxu0 %v3799_v27  ;;  %2385 = vmatprep.subr.bf16.mxu1 %v3805_v58  ;;  %v3842_v25 = vld [vmem:[%s5231_s1 + $0x960] ss:$8 sps:$4 sm:$0xff]   ;;  %v3850_v28 = vld [vmem:[%s5231_s1 + $0x974] ss:$8 sps:$4 sm:$0xff]   ;;  %v3848_v30 = vld [vmem:[%s5231_s1 + $0x970] ss:$8 sps:$4 sm:$0xff]  }
 0x101   :  { %2590 = vmatprep.subr.bf16.mxu0 %v3808_v49  ;;  %v3853_v31 = vld [vmem:[%s5231_s1 + $0x484] ss:$8 sps:$4 sm:$0xff]   ;;  %v3851_v33 = vld [vmem:[%s5231_s1 + $0x480] ss:$8 sps:$4 sm:$0xff]   ;;  %v3859_v35 = vld [vmem:[%s5231_s1 + $0x494] ss:$8 sps:$4 sm:$0xff]  }
 0x102   :  { %2377 = vmatmul.mubr.bf16.vlgmr.msra.gmra.mrb[0].mxu1 %v161_v61  ;;  %v3856_v32 = vld [vmem:[%s5231_s1 + $0x984] ss:$8 sps:$4 sm:$0xff]   ;;  %v3854_v34 = vld [vmem:[%s5231_s1 + $0x980] ss:$8 sps:$4 sm:$0xff]   ;;  %v3862_v36 = vld [vmem:[%s5231_s1 + $0x994] ss:$8 sps:$4 sm:$0xff]  }
 0x103   :  { %2582 = vmatmul.mubr.bf16.vlgmr.msra.gmra.mrb[0].mxu0 %v171_v62  ;;  %2386 = vmatpush1.bf16.msra.mxu1 %v3803_v63  ;;  %v3857_v38 = vld [vmem:[%s5231_s1 + $0x490] ss:$8 sps:$4 sm:$0xff]   ;;  %v3865_v39 = vld [vmem:[%s5231_s1 + $0x4a4] ss:$8 sps:$4 sm:$0xff]   ;;  %v3863_v45 = vld [vmem:[%s5231_s1 + $0x4a0] ss:$8 sps:$4 sm:$0xff]  }
 0x104   :  { %2591 = vmatpush1.bf16.msra.mxu0 %v3806_v0  ;;  %2387 = vmatprep.subr.bf16.mxu1 %v3811_v1  ;;  %v3860_v40 = vld [vmem:[%s5231_s1 + $0x990] ss:$8 sps:$4 sm:$0xff]   ;;  %v3868_v44 = vld [vmem:[%s5231_s1 + $0x9a4] ss:$8 sps:$4 sm:$0xff]   ;;  %v3866_v46 = vld [vmem:[%s5231_s1 + $0x9a0] ss:$8 sps:$4 sm:$0xff]  }
 0x105   :  { %2592 = vmatprep.subr.bf16.mxu0 %v3814_v41  ;;  %2417 = vmatprep.mubr.bf16.mxu1 %v164_v42  ;;  %v3871_v47 = vld [vmem:[%s5231_s1 + $0x4b4] ss:$8 sps:$4 sm:$0xff]   ;;  %v3869_v50 = vld [vmem:[%s5231_s1 + $0x4b0] ss:$8 sps:$4 sm:$0xff]   ;;  %v3877_v52 = vld [vmem:[%s5231_s1 + $0x4c4] ss:$8 sps:$4 sm:$0xff]  }
 0x106   :  { %2622 = vmatprep.mubr.bf16.mxu0 %v174_v2  ;;  %v3874_v48 = vld [vmem:[%s5231_s1 + $0x9b4] ss:$8 sps:$4 sm:$0xff]   ;;  %v3872_v51 = vld [vmem:[%s5231_s1 + $0x9b0] ss:$8 sps:$4 sm:$0xff]   ;;  %v3880_v53 = vld [vmem:[%s5231_s1 + $0x9c4] ss:$8 sps:$4 sm:$0xff]  }
 0x107   :  { %2388 = vmatpush1.bf16.msra.mxu1 %v3809_v3  ;;  %v3875_v54 = vld [vmem:[%s5231_s1 + $0x4c0] ss:$8 sps:$4 sm:$0xff]   ;;  %v3883_v37 = vld [vmem:[%s5231_s1 + $0x4d4] ss:$8 sps:$4 sm:$0xff]   ;;  %v3881_v27 = vld [vmem:[%s5231_s1 + $0x4d0] ss:$8 sps:$4 sm:$0xff]   ;;  %v163_v3 = vpack.c.bf16 %v4875_v56, %v4875_v56 }
 0x108   :  { %2593 = vmatpush1.bf16.msra.mxu0 %v3812_v4  ;;  %2389 = vmatprep.subr.bf16.mxu1 %v3817_v5  ;;  %v3878_v55 = vld [vmem:[%s5231_s1 + $0x9c0] ss:$8 sps:$4 sm:$0xff]   ;;  %v3886_v57 = vld [vmem:[%s5231_s1 + $0x9d4] ss:$8 sps:$4 sm:$0xff]   ;;  %v3884_v58 = vld [vmem:[%s5231_s1 + $0x9d0] ss:$8 sps:$4 sm:$0xff]   ;;  %v173_v4 = vpack.c.bf16 %v4878_v14, %v4878_v14 }
 0x109   :  { %2594 = vmatprep.subr.bf16.mxu0 %v3820_v6  ;;  %v3889_v49 = vld [vmem:[%s5231_s1 + $0x4e4] ss:$8 sps:$4 sm:$0xff]   ;;  %v3887_v60 = vld [vmem:[%s5231_s1 + $0x4e0] ss:$8 sps:$4 sm:$0xff]   ;;  %v3895_v62 = vld [vmem:[%s5231_s1 + $0x4f4] ss:$8 sps:$4 sm:$0xff]  }
 0x10a   :  { %v3892_v59 = vld [vmem:[%s5231_s1 + $0x9e4] ss:$8 sps:$4 sm:$0xff]   ;;  %v3890_v61 = vld [vmem:[%s5231_s1 + $0x9e0] ss:$8 sps:$4 sm:$0xff]   ;;  %v3898_v63 = vld [vmem:[%s5231_s1 + $0x9f4] ss:$8 sps:$4 sm:$0xff]  }
 0x10b   :  { %2390 = vmatpush1.bf16.msra.mxu1 %v3815_v7  ;;  %v2966_v0 = vld.sshfl [vmem:[%s5230_s0 + $0x28] sm:$0x33 pattern:$0x76325410]  ;;  %v3893_v1 = vld [vmem:[%s5231_s1 + $0x4f0] ss:$8 sps:$4 sm:$0xff]  }
 0x10c   :  { %2595 = vmatpush1.bf16.msra.mxu0 %v3818_v8  ;;  %2391 = vmatprep.subr.bf16.mxu1 %v3823_v9  ;;  %v3896_v41 = vld [vmem:[%s5231_s1 + $0x9f0] ss:$8 sps:$4 sm:$0xff]   ;;  %v132_v42 = vcombine.high %v2966_v0, %v2966_v0  ;;  %v3902_v2 = vld [vmem:[%s5231_s1 + $0xa04] ss:$8 sps:$4 sm:$0xff]   ;;  %v3900_v5 = vld [vmem:[%s5231_s1 + $0xa00] ss:$8 sps:$4 sm:$0xff]  }
 0x10d   :  { %2596 = vmatprep.subr.bf16.mxu0 %v3826_v10  ;;  %v3905_v7 = vld [vmem:[%s5231_s1 + $0xa14] ss:$8 sps:$4 sm:$0xff]   ;;  %v3903_v56 = vld [vmem:[%s5231_s1 + $0xa10] ss:$8 sps:$4 sm:$0xff]   ;;  %v3908_v14 = vld [vmem:[%s5231_s1 + $0xa24] ss:$8 sps:$4 sm:$0xff]  }
 0x10e   :  { %v176_v6 = vpack.c.bf16 %v132_v42, %v132_v42  ;;  %v3906_v8 = vld [vmem:[%s5231_s1 + $0xa20] ss:$8 sps:$4 sm:$0xff]   ;;  %v3911_v9 = vld [vmem:[%s5231_s1 + $0xa34] ss:$8 sps:$4 sm:$0xff]   ;;  %v3909_v10 = vld [vmem:[%s5231_s1 + $0xa30] ss:$8 sps:$4 sm:$0xff]  }
 0x10f   :  { %2392 = vmatpush1.bf16.msra.mxu1 %v3821_v11  ;;  %v3914_v11 = vld [vmem:[%s5231_s1 + $0xa44] ss:$8 sps:$4 sm:$0xff]   ;;  %vm3987_vm1 = vmmov 0   ;;  %vm2907_vm2 = vcmask 523264   ;;  %s3988_s15 = smov [#allocation2]  }
 0x110   :  { %2597 = vmatpush1.bf16.msra.mxu0 %v3824_v12  ;;  %2393 = vmatprep.subr.bf16.mxu1 %v3829_v13  ;;  %v3912_v12 = vld [vmem:[%s5231_s1 + $0xa40] ss:$8 sps:$4 sm:$0xff]   ;;  %v3917_v13 = vld [vmem:[%s5231_s1 + $0xa54] ss:$8 sps:$4 sm:$0xff]  }
 0x111   :  { %2598 = vmatprep.subr.bf16.mxu0 %v3832_v15  ;;  %v3915_v15 = vld [vmem:[%s5231_s1 + $0xa50] ss:$8 sps:$4 sm:$0xff]  }
 0x113   :  { %2394 = vmatpush1.bf16.msra.mxu1 %v3827_v16  ;;  %v3920_v16 = vld [vmem:[%s5231_s1 + $0xa64] ss:$8 sps:$4 sm:$0xff]  }
 0x114   :  { %2599 = vmatpush1.bf16.msra.mxu0 %v3830_v17  ;;  %2395 = vmatprep.subr.bf16.mxu1 %v3835_v18  ;;  %v3918_v17 = vld [vmem:[%s5231_s1 + $0xa60] ss:$8 sps:$4 sm:$0xff]   ;;  %v3923_v18 = vld [vmem:[%s5231_s1 + $0xa74] ss:$8 sps:$4 sm:$0xff]  }
 0x115   :  { %2600 = vmatprep.subr.bf16.mxu0 %v3838_v19  ;;  %v3921_v19 = vld [vmem:[%s5231_s1 + $0xa70] ss:$8 sps:$4 sm:$0xff]  }
 0x117   :  { %2396 = vmatpush1.bf16.msra.mxu1 %v3833_v20  ;;  %v3926_v20 = vld [vmem:[%s5231_s1 + $0xa84] ss:$8 sps:$4 sm:$0xff]  }
 0x118   :  { %2601 = vmatpush1.bf16.msra.mxu0 %v3836_v21  ;;  %2397 = vmatprep.subr.bf16.mxu1 %v3841_v22  ;;  %v3924_v21 = vld [vmem:[%s5231_s1 + $0xa80] ss:$8 sps:$4 sm:$0xff]   ;;  %v175_v22 = vpack.c.bf16 %v2966_v0, %v2966_v0 }
 0x119   :  { %2602 = vmatprep.subr.bf16.mxu0 %v3844_v23  ;;  %v3927_v23 = vld [vmem:[%s5233_s3 + $0x40] sm:$0xff]  }
 0x11b   :  { %2398 = vmatpush1.bf16.msra.mxu1 %v3839_v24  ;;  %v3928_v24 = vld [vmem:[%s5233_s3] sm:$0xff]  }
 0x11c   :  { %2603 = vmatpush1.bf16.msra.mxu0 %v3842_v25  ;;  %2399 = vmatprep.subr.bf16.mxu1 %v3847_v26  ;;  %v3929_v25 = vld [vmem:[%s5233_s3 + $0x48] sm:$0xff]  }
 0x11d   :  { %2604 = vmatprep.subr.bf16.mxu0 %v3850_v28  ;;  %v3930_v26 = vld [vmem:[%s5233_s3 + $0x8] sm:$0xff]   ;;  %v3931_v28 = vld [vmem:[%s5233_s3 + $0x50] sm:$0xff]  }
 0x11f   :  { %2400 = vmatpush1.bf16.msra.mxu1 %v3845_v29  ;;  %v3932_v29 = vld [vmem:[%s5233_s3 + $0x10] sm:$0xff]  }
 0x120   :  { %2605 = vmatpush1.bf16.msra.mxu0 %v3848_v30  ;;  %2401 = vmatprep.subr.bf16.mxu1 %v3853_v31  ;;  %v3933_v30 = vld [vmem:[%s5233_s3 + $0x58] sm:$0xff]  }
 0x121   :  { %2606 = vmatprep.subr.bf16.mxu0 %v3856_v32  ;;  %v3934_v31 = vld [vmem:[%s5233_s3 + $0x18] sm:$0xff]   ;;  %v3935_v32 = vld [vmem:[%s5233_s3 + $0x60] sm:$0xff]  }
 0x123   :  { %2402 = vmatpush1.bf16.msra.mxu1 %v3851_v33  ;;  %v3936_v33 = vld [vmem:[%s5233_s3 + $0x20] sm:$0xff]  }
 0x124   :  { %2607 = vmatpush1.bf16.msra.mxu0 %v3854_v34  ;;  %2403 = vmatprep.subr.bf16.mxu1 %v3859_v35  ;;  %v3937_v34 = vld [vmem:[%s5233_s3 + $0x68] sm:$0xff]  }
 0x125   :  { %2608 = vmatprep.subr.bf16.mxu0 %v3862_v36  ;;  %v3938_v35 = vld [vmem:[%s5233_s3 + $0x28] sm:$0xff]   ;;  %v3939_v36 = vld [vmem:[%s5233_s3 + $0x70] sm:$0xff]  }
 0x127   :  { %2404 = vmatpush1.bf16.msra.mxu1 %v3857_v38  ;;  %v3940_v38 = vld [vmem:[%s5233_s3 + $0x30] sm:$0xff]  }
 0x128   :  { %2609 = vmatpush1.bf16.msra.mxu0 %v3860_v40  ;;  %2405 = vmatprep.subr.bf16.mxu1 %v3865_v39  ;;  %v3941_v40 = vld [vmem:[%s5233_s3 + $0x78] sm:$0xff]  }
 0x129   :  { %2610 = vmatprep.subr.bf16.mxu0 %v3868_v44  ;;  %v3942_v39 = vld [vmem:[%s5233_s3 + $0x38] sm:$0xff]  }
 0x12b   :  { %2406 = vmatpush1.bf16.msra.mxu1 %v3863_v45 }
 0x12c   :  { %2611 = vmatpush1.bf16.msra.mxu0 %v3866_v46  ;;  %2407 = vmatprep.subr.bf16.mxu1 %v3871_v47 }
 0x12d   :  { %2612 = vmatprep.subr.bf16.mxu0 %v3874_v48  ;;  %v519_v48 = vsub.s32 0, %v4146_v43 }
 0x12f   :  { %2408 = vmatpush1.bf16.msra.mxu1 %v3869_v50  ;;  %v515_v50 = vld [vmem:[%s5232_s2] sm:$0x3] }
 0x130   :  { %2613 = vmatpush1.bf16.msra.mxu0 %v3872_v51  ;;  %2409 = vmatprep.subr.bf16.mxu1 %v3877_v52  ;;  %v523_v51 = vsub.s32 1, %v4146_v43  ;;  %v520_v52 = vrot.slane %v515_v50, %v519_v48 }
 0x131   :  { %2614 = vmatprep.subr.bf16.mxu0 %v3880_v53 }
 0x132   :  { %v524_v53 = vrot.slane %v515_v50, %v523_v51 }
 0x133   :  { %2410 = vmatpush1.bf16.msra.mxu1 %v3875_v54 }
 0x134   :  { %2615 = vmatpush1.bf16.msra.mxu0 %v3878_v55  ;;  %2411 = vmatprep.subr.bf16.mxu1 %v3883_v37 }
 0x135   :  { %2616 = vmatprep.subr.bf16.mxu0 %v3886_v57 }
 0x137   :  { %2412 = vmatpush1.bf16.msra.mxu1 %v3881_v27 }
 0x138   :  { %2617 = vmatpush1.bf16.msra.mxu0 %v3884_v58  ;;  %2413 = vmatprep.subr.bf16.mxu1 %v3889_v49 }
 0x139   :  { %2618 = vmatprep.subr.bf16.mxu0 %v3892_v59 }
 0x13b   :  { %2414 = vmatpush1.bf16.msra.mxu1 %v3887_v60 }
 0x13c   :  { %2619 = vmatpush1.bf16.msra.mxu0 %v3890_v61  ;;  %2415 = vmatprep.subr.bf16.mxu1 %v3895_v62 }
 0x13d   :  { %2620 = vmatprep.subr.bf16.mxu0 %v3898_v63 }
 0x13f   :  { %2416 = vmatpush1.bf16.msra.mxu1 %v3893_v1 }
 0x140   :  { %2621 = vmatpush1.bf16.msra.mxu0 %v3896_v41  ;;  %3332 = vmatprep.subr.bf16.mxu1 %v3927_v23 }
 0x141   :  { %2631 = vmatprep.subr.bf16.mxu0 %v3902_v2 }
 0x142   :  { %2418 = vmatmul.mubr.bf16.vlgmr.msra.gmra.mrb[0].mxu1 %v163_v3  ;;  %v3943_v3 = vld [vmem:[%s5235_s5] sm:$0xff]  }
 0x143   :  { %2623 = vmatmul.mubr.bf16.vlgmr.msra.gmra.mrb[0].mxu0 %v173_v4  ;;  %3333 = vmatpush3.bf16.msra.mxu1 %v3928_v24  ;;  %v3986_v4 = vmov 0.0  }
 0x144   :  { %2632 = vmatpush1.bf16.msra.mxu0 %v3900_v5  ;;  %3305 = vmatprep.mubr.msk.bf16.mxu0 %vm2217_vm0, %v176_v6  ;;  %v3944_v5 = vld [vmem:[%s5235_s5 + $0x8] sm:$0xff]   ;;  %v3945_v6 = vld [vmem:[%s5235_s5 + $0x10] sm:$0xff]  }
 0x145   :  { %2633 = vmatprep.subr.bf16.mxu0 %v3905_v7  ;;  %3334 = vmatprep.subr.bf16.mxu1 %v3929_v25  ;;  %v3946_v7 = vld [vmem:[%s5235_s5 + $0x18] sm:$0xff]  }
 0x147   :  { %3335 = vmatpush3.bf16.msra.mxu1 %v3930_v26 }
 0x148   :  { %2634 = vmatpush1.bf16.msra.mxu0 %v3903_v56  ;;  %3336 = vmatprep.subr.bf16.mxu1 %v3931_v28 }
 0x149   :  { %2635 = vmatprep.subr.bf16.mxu0 %v3908_v14  ;;  %v3308_v14 = vld [vmem:[%s5234_s4] ss:$0 sm:$0xff]  ;;  %s2958_s4 = sshll.u32 %s3988_s15, 4  ;;  %s2959_s4 = int_to_ptr.vmem [resolvable:$true] %s2958_s4 }
 0x14a   :  { %s3961_s16 = scalar_lea.vmem %s2959_s4, 32  ;;  %p3966_p1 = scmp.lt.s32.totalorder %s2959_s4, %s2959_s4 }
 0x14b   :  { %3337 = vmatpush3.bf16.msra.mxu1 %v3932_v29  ;;  %p3962_p0 = scmp.ne.s32.totalorder %s2959_s4, %s3961_s16  ;;  %p3967_p2 = scmp.lt.s32.totalorder %s3961_s16, %s3961_s16 }
 0x14c   :  { %2636 = vmatpush1.bf16.msra.mxu0 %v3906_v8  ;;  %3338 = vmatprep.subr.bf16.mxu1 %v3933_v30 }
 0x14d   :  { %2637 = vmatprep.subr.bf16.mxu0 %v3911_v9  ;;  %p3968_p3 = por %p3967_p2, %p3966_p1 }
 0x14f   :  { %3339 = vmatpush3.bf16.msra.mxu1 %v3934_v31  ;;  %p3969_p4 = pnand %p3968_p3, %p3962_p0 }
 0x150   :  { %2638 = vmatpush1.bf16.msra.mxu0 %v3909_v10  ;;  %3340 = vmatprep.subr.bf16.mxu1 %v3935_v32 }
 0x151   :  { %2639 = vmatprep.subr.bf16.mxu0 %v3914_v11 }
 0x153   :  { %3341 = vmatpush3.bf16.msra.mxu1 %v3936_v33 }
 0x154   :  { %2640 = vmatpush1.bf16.msra.mxu0 %v3912_v12  ;;  %3342 = vmatprep.subr.bf16.mxu1 %v3937_v34 }
 0x155   :  { %2641 = vmatprep.subr.bf16.mxu0 %v3917_v13 }
 0x157   :  { %3343 = vmatpush3.bf16.msra.mxu1 %v3938_v35 }
 0x158   :  { %2642 = vmatpush1.bf16.msra.mxu0 %v3915_v15  ;;  %3344 = vmatprep.subr.bf16.mxu1 %v3939_v36 }
 0x159   :  { %2643 = vmatprep.subr.bf16.mxu0 %v3920_v16 }
 0x15b   :  { %3345 = vmatpush3.bf16.msra.mxu1 %v3940_v38 }
 0x15c   :  { %2644 = vmatpush1.bf16.msra.mxu0 %v3918_v17  ;;  %3346 = vmatprep.subr.bf16.mxu1 %v3941_v40 }
 0x15d   :  { %2645 = vmatprep.subr.bf16.mxu0 %v3923_v18 }
 0x15f   :  { %3347 = vmatpush3.bf16.msra.mxu1 %v3942_v39 }
 0x160   :  { %2646 = vmatpush1.bf16.msra.mxu0 %v3921_v19  ;;  %3359 = vmatprep.subr.bf16.mxu1 %v3986_v4  ;;  %v3326_v19 = vld [vmem:[%s5236_s6] ss:$0 sm:$0xff] }
 0x161   :  { %2647 = vmatprep.subr.bf16.mxu0 %v3926_v20 }
 0x164   :  { %2648 = vmatpush1.bf16.msra.mxu0 %v3924_v21 }
 0x167   :  { %2664 = vmatmul.mubr.bf16.vlgmr.msra.gmra.mrb[0].mxu0 %v175_v22 }
 0x215   :  { %v2419_v44 = vpop.f32.mrb[0].mxu1 }
 0x216   :  { %v2421_v45 = vpop.f32.mrb[1].mxu1  ;;  %v3371_v54 = vadd.f32 %v2419_v44, %v520_v52 }
 0x217   :  { %v2423_v46 = vpop.f32.mrb[2].mxu1  ;;  %v3373_v55 = vadd.f32 %v2421_v45, %v524_v53 }
 0x218   :  { %v2424_v47 = vpop.f32.mrb[3].mxu1 }
 0x23a   :  { %v2665_v37 = vpop.f32.mrb[0].mxu0 }
 0x23b   :  { %v3372_v57 = vadd.f32 %v3371_v54, %v2665_v37  ;;  %v2667_v27 = vpop.f32.mrb[1].mxu0 }
 0x23c   :  { %v3374_v58 = vadd.f32 %v3373_v55, %v2667_v27  ;;  %v2669_v49 = vpop.f32.mrb[2].mxu0 }
 0x23d   :  { %v3306_v59 = vmul.f32 -1.442695, %v3372_v57  ;;  %v2670_v60 = vpop.f32.mrb[3].mxu0 }
 0x23e   :  { %v3307_v61 = vmul.f32 -1.442695, %v3374_v58 }
 0x23f   :  { %3947 = vpow2.f32 %v3306_v59 }
 0x240   :  { %3949 = vpow2.f32 %v3307_v61 }
 0x249   :  { %v3948_v62 = vpop.eup %3947 }
 0x24a   :  { %v3950_v63 = vpop.eup %3949  ;;  %v2678_v0 = vadd.f32 1.0, %v3948_v62 }
 0x24b   :  { %v2679_v1 = vadd.f32 1.0, %v3950_v63 }
 0x24c   :  { %3951 = vrcp.f32 %v2678_v0 }
 0x24d   :  { %3953 = vrcp.f32 %v2679_v1 }
 0x256   :  { %v3952_v43 = vpop.eup %3951 }
 0x257   :  { %v3954_v41 = vpop.eup %3953  ;;  %v2684_v2 = vpack.c.bf16 %v3952_v43, %v3952_v43 }
 0x258   :  { %v2685_v42 = vpack.c.bf16 %v3954_v41, %v3954_v41 }
 0x25a   :  { %2853 = vmatprep.mubr.bf16.mxu1 %v2685_v42 }
 0x25b   :  { %2854 = vmatmul.mubr.bf16.vlgmr.msra.gmra.mrb[4].mxu1 %v2684_v2 }
 0x25c   :  { %3360 = vmatpush3.bf16.msra.mxu1 %v3943_v3  ;;  %3367 = vmatprep.mubr.msk.bf16.mxu1 %vm3987_vm1, %v3986_v4 }
 0x25d   :  { %3361 = vmatprep.subr.bf16.mxu1 %v3986_v4 }
 0x260   :  { %3362 = vmatpush3.bf16.msra.mxu1 %v3944_v5 }
 0x261   :  { %3363 = vmatprep.subr.bf16.mxu1 %v3986_v4 }
 0x264   :  { %3364 = vmatpush3.bf16.msra.mxu1 %v3945_v6 }
 0x265   :  { %3365 = vmatprep.subr.bf16.mxu1 %v3986_v4 }
 0x268   :  { %3366 = vmatpush3.bf16.msra.mxu1 %v3946_v7 }
 0x32e   :  { %v3348_v56 = vpop.f32.mrb[4].mxu1 }
 0x32f   :  { %v3349_v8 = vpop.f32.mrb[5].mxu1 }
 0x330   :  { %v3350_v9 = vadd.f32 %v3349_v8, %v3348_v56  ;;  %v3351_v10 = vpop.f32.mrb[6].mxu1 }
 0x331   :  { %v3352_v11 = vpop.f32.mrb[7].mxu1 }
 0x332   :  { %v2856_v12 = vadd.f32 %v3350_v9, %v3308_v14 }
 0x334   :  { %v3325_v13 = vmul.f32 -1.442695, %v2856_v12 }
 0x336   :  { %3955 = vpow2.f32 %v3325_v13 }
 0x340   :  { %v3956_v15 = vpop.eup %3955 }
 0x341   :  { %v2864_v16 = vadd.f32 1.0, %v3956_v15 }
 0x343   :  { %3957 = vrcp.f32 %v2864_v16 }
 0x34d   :  { %v3958_v17 = vpop.eup %3957 }
 0x34e   :  { %v2867_v18 = vpack.c.bf16 %v3958_v17, %v3958_v17 }
 0x350   :  { %3368 = vmatmul.mubr.msk.bf16.vlgmr.msra.gmra.mrb[8].mxu1 %vm2907_vm2, %v2867_v18 }
 0x423   :  { %v2945_v20 = vpop.f32.mrb[8].mxu1 }
 0x424   :  { %v2946_v21 = vadd.f32 %v3326_v19, %v2945_v20  ;;  %v3369_v22 = vpop.f32.mrb[9].mxu1 }
 0x425   :  { %v2948_v23 = vpop.f32.mrb[10].mxu1 }
 0x426   :  { %2951 = vst [vmem:[#allocation2] sm:$0x3] %v2946_v21  ;;  %v3370_v24 = vpop.f32.mrb[11].mxu1 }
 0x427   :  { %3972 = shalt.err (!%p3969_p4)
}
 0x428   :  { %s3973_s6 = scalar_lea.hbm %s5237_s7, 32 }
 0x429   :  { %p3974_p5 = scmp.ne.s32.totalorder %s5237_s7, %s3973_s6  ;;  %p3977_p6 = scmp.lt.u32.totalorder %s3973_s6, %s5237_s7 }
 0x42b   :  { %p3979_p7 = pnand %p3977_p6, %p3974_p5 }
 0x42d   :  { %3982 = shalt.err (!%p3979_p7)
}
 0x42e   :  { %2961 = dma.vmem_to_hbm [thread:$0]  %s2959_s4, 32, %s5237_s7, [#allocation3]  }
 0x42f   :  { %3983 = dma.done.wait [#allocation3], 32  }
 0x430   :  { %3984 = vsyncadd [#allocation3], 4294967264 }
 0x431   :  { %2965 = vsyncpa [#allocation3], 1 }

</bundles_post_ra>
